<compile_context>
chip_gen: v7x
topology: tpu7x:2x2x1
jax: 0.10.0
libtpu: 0.0.40
codegen_flags: <defaults>
</compile_context>

<pallas_src>
import jax
import jax.numpy as jnp
import numpy as np
from jax.experimental import pallas as pl
from jax.experimental.pallas import tpu as pltpu


def _round_up(x, m):
    return ((x + m - 1) // m) * m


def ggnn_readout_kernel(ids_ref, hx_ref, wg_ref, bg_ref, wp_ref, out_ref, pooled_acc):
    i = pl.program_id(1)
    g_pad, d_pad = pooled_acc.shape

    # ---- init the resident pooled accumulator (and defensively zero the output block)
    #      on the first node tile of this split ----
    @pl.when(i == 0)
    def _():
        pooled_acc[...] = jnp.zeros_like(pooled_acc)
        out_ref[...] = jnp.zeros_like(out_ref)

    hx = hx_ref[...]                                    # [tile_n, 2*D_pad] bf16

    # ---- fused gating matmul: z = hx @ [[Wl_h, Wr_h], [Wl_x, Wr_x]] + [bl | br] ----
    z = jnp.dot(hx, wg_ref[...], preferred_element_type=jnp.float32) + bg_ref[...]
    zl = z[:, :d_pad]                                   # classifier_l pre-activation
    zr = z[:, d_pad:]                                   # classifier_r pre-activation

    # sigmoid via the exact tanh identity (single EUP op), tanh gate on EUP as well
    gate_l = 0.5 * (jnp.tanh(0.5 * zl) + 1.0)
    gated = (gate_l * jnp.tanh(zr)).astype(jnp.bfloat16)   # [tile_n, D_pad]

    # ---- global_add_pool: one-hot built on the fly from graph ids, pooled on the MXU ----
    ids = ids_ref[...]                                  # [1, tile_n] int32 (-1 = padding)
    giota = jax.lax.broadcasted_iota(jnp.int32, (g_pad, ids.shape[1]), 0)
    onehot = (ids == giota).astype(jnp.bfloat16)        # [G_pad, tile_n]
    pooled_acc[...] += jnp.dot(onehot, gated, preferred_element_type=jnp.float32)

    # ---- last tile of this split: all max_seq_len heads as one lane-dense matmul ----
    # (bias is added in the wrapper after summing the per-split partials)
    @pl.when(i == pl.num_programs(1) - 1)
    def _():
        out_ref[...] = jnp.dot(pooled_acc[...].astype(jnp.bfloat16), wp_ref[...],
                               preferred_element_type=jnp.float32).astype(out_ref.dtype)


def ggnn_readout_forward(h_final, x_enc, batch, num_graphs,
                         w_l, b_l, w_r, b_r, w_pred, b_pred,
                         *, tile_n=1024, num_node_splits=2):
    """Fused GGNN readout.

    h_final: [N, D]   final-layer node states (output of the GatedGraphConv stack)
    x_enc:   [N, D]   encoded node features (output of node_encoder)
    batch:   [N]      graph id per node (ids must be < num_graphs; others are dropped)
    w_l/w_r: [D, 2D]  classifier_l / classifier_r nn.Linear weights (PyTorch layout)
    b_l/b_r: [D]
    w_pred:  [L, V, D] stacked graph_pred_linear_list weights, b_pred: [L, V]
    returns: [L, num_graphs, V]  (== torch.stack(pred_list))
    """
    f32, bf16 = jnp.float32, jnp.bfloat16
    N, D = h_final.shape
    L, V, D2 = w_pred.shape
    assert D2 == D and x_enc.shape == (N, D)
    assert w_l.shape == (D, 2 * D) and w_r.shape == (D, 2 * D)

    # lane-dense padding
    D_pad = _round_up(D, 128)
    V_pad = _round_up(V, 128)
    G_pad = _round_up(max(int(num_graphs), 1), 8)
    N_pad = _round_up(N, num_node_splits * tile_n)
    tiles_per_split = N_pad // (num_node_splits * tile_n)
    LVp = L * V_pad

    def pad2(a, r, c):
        return jnp.pad(a, ((0, r - a.shape[0]), (0, c - a.shape[1])))

    # dominant HBM stream: pre-concatenated [h | x] in bf16 (f32 accumulation in-kernel).
    # NOTE: upstream should ideally hand these over already in bf16 to avoid this cast pass.
    h_p = pad2(jnp.asarray(h_final).astype(bf16), N_pad, D_pad)
    x_p = pad2(jnp.asarray(x_enc).astype(bf16), N_pad, D_pad)
    hx_p = jnp.concatenate([h_p, x_p], axis=1)                      # [N_pad, 2*D_pad] bf16

    # graph ids as a [1, N_pad] int32 row; padded nodes get id -1 -> contribute 0
    batch_ids = jnp.concatenate([jnp.asarray(batch, jnp.int32),
                                 jnp.full((N_pad - N,), -1, jnp.int32)]).reshape(1, N_pad)

    # fused gating weight [[Wl_h, Wr_h], [Wl_x, Wr_x]] (transposed to [in, out]) + bias
    wl = jnp.asarray(w_l, f32)
    wr = jnp.asarray(w_r, f32)
    wlh = pad2(wl[:, :D].T, D_pad, D_pad)
    wlx = pad2(wl[:, D:].T, D_pad, D_pad)
    wrh = pad2(wr[:, :D].T, D_pad, D_pad)
    wrx = pad2(wr[:, D:].T, D_pad, D_pad)
    w_gate = jnp.concatenate(
        [jnp.concatenate([wlh, wrh], axis=1),
         jnp.concatenate([wlx, wrx], axis=1)], axis=0).astype(bf16)  # [2*D_pad, 2*D_pad]
    b_gate = jnp.concatenate(
        [pad2(jnp.asarray(b_l, f32).reshape(1, D), 1, D_pad),
         pad2(jnp.asarray(b_r, f32).reshape(1, D), 1, D_pad)], axis=1)  # [1, 2*D_pad] f32

    # stacked prediction heads -> one lane-dense [D_pad, L*V_pad] bf16 weight (resident)
    wp = jnp.transpose(jnp.asarray(w_pred, f32), (2, 0, 1))          # [D, L, V]
    wp = jnp.pad(wp, ((0, D_pad - D), (0, 0), (0, V_pad - V)))       # [D_pad, L, V_pad]
    wp = wp.reshape(D_pad, LVp).astype(bf16)

    grid = (num_node_splits, tiles_per_split)

    # VMEM budget from the actual footprint (+ headroom for compiler internal scratch)
    db = 2                                             # default double-buffering
    vmem_bytes = (
        db * tile_n * 2 * D_pad * 2                    # hx tile stream (bf16)
        + db * 8 * tile_n * 4                          # graph-id tile (i32, sublane-padded)
        + db * 2 * D_pad * 2 * D_pad * 2               # fused gating weight (bf16, resident)
        + db * 8 * 2 * D_pad * 4                       # gating bias (f32, sublane-padded)
        + db * D_pad * LVp * 2                         # stacked pred-head weight (bf16)
        + db * G_pad * LVp * 4                         # output block (f32)
        + G_pad * D_pad * 4                            # pooled accumulator scratch (f32)
    )
    vmem_limit = int(vmem_bytes + 8 * 2**20)

    out_partial = pl.pallas_call(
        ggnn_readout_kernel,
        out_shape=jax.ShapeDtypeStruct((num_node_splits, G_pad, LVp), f32),
        grid=grid,
        in_specs=[
            pl.BlockSpec((1, tile_n),
                         lambda c, i: (0, c * tiles_per_split + i)),        # graph ids
            pl.BlockSpec((tile_n, 2 * D_pad),
                         lambda c, i: (c * tiles_per_split + i, 0)),        # hx tile
            pl.BlockSpec((2 * D_pad, 2 * D_pad), lambda c, i: (0, 0)),      # fused W_gate
            pl.BlockSpec((1, 2 * D_pad), lambda c, i: (0, 0)),              # fused b_gate
            pl.BlockSpec((D_pad, LVp), lambda c, i: (0, 0)),                # stacked W_pred
        ],
        out_specs=pl.BlockSpec((None, G_pad, LVp), lambda c, i: (c, 0, 0)),
        scratch_shapes=[pltpu.VMEM((G_pad, D_pad), f32)],                   # pooled acc
        compiler_params=pltpu.CompilerParams(
            dimension_semantics=("parallel", "arbitrary"),   # splits parallel, node axis
            vmem_limit_bytes=vmem_limit),                    # is a reduction
    )(batch_ids, hx_p, w_gate, b_gate, wp)

    # combine per-split partial predictions (head is linear), add bias, unpad
    pred = out_partial.sum(axis=0)[:num_graphs]                      # [G, L*V_pad]
    pred = pred.reshape(num_graphs, L, V_pad)[:, :, :V]
    pred = pred + jnp.asarray(b_pred, f32)[None, :, :]
    return jnp.transpose(pred, (1, 0, 2))                            # [L, G, V]


def _glorot(key, shape):
    fan_out, fan_in = shape[-2], shape[-1]
    limit = np.sqrt(6.0 / (fan_in + fan_out))
    return jax.random.uniform(key, shape, jnp.float32, minval=-limit, maxval=limit)


if __name__ == "__main__":
    # Small shapes consistent with the module: a few thousand nodes, a handful of graphs,
    # a few sequence positions / vocab entries.
    N, D = 5000, 128                 # nodes, emb_dim (N not a tile multiple on purpose)
    num_graphs = 8
    max_seq_len, num_vocab = 4, 20

    key = jax.random.PRNGKey(0)
    ks = jax.random.split(key, 9)

    # stand-ins for node_encoder / GatedGraphConv_EType outputs (see TODOs above)
    h_final = jax.random.normal(ks[0], (N, D), jnp.float32)
    x_enc = jax.random.normal(ks[1], (N, D), jnp.float32)
    batch = jnp.sort(jax.random.randint(ks[2], (N,), 0, num_graphs))

    w_l = _glorot(ks[3], (D, 2 * D))
    b_l = 0.1 * jax.random.normal(ks[4], (D,), jnp.float32)
    w_r = _glorot(ks[5], (D, 2 * D))
    b_r = 0.1 * jax.random.normal(ks[6], (D,), jnp.float32)
    w_pred = _glorot(ks[7], (max_seq_len, num_vocab, D))
    b_pred = 0.1 * jax.random.normal(ks[8], (max_seq_len, num_vocab), jnp.float32)

    out = ggnn_readout_forward(h_final, x_enc, batch, num_graphs,
                               w_l, b_l, w_r, b_r, w_pred, b_pred,
                               tile_n=1024, num_node_splits=2)
    out = jax.block_until_ready(out)

    # Pure-JAX reference with the same quantization choices the kernel makes
    # (bf16 gating inputs/weights, bf16 gated for pooling, bf16 head weights/pooled,
    #  f32 math and f32 accumulation everywhere), so the comparison isolates kernel
    # correctness rather than the deliberate bf16 deviation from the f32 torch module.
    hi = jax.lax.Precision.HIGHEST
    hb = h_final.astype(jnp.bfloat16).astype(jnp.float32)
    xb = x_enc.astype(jnp.bfloat16).astype(jnp.float32)
    wlb = w_l.astype(jnp.bfloat16).astype(jnp.float32)
    wrb = w_r.astype(jnp.bfloat16).astype(jnp.float32)
    hx = jnp.concatenate([hb, xb], axis=-1)
    gated_ref = (jax.nn.sigmoid(jnp.dot(hx, wlb.T, precision=hi) + b_l)
                 * jnp.tanh(jnp.dot(hx, wrb.T, precision=hi) + b_r))
    gated_ref = gated_ref.astype(jnp.bfloat16).astype(jnp.float32)
    pooled_ref = jax.ops.segment_sum(gated_ref, batch, num_segments=num_graphs)
    pooled_b = pooled_ref.astype(jnp.bfloat16).astype(jnp.float32)
    wpb = w_pred.astype(jnp.bfloat16).astype(jnp.float32)
    ref = jnp.stack([jnp.dot(pooled_b, wpb[i].T, precision=hi) + b_pred[i]
                     for i in range(max_seq_len)], axis=0)

    np.testing.assert_allclose(np.asarray(out), np.asarray(ref), rtol=2e-2, atol=2e-2)

    pred_list = list(out)   # mirrors the module's list-of-[G, num_vocab] return
    assert len(pred_list) == max_seq_len and pred_list[0].shape == (num_graphs, num_vocab)

    print("KERNEL_OK")
</pallas_src>

<mosaic_0001>
module attributes {stable_mosaic.version = 11 : i64} {
  func.func @ggnn_readout_kernel(%arg0: i32, %arg1: i32, %arg2: memref<1x1024xi32, #tpu.memory_space<vmem>>, %arg3: memref<1024x256xbf16, #tpu.memory_space<vmem>>, %arg4: memref<256x256xbf16, #tpu.memory_space<vmem>>, %arg5: memref<1x256xf32, #tpu.memory_space<vmem>>, %arg6: memref<128x512xbf16, #tpu.memory_space<vmem>>, %arg7: memref<1x8x512xf32, #tpu.memory_space<vmem>>, %arg8: memref<8x128xf32, #tpu.memory_space<vmem>>) attributes {dimension_semantics = [#tpu.dimension_semantics<parallel>, #tpu.dimension_semantics<arbitrary>], iteration_bounds = array<i64: 2, 3>, scalar_prefetch = 0 : i64, scratch_operands = 1 : i64, tpu.core_type = #tpu.core_type<tc>, window_params = [{transform_indices = @transform_0, window_bounds = array<i64: 1, 1024>}, {transform_indices = @transform_1, window_bounds = array<i64: 1024, 256>}, {pipeline_mode = #tpu.pipeline_mode<synchronous>, transform_indices = @transform_2, window_bounds = array<i64: 256, 256>}, {pipeline_mode = #tpu.pipeline_mode<synchronous>, transform_indices = @transform_3, window_bounds = array<i64: 1, 256>}, {pipeline_mode = #tpu.pipeline_mode<synchronous>, transform_indices = @transform_4, window_bounds = array<i64: 128, 512>}, {transform_indices = @transform_5, window_bounds = array<i64: 1, 8, 512>}]} {
    %c0_i32 = arith.constant 0 : i32
    %0 = arith.cmpi eq, %arg1, %c0_i32 : i32
    %1 = arith.extui %0 : i1 to i32
    %c0_i32_0 = arith.constant 0 : i32
    %2 = arith.cmpi ne, %1, %c0_i32_0 : i32
    scf.if %2 {
      %cst_17 = arith.constant 0.000000e+00 : f32
      %35 = vector.broadcast %cst_17 : f32 to vector<8x128xf32>
      %c0_18 = arith.constant 0 : index
      %c0_19 = arith.constant 0 : index
      %36 = vector.load %arg8[%c0_18, %c0_19] : memref<8x128xf32, #tpu.memory_space<vmem>>, vector<8x128xf32>
      tpu.vector_store %arg8[%c0_18, %c0_19], %35 {strides = array<i32>} : memref<8x128xf32, #tpu.memory_space<vmem>>, vector<8x128xf32>,
      %cst_20 = arith.constant 0.000000e+00 : f32
      %37 = vector.broadcast %cst_20 : f32 to vector<8x512xf32>
      %c0_21 = arith.constant 0 : index
      %c0_22 = arith.constant 0 : index
      %c0_23 = arith.constant 0 : index
      %38 = vector.load %arg7[%c0_21, %c0_22, %c0_23] : memref<1x8x512xf32, #tpu.memory_space<vmem>>, vector<1x8x512xf32>
      %39 = vector.shape_cast %38 : vector<1x8x512xf32> to vector<8x512xf32>
      %40 = vector.shape_cast %37 : vector<8x512xf32> to vector<1x8x512xf32>
      tpu.vector_store %arg7[%c0_21, %c0_22, %c0_23], %40 {strides = array<i32>} : memref<1x8x512xf32, #tpu.memory_space<vmem>>, vector<1x8x512xf32>,
    } else {
    }
    %c0 = arith.constant 0 : index
    %c0_1 = arith.constant 0 : index
    %3 = vector.load %arg3[%c0, %c0_1] : memref<1024x256xbf16, #tpu.memory_space<vmem>>, vector<1024x256xbf16>
    %c0_2 = arith.constant 0 : index
    %c0_3 = arith.constant 0 : index
    %4 = vector.load %arg4[%c0_2, %c0_3] : memref<256x256xbf16, #tpu.memory_space<vmem>>, vector<256x256xbf16>
    %cst = arith.constant dense<0.000000e+00> : vector<1024x256xf32>
    %5 = tpu.matmul %3, %4, %cst {dimension_numbers = #tpu.dot_dimension_numbers<[1], [0], [0], [1], [0, 0, 1, 1], [], []>} : vector<1024x256xbf16>, vector<256x256xbf16>, vector<1024x256xf32> -> vector<1024x256xf32>
    %c0_4 = arith.constant 0 : index
    %c0_5 = arith.constant 0 : index
    %6 = vector.load %arg5[%c0_4, %c0_5] : memref<1x256xf32, #tpu.memory_space<vmem>>, vector<1x256xf32>
    %7 = vector.broadcast %6 : vector<1x256xf32> to vector<1024x256xf32>
    %8 = arith.addf %5, %7 : vector<1024x256xf32>
    %9 = vector.extract_strided_slice %8 {offsets = [0, 0], sizes = [1024, 128], strides = [1, 1]} : vector<1024x256xf32> to vector<1024x128xf32>
    %10 = vector.extract_strided_slice %8 {offsets = [0, 128], sizes = [1024, 128], strides = [1, 1]} : vector<1024x256xf32> to vector<1024x128xf32>
    %cst_6 = arith.constant 5.000000e-01 : f32
    %11 = vector.broadcast %cst_6 : f32 to vector<1024x128xf32>
    %12 = arith.mulf %11, %9 : vector<1024x128xf32>
    %13 = math.tanh %12 : vector<1024x128xf32>
    %cst_7 = arith.constant 1.000000e+00 : f32
    %14 = vector.broadcast %cst_7 : f32 to vector<1024x128xf32>
    %15 = arith.addf %13, %14 : vector<1024x128xf32>
    %cst_8 = arith.constant 5.000000e-01 : f32
    %16 = vector.broadcast %cst_8 : f32 to vector<1024x128xf32>
    %17 = arith.mulf %16, %15 : vector<1024x128xf32>
    %18 = math.tanh %10 : vector<1024x128xf32>
    %19 = arith.mulf %17, %18 : vector<1024x128xf32>
    %20 = arith.truncf %19 : vector<1024x128xf32> to vector<1024x128xbf16>
    %c0_9 = arith.constant 0 : index
    %c0_10 = arith.constant 0 : index
    %21 = vector.load %arg2[%c0_9, %c0_10] : memref<1x1024xi32, #tpu.memory_space<vmem>>, vector<1x1024xi32>
    %22 = tpu.iota {dimensions = array<i32: 0>} : vector<8x1024xi32>
    %23 = vector.broadcast %21 : vector<1x1024xi32> to vector<8x1024xi32>
    %24 = arith.cmpi eq, %23, %22 : vector<8x1024xi32>
    %25 = arith.extui %24 : vector<8x1024xi1> to vector<8x1024xi32>
    %26 = arith.sitofp %25 : vector<8x1024xi32> to vector<8x1024xf32>
    %27 = arith.truncf %26 : vector<8x1024xf32> to vector<8x1024xbf16>
    %c0_11 = arith.constant 0 : index
    %c0_12 = arith.constant 0 : index
    %28 = vector.load %arg8[%c0_11, %c0_12] : memref<8x128xf32, #tpu.memory_space<vmem>>, vector<8x128xf32>
    %cst_13 = arith.constant dense<0.000000e+00> : vector<8x128xf32>
    %29 = tpu.matmul %27, %20, %cst_13 {dimension_numbers = #tpu.dot_dimension_numbers<[1], [0], [0], [1], [0, 0, 1, 1], [], []>} : vector<8x1024xbf16>, vector<1024x128xbf16>, vector<8x128xf32> -> vector<8x128xf32>
    %30 = arith.addf %28, %29 : vector<8x128xf32>
    %c0_14 = arith.constant 0 : index
    %c0_15 = arith.constant 0 : index
    %31 = vector.load %arg8[%c0_14, %c0_15] : memref<8x128xf32, #tpu.memory_space<vmem>>, vector<8x128xf32>
    tpu.vector_store %arg8[%c0_14, %c0_15], %30 {strides = array<i32>} : memref<8x128xf32, #tpu.memory_space<vmem>>, vector<8x128xf32>,
    %c2_i32 = arith.constant 2 : i32
    %32 = arith.cmpi eq, %arg1, %c2_i32 : i32
    %33 = arith.extui %32 : i1 to i32
    %c0_i32_16 = arith.constant 0 : i32
    %34 = arith.cmpi ne, %33, %c0_i32_16 : i32
    scf.if %34 {
      %c0_17 = arith.constant 0 : index
      %c0_18 = arith.constant 0 : index
      %35 = vector.load %arg8[%c0_17, %c0_18] : memref<8x128xf32, #tpu.memory_space<vmem>>, vector<8x128xf32>
      %36 = arith.truncf %35 : vector<8x128xf32> to vector<8x128xbf16>
      %c0_19 = arith.constant 0 : index
      %c0_20 = arith.constant 0 : index
      %37 = vector.load %arg6[%c0_19, %c0_20] : memref<128x512xbf16, #tpu.memory_space<vmem>>, vector<128x512xbf16>
      %cst_21 = arith.constant dense<0.000000e+00> : vector<8x512xf32>
      %38 = tpu.matmul %36, %37, %cst_21 {dimension_numbers = #tpu.dot_dimension_numbers<[1], [0], [0], [1], [0, 0, 1, 1], [], []>} : vector<8x128xbf16>, vector<128x512xbf16>, vector<8x512xf32> -> vector<8x512xf32>
      %c0_22 = arith.constant 0 : index
      %c0_23 = arith.constant 0 : index
      %c0_24 = arith.constant 0 : index
      %39 = vector.load %arg7[%c0_22, %c0_23, %c0_24] : memref<1x8x512xf32, #tpu.memory_space<vmem>>, vector<1x8x512xf32>
      %40 = vector.shape_cast %39 : vector<1x8x512xf32> to vector<8x512xf32>
      %41 = vector.shape_cast %38 : vector<8x512xf32> to vector<1x8x512xf32>
      tpu.vector_store %arg7[%c0_22, %c0_23, %c0_24], %41 {strides = array<i32>} : memref<1x8x512xf32, #tpu.memory_space<vmem>>, vector<1x8x512xf32>,
    } else {
    }
    return
  }
  func.func @transform_0(%arg0: i32, %arg1: i32) -> (i32, i32) {
    %c3_i32 = arith.constant 3 : i32
    %0 = arith.muli %arg0, %c3_i32 : i32
    %1 = arith.addi %0, %arg1 : i32
    %c0_i32 = arith.constant 0 : i32
    %c0_i32_0 = arith.constant 0 : i32
    return %c0_i32, %1 : i32, i32
  }
  func.func @transform_1(%arg0: i32, %arg1: i32) -> (i32, i32) {
    %c3_i32 = arith.constant 3 : i32
    %0 = arith.muli %arg0, %c3_i32 : i32
    %1 = arith.addi %0, %arg1 : i32
    %c0_i32 = arith.constant 0 : i32
    %c0_i32_0 = arith.constant 0 : i32
    return %1, %c0_i32 : i32, i32
  }
  func.func @transform_2(%arg0: i32, %arg1: i32) -> (i32, i32) {
    %c0_i32 = arith.constant 0 : i32
    %c0_i32_0 = arith.constant 0 : i32
    %c0_i32_1 = arith.constant 0 : i32
    return %c0_i32, %c0_i32_0 : i32, i32
  }
  func.func @transform_3(%arg0: i32, %arg1: i32) -> (i32, i32) {
    %c0_i32 = arith.constant 0 : i32
    %c0_i32_0 = arith.constant 0 : i32
    %c0_i32_1 = arith.constant 0 : i32
    return %c0_i32, %c0_i32_0 : i32, i32
  }
  func.func @transform_4(%arg0: i32, %arg1: i32) -> (i32, i32) {
    %c0_i32 = arith.constant 0 : i32
    %c0_i32_0 = arith.constant 0 : i32
    %c0_i32_1 = arith.constant 0 : i32
    return %c0_i32, %c0_i32_0 : i32, i32
  }
  func.func @transform_5(%arg0: i32, %arg1: i32) -> (i32, i32, i32) {
    %c0_i32 = arith.constant 0 : i32
    %c0_i32_0 = arith.constant 0 : i32
    %c0_i32_1 = arith.constant 0 : i32
    return %arg0, %c0_i32, %c0_i32_0 : i32, i32, i32
  }
}

</mosaic_0001>

<bundles_post_ra>
// kernel: tpu_custom_call.1
= control target key start
LH: loop header
LB: loop body
LE: loop exit
PB: predicated region body
PF: predicated region fallthrough
CT: control target
= control target key end

     0   :  { %s6742_s0 = inlined_call_operand.hbm [shape: s32[1,6144], index: 0, kind: input, shape index: {}]   ;;  %s6743_s1 = inlined_call_operand.hbm [shape: bf16[6144,256], index: 1, kind: input, shape index: {}]   ;;  %s6744_s2 = inlined_call_operand.hbm [shape: bf16[256,256], index: 2, kind: input, shape index: {}]   ;;  %s6745_s3 = inlined_call_operand.hbm [shape: f32[1,256], index: 3, kind: input, shape index: {}]   ;;  %s6746_s4 = inlined_call_operand.hbm [shape: bf16[128,512], index: 4, kind: input, shape index: {}]   ;;  %s6747_s5 = inlined_call_operand.hbm [shape: f32[2,8,512], index: 5, kind: output, shape index: {}]  }
   0x1   :  { %6798 = sst [smem:[#allocation75_spill]] %s6744_s2 }
   0x2   :  { %6799 = sst [smem:[#allocation76_spill]] %s6745_s3 }
   0x3   :  { %6800 = sst [smem:[#allocation77_spill]] %s6746_s4 }
   0x4   :  { %6801 = sst [smem:[#allocation78_spill]] %s6747_s5 }
   0x5   :  { %10 = vsyncpa [#allocation4], 0 }
   0x6   :  { %12 = vsyncpa [#allocation4 + $0x1], 0 }
   0x7   :  { %13 = vsyncpa [#allocation7], 0 }
   0x8   :  { %15 = vsyncpa [#allocation7 + $0x1], 0 }
   0x9   :  { %16 = vsyncpa [#allocation10], 0 }
   0xa   :  { %17 = vsyncpa [#allocation5], 0 }
   0xb   :  { %19 = vsyncpa [#allocation5 + $0x1], 0  ;;  %s5142_s18 = smov 0   ;;  %s5144_s19 = smov 0  }
   0xc   :  { %s5146_s20 = smov 0   ;;  %s5148_s21 = smov 0  }
   0xd   :  { %s5150_s22 = smov 0   ;;  %s5152_s23 = smov 0  }
   0xe   :  { %s5154_s24 = smov 0   ;;  %s5156_s25 = smov 0  }
   0xf   :  { %s5158_s26 = smov 0   ;;  %s5160_s27 = smov 0  }
  0x10   :  { %s5162_s28 = smov 0  }
  0x11 LB: > { %6802 = sst [smem:[#allocation18_spill]] %s5057_s18  ;;  %s5196_s29 = sadd.s32 4294967295, %s5097_s28   ;;  %s5097_s28 = sphi %s5162_s28, %s25_s28   ;;  %s5093_s27 = sphi %s5160_s27, %s6997_s27   ;;  %s5089_s26 = sphi %s5158_s26, %s6996_s26   ;;  %s5085_s25 = sphi %s5156_s25, %s6995_s25   ;;  %s5081_s24 = sphi %s5154_s24, %s6986_s24   ;;  %s5077_s23 = sphi %s5152_s23, %s6994_s23   ;;  %s5073_s22 = sphi %s5150_s22, %s6993_s22   ;;  %s5069_s21 = sphi %s5148_s21, %s6992_s21   ;;  %s5065_s20 = sphi %s5146_s20, %s6991_s20   ;;  %s5061_s19 = sphi %s5144_s19, %s6990_s19   ;;  %s5057_s18 = sphi %s5142_s18, %s6989_s18  }
  0x12   : > { %6803 = sst [smem:[#allocation19_spill]] %s5085_s25  ;;  %s3506_s30 = sadd.s32 4294967294, %s5097_s28  }
  0x13   : > { %6804 = sst [smem:[#allocation20_spill]] %s5089_s26  ;;  %p61_p0 = scmp.ne.s32.totalorder %s5073_s22, %s5069_s21 }
  0x14   : > { %p6749_p1 = scmp.eq.s32.totalorder %s5196_s29, 0  ;;  %p177_p2 = scmp.ne.s32.totalorder %s5065_s20, %s5061_s19 }
  0x15   : > { %p178_p3 = scmp.eq.s32.totalorder %s5196_s29, 5  ;;  %p183_p5 = scmp.ne.s32.totalorder %s5061_s19, %s5057_s18 }
  0x16   : > { %p5206_p4 = por %p6749_p1, %p61_p0  ;;  %p184_p7 = scmp.eq.s32.totalorder %s3506_s30, 5 }
  0x17   : > { %p5212_p6 = por %p178_p3, %p177_p2  ;;  %p3507_p8 = scmp.ge.s32.totalorder %s5097_s28, 1 }
  0x18   : > { %s6805_s6 = scalar_select %p5206_p4, 1, 0 }
  0x19   : > { %s6806_s7 = scalar_select %p5212_p6, 1, 0 }
  0x1a   : > { %p191_p9 = scmp.lt.s32.totalorder %s5097_s28, 7  ;;  %p5218_p10 = por %p184_p7, %p183_p5 }
  0x1b   : > { %6807 = sst [smem:[#allocation21_spill]] %s6806_s7  ;;  %s5099_s10 = smov [#allocation8]  }
  0x1c   : > { %s6808_s8 = scalar_select %p5218_p10, 1, 0 }
  0x1d   : > { %p5222_p11 = pnand %p3507_p8, %p191_p9  ;;  %s203_s11 = sshll.u32 %s5099_s10, 4  ;;  %s204_s11 = int_to_ptr.vmem [resolvable:$true] %s203_s11 }
  0x1e   : > { %6809 = sst [smem:[#allocation22_spill]] %s6808_s8  ;;  %s5100_s13 = smov [#allocation9]  }
  0x1f   : > { %s6810_s9 = scalar_select %p5222_p11, 1, 0 }
  0x20   : > { %p3891_p12 = pneg %p5222_p11  ;;  %s217_s14 = sshll.u32 %s5100_s13, 4  ;;  %s5234_s14 = int_to_ptr.vmem [resolvable:$true] %s217_s14 }
  0x21   : > { %s6812_s2 = sld [smem:[#allocation75_spill]] }
  0x22   : > { %p5230_p13 = pnand %p3891_p12, %p6749_p1 }
  0x24   : > { %p5244_p2 = pneg %p5230_p13 }
  0x27   : > { %s4819_s17 = scalar_lea.hbm %s6812_s2, 4096 }
  0x28   : > { %p4820_p0 = scmp.ne.s32.totalorder %s6812_s2, %s4819_s17  ;;  %p4826_p7 = scmp.lt.u32.totalorder %s4819_s17, %s6812_s2 }
  0x2a   : > { %p4822_p3 = pnand %p5244_p2, %p4820_p0 }
  0x2c   : > { %p4823_p5 = pneg %p4822_p3 }
  0x2e   : > { %p4828_p8 = pnand %p4826_p7, %p4823_p5 }
  0x30   : > { %4831 = shalt.err (!%p4828_p8)
}
  0x31   : > { %s4832_s15 = scalar_lea.vmem %s204_s11, 4096  ;;  %p4840_p10 = scmp.lt.s32.totalorder %s204_s11, %s204_s11 }
  0x32   : > { %p4833_p9 = scmp.ne.s32.totalorder %s204_s11, %s4832_s15  ;;  %p4841_p6 = scmp.lt.s32.totalorder %s4832_s15, %s4832_s15 }
  0x34   : > { %p4835_p12 = pnand %p4833_p9, %p5244_p2  ;;  %p4842_p4 = por %p4841_p6, %p4840_p10 }
  0x36   : > { %p4836_p1 = pneg %p4835_p12 }
  0x38   : > { %p4843_p11 = pnand %p4842_p4, %p4836_p1 }
  0x3a   : > { %4846 = shalt.err (!%p4843_p11)
}
  0x3b   : > { %s6757_s16 = smov 128   ;;  %s6758_s21 = smov 8  }
  0x3c   : > { %3894 = dma.hbm_to_vmem [thread:$0]  (!%p5230_p13), %s6812_s2, 4096, %s204_s11, [#allocation7], %s6757_s16, %s6757_s16, %s6758_s21  }
  0x3d   : > { %s6814_s3 = sld [smem:[#allocation76_spill]] }
  0x43   : > { %s4847_s18 = scalar_lea.hbm %s6814_s3, 32 }
  0x44   : > { %p4848_p1 = scmp.ne.s32.totalorder %s6814_s3, %s4847_s18  ;;  %p4854_p10 = scmp.lt.u32.totalorder %s4847_s18, %s6814_s3 }
  0x46   : > { %p4850_p4 = pnand %p4848_p1, %p5244_p2 }
  0x48   : > { %p4851_p6 = pneg %p4850_p4 }
  0x4a   : > { %p4856_p11 = pnand %p4854_p10, %p4851_p6 }
  0x4c   : > { %4859 = shalt.err (!%p4856_p11)
}
  0x4d   : > { %s4860_s11 = scalar_lea.vmem %s5234_s14, 32  ;;  %p4868_p7 = scmp.lt.s32.totalorder %s5234_s14, %s5234_s14 }
  0x4e   : > { %p4861_p0 = scmp.ne.s32.totalorder %s5234_s14, %s4860_s11  ;;  %p4869_p8 = scmp.lt.s32.totalorder %s4860_s11, %s4860_s11 }
  0x50   : > { %p4863_p3 = pnand %p4861_p0, %p5244_p2  ;;  %p4870_p9 = por %p4869_p8, %p4868_p7 }
  0x52   : > { %p4864_p5 = pneg %p4863_p3 }
  0x54   : > { %p4871_p12 = pnand %p4870_p9, %p4864_p5 }
  0x56   : > { %4874 = shalt.err (!%p4871_p12)
}
  0x57   : > { %3897 = dma.hbm_to_vmem [thread:$0]  (!%p5230_p13), %s6814_s3, 32, %s5234_s14, [#allocation10]  }
  0x58   : > { %s5103_s25 = smov [#allocation11]   ;;  %s6815_s4 = sld [smem:[#allocation77_spill]] }
  0x59   : > { %s227_s7 = sshll.u32 %s5103_s25, 4  ;;  %s228_s7 = int_to_ptr.vmem [resolvable:$true] %s227_s7 }
  0x5e   : > { %s4875_s30 = scalar_lea.hbm %s6815_s4, 4096 }
  0x5f   : > { %p4876_p1 = scmp.ne.s32.totalorder %s6815_s4, %s4875_s30  ;;  %p4882_p10 = scmp.lt.u32.totalorder %s4875_s30, %s6815_s4 }
  0x61   : > { %p4878_p4 = pnand %p4876_p1, %p5244_p2 }
  0x63   : > { %p4879_p6 = pneg %p4878_p4 }
  0x65   : > { %p4884_p11 = pnand %p4882_p10, %p4879_p6 }
  0x67   : > { %4887 = shalt.err (!%p4884_p11)
}
  0x68   : > { %s4888_s14 = scalar_lea.vmem %s228_s7, 4096  ;;  %p4896_p7 = scmp.lt.s32.totalorder %s228_s7, %s228_s7 }
  0x69   : > { %p4889_p0 = scmp.ne.s32.totalorder %s228_s7, %s4888_s14  ;;  %p4897_p8 = scmp.lt.s32.totalorder %s4888_s14, %s4888_s14 }
  0x6b   : > { %p4891_p3 = pnand %p4889_p0, %p5244_p2  ;;  %p4898_p9 = por %p4897_p8, %p4896_p7 }
  0x6d   : > { %p4892_p5 = pneg %p4891_p3 }
  0x6f   : > { %p4899_p12 = pnand %p4898_p9, %p4892_p5 }
  0x71   : > { %4902 = shalt.err (!%p4899_p12)
}
  0x72   : > { %s5104_s5 = smov 256   ;;  %s5105_s10 = smov 16  }
  0x73   : > { %3900 = dma.hbm_to_vmem [thread:$0]  (!%p5230_p13), %s6815_s4, 4096, %s228_s7, [#allocation10], %s5104_s5, %s5104_s5, %s5105_s10  }
  0x74   : > { %s34_s25 = sadd.s32 1, %s5089_s26  ;;  %s37_s8 = sadd.s32 1, %s5093_s27 }
  0x75   : > { %p35_p2 = scmp.ge.s32.totalorder %s34_s25, 3  ;;  %s41_s17 = smul.u32 3, %s5093_s27 }
  0x76   : > { %s48_s30 = sadd.s32 1, %s5077_s23  ;;  %p55_p1 = scmp.ne.s32.totalorder %s5077_s23, %s5073_s22 }
  0x77   : > { %s6999_s25 = smov (%p35_p2, %s34_s25), 0  ;;  %s7001_s8 = smov (!%p35_p2, %s37_s8), %s5093_s27 }
  0x78   : > { %s5314_s13 = sadd.s32 %s5089_s26, %s41_s17  ;;  %p56_p4 = scmp.eq.s32.totalorder %s5097_s28, 0 }
  0x79   : > { %p39_p6 = scmp.ge.s32.totalorder %s7001_s8, 2  ;;  %s167_s12 = sadd.s32 1, %s5065_s20 }
  0x7a   : > { %p5318_p13 = por %p56_p4, %p55_p1  ;;  %p3915_p10 = scmp.lt.s32.totalorder %s5097_s28, 6 }
  0x7b   : > { %s7003_s8 = smov (%p39_p6, %s7001_s8), 0  ;;  %s5326_s15 = sand.u32 1, %s5077_s23  }
  0x7c   : > { %6817 = sst [smem:[#allocation23_spill]] %s7003_s8  ;;  %s3749_s11 = sshll.u32 %s5314_s13, 7 }
  0x7d   : > { %s43_s14 = smul.u32 3, %s7003_s8  ;;  %s164_s5 = ssub.s32 %s5093_s27, %s7003_s8 }
  0x7e   : > { %p165_p11 = scmp.eq.s32.totalorder %s164_s5, 0  ;;  %s3512_s16 = sshll.u32 %s5326_s15, 3 }
  0x7f   : > { %s44_s10 = sadd.s32 %s43_s14, %s6999_s25  ;;  %s5338_s2 = scalar_lea.hbm %s6742_s0, %s3749_s11 }
  0x80   : > { %s45_s18 = ssub.s32 %s5314_s13, %s44_s10  ;;  %s245_s26 = scalar_lea.vmem [#allocation3], %s3512_s16 }
  0x81   : > { %p46_p0 = scmp.eq.s32.totalorder %s45_s18, 0  ;;  %s255_s8 = sshll.u32 %s245_s26, 4  ;;  %s5354_s8 = int_to_ptr.vmem [resolvable:$true] %s255_s8 }
  0x82   : > { %s5341_s3 = scalar_select %p165_p11, %s5065_s20, %s167_s12  }
  0x83   : > { %s5344_s4 = scalar_select %p46_p0, %s5077_s23, %s48_s30  }
  0x84   : > { %p5350_p3 = pnand %p3915_p10, %p5318_p13  ;;  %s3515_s21 = sshll.u32 %s5326_s15, 10 }
  0x85   : > { %s242_s11 = scalar_lea.sflag [#allocation4], %s5326_s15  ;;  %s4903_s5 = scalar_lea.hbm %s5338_s2, 128 }
  0x86   : > { %p4904_p5 = scmp.ne.s32.totalorder %s5338_s2, %s4903_s5  ;;  %p4905_p7 = pneg %p5350_p3 }
  0x87   : > { %s4908_s12 = scalar_lea.hbm %s6742_s0, 768  ;;  %p4909_p12 = scmp.lt.u32.totalorder %s5338_s2, %s6742_s0 }
  0x88   : > { %p4906_p8 = pnand %p4905_p7, %p4904_p5  ;;  %p4910_p2 = scmp.lt.u32.totalorder %s4908_s12, %s4903_s5 }
  0x89   : > { %p4912_p4 = scmp.lt.u32.totalorder %s4903_s5, %s5338_s2 }
  0x8a   : > { %p4907_p9 = pneg %p4906_p8  ;;  %p4911_p1 = por %p4910_p2, %p4909_p12 }
  0x8c   : > { %p4913_p6 = por %p4912_p4, %p4911_p1 }
  0x8e   : > { %p4914_p13 = pnand %p4913_p6, %p4907_p9 }
  0x90   : > { %4917 = shalt.err (!%p4914_p13)
}
  0x91   : > { %s4918_s16 = scalar_lea.vmem %s5354_s8, 128  ;;  %s5106_s18 = smov [#allocation3]  }
  0x92   : > { %p4919_p10 = scmp.ne.s32.totalorder %s5354_s8, %s4918_s16  ;;  %s4923_s17 = sshll.u32 %s5106_s18, 4  ;;  %s4924_s17 = int_to_ptr.vmem [resolvable:$false] %s4923_s17 }
  0x93   : > { %s4925_s26 = scalar_lea.vmem %s4924_s17, 256  ;;  %p4926_p5 = scmp.lt.s32.totalorder %s5354_s8, %s4924_s17 }
  0x94   : > { %p4921_p11 = pnand %p4919_p10, %p4905_p7  ;;  %p4927_p8 = scmp.lt.s32.totalorder %s4925_s26, %s4918_s16 }
  0x96   : > { %p4922_p0 = pneg %p4921_p11  ;;  %p4928_p12 = por %p4927_p8, %p4926_p5 }
  0x98   : > { %p4929_p2 = pnand %p4928_p12, %p4922_p0 }
  0x9a   : > { %4932 = shalt.err (!%p4929_p2)
}
  0x9b   : > { %3904 = dma.hbm_to_vmem [thread:$0]  (!%p5350_p3), %s5338_s2, 128, %s5354_s8, %s242_s11  }
  0x9c   : > { %s3751_s5 = sshll.u32 %s5314_s13, 14  ;;  %s266_s30 = scalar_lea.vmem [#allocation6], %s3515_s21 }
  0x9d   : > { %s276_s12 = sshll.u32 %s266_s30, 4  ;;  %s5389_s16 = scalar_lea.hbm %s6743_s1, %s3751_s5  ;;  %s5391_s12 = int_to_ptr.vmem [resolvable:$true] %s276_s12 }
  0x9e   : > { %s262_s18 = sand.u32 1, %s5097_s28   ;;  %s4933_s26 = scalar_lea.hbm %s5389_s16, 16384 }
  0x9f   : > { %s5394_s17 = scalar_lea.sflag [#allocation7], %s262_s18  ;;  %p4934_p9 = scmp.ne.s32.totalorder %s5389_s16, %s4933_s26 }
  0xa0   : > { %s4938_s13 = scalar_lea.hbm %s6743_s1, 98304  ;;  %p4939_p6 = scmp.lt.u32.totalorder %s5389_s16, %s6743_s1 }
  0xa1   : > { %p4936_p1 = pnand %p4934_p9, %p4905_p7  ;;  %p4940_p13 = scmp.lt.u32.totalorder %s4938_s13, %s4933_s26 }
  0xa2   : > { %p4942_p11 = scmp.lt.u32.totalorder %s4933_s26, %s5389_s16 }
  0xa3   : > { %p4937_p4 = pneg %p4936_p1  ;;  %p4941_p10 = por %p4940_p13, %p4939_p6 }
  0xa5   : > { %p4943_p0 = por %p4942_p11, %p4941_p10 }
  0xa7   : > { %p4944_p5 = pnand %p4943_p0, %p4937_p4 }
  0xa9   : > { %4947 = shalt.err (!%p4944_p5)
}
  0xaa   : > { %s4948_s11 = scalar_lea.vmem %s5391_s12, 16384  ;;  %s5107_s5 = smov [#allocation6]  }
  0xab   : > { %p4949_p8 = scmp.ne.s32.totalorder %s5391_s12, %s4948_s11  ;;  %s4953_s30 = sshll.u32 %s5107_s5, 4  ;;  %s4954_s30 = int_to_ptr.vmem [resolvable:$false] %s4953_s30 }
  0xac   : > { %s4955_s7 = scalar_lea.vmem %s4954_s30, 32768  ;;  %p4956_p9 = scmp.lt.s32.totalorder %s5391_s12, %s4954_s30 }
  0xad   : > { %p4951_p12 = pnand %p4949_p8, %p4905_p7  ;;  %p4957_p1 = scmp.lt.s32.totalorder %s4955_s7, %s4948_s11 }
  0xaf   : > { %p4952_p2 = pneg %p4951_p12  ;;  %p4958_p6 = por %p4957_p1, %p4956_p9 }
  0xb1   : > { %p4959_p13 = pnand %p4958_p6, %p4952_p2 }
  0xb3   : > { %4962 = shalt.err (!%p4959_p13)
}
  0xb4   : > { %s6819_s10 = smov 8   ;;  %s6820_s18 = smov 128  }
  0xb5   : > { %3907 = dma.hbm_to_vmem [thread:$0]  (!%p5350_p3), %s5389_s16, 16384, %s5391_s12, %s5394_s17, %s6820_s18, %s6820_s18, %s6819_s10  }
  0xb6   : > { %p6821_p7 = scmp.ne.s32.totalorder %s6810_s9, 0 }
  0xb8   : > { %288 = sbr.rel (%p6821_p7) target bundleno = 1329 (0x531), region = 40 }
  0xbf   : > { %s290_s26 = sand.u32 1, %s5073_s22   ;;  %p6822_p4 = scmp.ne.s32.totalorder %s6805_s6, 0 }
  0xc0   : > { %s3520_s2 = sshll.u32 %s290_s26, 3  ;;  %s291_s8 = scalar_lea.sflag [#allocation4], %s290_s26 }
  0xc1   : > { %s5426_s13 = scalar_lea.vmem [#allocation3], %s3520_s2 }
  0xc2   : > { %5036 = dma.done.wait (%p6822_p4), %s291_s8, 128  }
  0xc3   : > { %5038 = vsyncadd (%p6822_p4), %s291_s8, 4294967168  ;;  %s299_s14 = sand.u32 1, %s5196_s29   ;;  %s3521_s15 = sshll.u32 %s290_s26, 10 }
  0xc4   : > { %s300_s12 = scalar_lea.sflag [#allocation7], %s299_s14  ;;  %s5433_s16 = scalar_lea.vmem [#allocation6], %s3521_s15 }
  0xc5   : > { %5040 = dma.done.wait (%p6822_p4), %s300_s12, 16384  }
  0xc6   : > { %5042 = vsyncadd (%p6822_p4), %s300_s12, 4294950912  ;;  %p6823_p3 = scmp.eq.s32.totalorder %s5196_s29, 0 }
  0xc8   : > { %5044 = dma.done.wait (%p6823_p3), [#allocation7], 4096   ;;  %p6824_p10 = pmov %p6823_p3 }
  0xc9   : > { %p6825_p11 = pmov %p6823_p3 }
  0xca   : > { %5046 = vsyncadd (%p6824_p10), [#allocation7], 4294963200 }
  0xcb   : > { %5048 = dma.done.wait (%p6825_p11), [#allocation10], 4128   ;;  %p6826_p0 = pmov %p6823_p3 }
  0xcc   : > { %s344_s9 = sand.u32 1, %s5061_s19   ;;  %p3526_p5 = scmp.ne.s32.totalorder %s5081_s24, 0 }
  0xcd   : > { %5050 = vsyncadd (%p6826_p0), [#allocation10], 4294963168  ;;  %s3525_s17 = sshll.u32 %s344_s9, 5  ;;  %v5108_v0 = vmov (!%p3526_p5), 0.0  }
  0xce   : > { %s5450_s21 = scalar_lea.vmem [#allocation12], %s3525_s17  ;;  %357 = sbr.rel (%p3526_p5) target bundleno = 213 (0xd5), region = 64  ;;  %358 = vst [vmem:[#allocation2] sm:$0xff] (!%p3526_p5), %v5108_v0 }
  0xcf   : > { %359 = vst [vmem:[%s5450_s21] sm:$0xff] (!%p3526_p5), %v5108_v0  ;;  %360 = vst [vmem:[%s5450_s21 + $0x8] sm:$0xff] (!%p3526_p5), %v5108_v0 }
  0xd0   : > { %361 = vst [vmem:[%s5450_s21 + $0x10] sm:$0xff] (!%p3526_p5), %v5108_v0  ;;  %362 = vst [vmem:[%s5450_s21 + $0x18] sm:$0xff] (!%p3526_p5), %v5108_v0 }
  0xd5 PF: > { %v4018_v1 = vld [vmem:[#allocation8 + $0x4] ss:$8 sps:$4 sm:$0xff]   ;;  %v4020_v2 = vld [vmem:[#allocation8] ss:$8 sps:$4 sm:$0xff]   ;;  %v4021_v3 = vld [vmem:[#allocation8 + $0x14] ss:$8 sps:$4 sm:$0xff]  }
  0xd6   : > { %1335 = vmatprep.subr.bf16.mxu0 %v4018_v1  ;;  %3841 = vmatprep.subr.bf16.mxu1 %v4018_v1  ;;  %v4023_v4 = vld [vmem:[#allocation8 + $0x10] ss:$8 sps:$4 sm:$0xff]   ;;  %v4024_v5 = vld [vmem:[#allocation8 + $0x24] ss:$8 sps:$4 sm:$0xff]   ;;  %v4026_v6 = vld [vmem:[#allocation8 + $0x20] ss:$8 sps:$4 sm:$0xff]  }
  0xd7   : > { %1336 = vmatpush1.bf16.msra.mxu0 %v4020_v2  ;;  %3857 = vmatpush1.bf16.msra.mxu1 %v4020_v2  ;;  %v4027_v7 = vld [vmem:[#allocation8 + $0x34] ss:$8 sps:$4 sm:$0xff]   ;;  %v4029_v8 = vld [vmem:[#allocation8 + $0x30] ss:$8 sps:$4 sm:$0xff]   ;;  %v4030_v9 = vld [vmem:[#allocation8 + $0x44] ss:$8 sps:$4 sm:$0xff]  }
  0xd8   : > { %1337 = vmatprep.subr.bf16.mxu0 %v4021_v3  ;;  %3842 = vmatprep.subr.bf16.mxu1 %v4021_v3  ;;  %v4032_v10 = vld [vmem:[#allocation8 + $0x40] ss:$8 sps:$4 sm:$0xff]   ;;  %v4033_v11 = vld [vmem:[#allocation8 + $0x54] ss:$8 sps:$4 sm:$0xff]   ;;  %v4035_v12 = vld [vmem:[#allocation8 + $0x50] ss:$8 sps:$4 sm:$0xff]  }
  0xd9   : > { %v4036_v13 = vld [vmem:[#allocation8 + $0x64] ss:$8 sps:$4 sm:$0xff]   ;;  %v4038_v15 = vld [vmem:[#allocation8 + $0x60] ss:$8 sps:$4 sm:$0xff]   ;;  %v4039_v16 = vld [vmem:[#allocation8 + $0x74] ss:$8 sps:$4 sm:$0xff]  }
  0xda   : > { %v4068_v14 = vld [vmem:[%s5433_s16 + $0x4] ss:$8 sps:$4 sm:$0xff]   ;;  %v4041_v17 = vld [vmem:[#allocation8 + $0x70] ss:$8 sps:$4 sm:$0xff]   ;;  %v4044_v19 = vld [vmem:[#allocation8 + $0x80] ss:$8 sps:$4 sm:$0xff]  }
  0xdb   : > { %1338 = vmatpush1.bf16.msra.mxu0 %v4023_v4  ;;  %3858 = vmatpush1.bf16.msra.mxu1 %v4023_v4  ;;  %v4042_v18 = vld [vmem:[#allocation8 + $0x84] ss:$8 sps:$4 sm:$0xff]   ;;  %v4045_v20 = vld [vmem:[#allocation8 + $0x94] ss:$8 sps:$4 sm:$0xff]   ;;  %v4047_v21 = vld [vmem:[#allocation8 + $0x90] ss:$8 sps:$4 sm:$0xff]  }
  0xdc   : > { %1339 = vmatprep.subr.bf16.mxu0 %v4024_v5  ;;  %3843 = vmatprep.subr.bf16.mxu1 %v4024_v5  ;;  %v4048_v22 = vld [vmem:[#allocation8 + $0xa4] ss:$8 sps:$4 sm:$0xff]   ;;  %v4050_v23 = vld [vmem:[#allocation8 + $0xa0] ss:$8 sps:$4 sm:$0xff]   ;;  %v4051_v24 = vld [vmem:[#allocation8 + $0xb4] ss:$8 sps:$4 sm:$0xff]  }
  0xdd   : > { %1367 = vmatprep.mubr.bf16.mxu0 %v4068_v14  ;;  %v4053_v25 = vld [vmem:[#allocation8 + $0xb0] ss:$8 sps:$4 sm:$0xff]   ;;  %v4054_v26 = vld [vmem:[#allocation8 + $0xc4] ss:$8 sps:$4 sm:$0xff]   ;;  %v4056_v27 = vld [vmem:[#allocation8 + $0xc0] ss:$8 sps:$4 sm:$0xff]  }
  0xde   : > { %v4057_v28 = vld [vmem:[#allocation8 + $0xd4] ss:$8 sps:$4 sm:$0xff]   ;;  %v4059_v29 = vld [vmem:[#allocation8 + $0xd0] ss:$8 sps:$4 sm:$0xff]   ;;  %v4060_v30 = vld [vmem:[#allocation8 + $0xe4] ss:$8 sps:$4 sm:$0xff]  }
  0xdf   : > { %1340 = vmatpush1.bf16.msra.mxu0 %v4026_v6  ;;  %3859 = vmatpush1.bf16.msra.mxu1 %v4026_v6  ;;  %v4062_v31 = vld [vmem:[#allocation8 + $0xe0] ss:$8 sps:$4 sm:$0xff]   ;;  %v4063_v32 = vld [vmem:[#allocation8 + $0xf4] ss:$8 sps:$4 sm:$0xff]   ;;  %v4065_v33 = vld [vmem:[#allocation8 + $0xf0] ss:$8 sps:$4 sm:$0xff]  }
  0xe0   : > { %1341 = vmatprep.subr.bf16.mxu0 %v4027_v7  ;;  %3844 = vmatprep.subr.bf16.mxu1 %v4027_v7  ;;  %v4066_v34 = vld [vmem:[%s5433_s16] ss:$8 sps:$4 sm:$0xff]   ;;  %v4069_v35 = vld [vmem:[%s5433_s16 + $0x14] ss:$8 sps:$4 sm:$0xff]   ;;  %v4071_v36 = vld [vmem:[%s5433_s16 + $0x10] ss:$8 sps:$4 sm:$0xff]  }
  0xe1   : > { %v4072_v37 = vld [vmem:[%s5433_s16 + $0x24] ss:$8 sps:$4 sm:$0xff]   ;;  %v4125_v38 = vld [vmem:[%s5433_s16 + $0x274] ss:$8 sps:$4 sm:$0xff]   ;;  %v4123_v39 = vld [vmem:[%s5433_s16 + $0x270] ss:$8 sps:$4 sm:$0xff]  }
  0xe2   : > { %1757 = vmatprep.mubr.bf16.mxu1 %v4125_v38  ;;  %v4074_v40 = vld [vmem:[%s5433_s16 + $0x20] ss:$8 sps:$4 sm:$0xff]   ;;  %v4075_v41 = vld [vmem:[%s5433_s16 + $0x34] ss:$8 sps:$4 sm:$0xff]   ;;  %v4129_v42 = vld [vmem:[%s5433_s16 + $0x284] ss:$8 sps:$4 sm:$0xff]  }
  0xe3   : > { %1342 = vmatpush1.bf16.msra.mxu0 %v4029_v8  ;;  %3860 = vmatpush1.bf16.msra.mxu1 %v4029_v8  ;;  %v4131_v43 = vld [vmem:[%s5433_s16 + $0x280] ss:$8 sps:$4 sm:$0xff]   ;;  %v4077_v44 = vld [vmem:[%s5433_s16 + $0x30] ss:$8 sps:$4 sm:$0xff]   ;;  %v4078_v45 = vld [vmem:[%s5433_s16 + $0x44] ss:$8 sps:$4 sm:$0xff]  }
  0xe4   : > { %1343 = vmatprep.subr.bf16.mxu0 %v4030_v9  ;;  %3845 = vmatprep.subr.bf16.mxu1 %v4030_v9  ;;  %v4135_v46 = vld [vmem:[%s5433_s16 + $0x294] ss:$8 sps:$4 sm:$0xff]   ;;  %v4137_v47 = vld [vmem:[%s5433_s16 + $0x290] ss:$8 sps:$4 sm:$0xff]   ;;  %v4080_v48 = vld [vmem:[%s5433_s16 + $0x40] ss:$8 sps:$4 sm:$0xff]  }
  0xe5   : > { %v4081_v49 = vld [vmem:[%s5433_s16 + $0x54] ss:$8 sps:$4 sm:$0xff]   ;;  %v4141_v50 = vld [vmem:[%s5433_s16 + $0x2a4] ss:$8 sps:$4 sm:$0xff]   ;;  %v4143_v51 = vld [vmem:[%s5433_s16 + $0x2a0] ss:$8 sps:$4 sm:$0xff]  }
  0xe6   : > { %v4083_v52 = vld [vmem:[%s5433_s16 + $0x50] ss:$8 sps:$4 sm:$0xff]   ;;  %v4084_v53 = vld [vmem:[%s5433_s16 + $0x64] ss:$8 sps:$4 sm:$0xff]   ;;  %v4147_v54 = vld [vmem:[%s5433_s16 + $0x2b4] ss:$8 sps:$4 sm:$0xff]  }
  0xe7   : > { %1344 = vmatpush1.bf16.msra.mxu0 %v4032_v10  ;;  %3861 = vmatpush1.bf16.msra.mxu1 %v4032_v10  ;;  %v4149_v55 = vld [vmem:[%s5433_s16 + $0x2b0] ss:$8 sps:$4 sm:$0xff]   ;;  %v4086_v56 = vld [vmem:[%s5433_s16 + $0x60] ss:$8 sps:$4 sm:$0xff]   ;;  %v4087_v57 = vld [vmem:[%s5433_s16 + $0x74] ss:$8 sps:$4 sm:$0xff]  }
  0xe8   : > { %1345 = vmatprep.subr.bf16.mxu0 %v4033_v11  ;;  %3846 = vmatprep.subr.bf16.mxu1 %v4033_v11  ;;  %v4153_v58 = vld [vmem:[%s5433_s16 + $0x2c4] ss:$8 sps:$4 sm:$0xff]   ;;  %v4155_v59 = vld [vmem:[%s5433_s16 + $0x2c0] ss:$8 sps:$4 sm:$0xff]   ;;  %v4089_v60 = vld [vmem:[%s5433_s16 + $0x70] ss:$8 sps:$4 sm:$0xff]  }
  0xe9   : > { %v4090_v61 = vld [vmem:[%s5433_s16 + $0x84] ss:$8 sps:$4 sm:$0xff]   ;;  %v4159_v62 = vld [vmem:[%s5433_s16 + $0x2d4] ss:$8 sps:$4 sm:$0xff]   ;;  %v4161_v63 = vld [vmem:[%s5433_s16 + $0x2d0] ss:$8 sps:$4 sm:$0xff]  }
  0xea   : > { %v4092_v0 = vld [vmem:[%s5433_s16 + $0x80] ss:$8 sps:$4 sm:$0xff]   ;;  %v4093_v1 = vld [vmem:[%s5433_s16 + $0x94] ss:$8 sps:$4 sm:$0xff]   ;;  %v4165_v2 = vld [vmem:[%s5433_s16 + $0x2e4] ss:$8 sps:$4 sm:$0xff]  }
  0xeb   : > { %1346 = vmatpush1.bf16.msra.mxu0 %v4035_v12  ;;  %3862 = vmatpush1.bf16.msra.mxu1 %v4035_v12  ;;  %v4167_v3 = vld [vmem:[%s5433_s16 + $0x2e0] ss:$8 sps:$4 sm:$0xff]   ;;  %v4095_v4 = vld [vmem:[%s5433_s16 + $0x90] ss:$8 sps:$4 sm:$0xff]   ;;  %v4096_v5 = vld [vmem:[%s5433_s16 + $0xa4] ss:$8 sps:$4 sm:$0xff]  }
  0xec   : > { %1347 = vmatprep.subr.bf16.mxu0 %v4036_v13  ;;  %3847 = vmatprep.subr.bf16.mxu1 %v4036_v13  ;;  %v4171_v6 = vld [vmem:[%s5433_s16 + $0x2f4] ss:$8 sps:$4 sm:$0xff]   ;;  %v4173_v7 = vld [vmem:[%s5433_s16 + $0x2f0] ss:$8 sps:$4 sm:$0xff]   ;;  %v4098_v8 = vld [vmem:[%s5433_s16 + $0xa0] ss:$8 sps:$4 sm:$0xff]  }
  0xed   : > { %v4099_v9 = vld [vmem:[%s5433_s16 + $0xb4] ss:$8 sps:$4 sm:$0xff]   ;;  %v4177_v10 = vld [vmem:[%s5433_s16 + $0x304] ss:$8 sps:$4 sm:$0xff]   ;;  %v4179_v11 = vld [vmem:[%s5433_s16 + $0x300] ss:$8 sps:$4 sm:$0xff]  }
  0xee   : > { %v4101_v12 = vld [vmem:[%s5433_s16 + $0xb0] ss:$8 sps:$4 sm:$0xff]   ;;  %v4102_v13 = vld [vmem:[%s5433_s16 + $0xc4] ss:$8 sps:$4 sm:$0xff]   ;;  %v4183_v14 = vld [vmem:[%s5433_s16 + $0x314] ss:$8 sps:$4 sm:$0xff]  }
  0xef   : > { %1348 = vmatpush1.bf16.msra.mxu0 %v4038_v15  ;;  %3863 = vmatpush1.bf16.msra.mxu1 %v4038_v15  ;;  %v4185_v15 = vld [vmem:[%s5433_s16 + $0x310] ss:$8 sps:$4 sm:$0xff]   ;;  %v4219_v38 = vld [vmem:[%s5433_s16 + $0x374] ss:$8 sps:$4 sm:$0xff]   ;;  %p3711_p8 = scmp.ne.s32.totalorder %s5081_s24, 2 }
  0xf0   : > { %1349 = vmatprep.subr.bf16.mxu0 %v4039_v16  ;;  %3848 = vmatprep.subr.bf16.mxu1 %v4039_v16  ;;  %v4104_v16 = vld [vmem:[%s5433_s16 + $0xc0] ss:$8 sps:$4 sm:$0xff]  }
  0xf3   : > { %1350 = vmatpush1.bf16.msra.mxu0 %v4041_v17  ;;  %3864 = vmatpush1.bf16.msra.mxu1 %v4041_v17  ;;  %v4105_v17 = vld [vmem:[%s5433_s16 + $0xd4] ss:$8 sps:$4 sm:$0xff]  }
  0xf4   : > { %1351 = vmatprep.subr.bf16.mxu0 %v4042_v18  ;;  %3849 = vmatprep.subr.bf16.mxu1 %v4042_v18  ;;  %v4189_v18 = vld [vmem:[%s5433_s16 + $0x324] ss:$8 sps:$4 sm:$0xff]  }
  0xf7   : > { %1352 = vmatpush1.bf16.msra.mxu0 %v4044_v19  ;;  %3865 = vmatpush1.bf16.msra.mxu1 %v4044_v19  ;;  %v4191_v19 = vld [vmem:[%s5433_s16 + $0x320] ss:$8 sps:$4 sm:$0xff]  }
  0xf8   : > { %1353 = vmatprep.subr.bf16.mxu0 %v4045_v20  ;;  %3850 = vmatprep.subr.bf16.mxu1 %v4045_v20  ;;  %v4107_v20 = vld [vmem:[%s5433_s16 + $0xd0] ss:$8 sps:$4 sm:$0xff]  }
  0xfb   : > { %1354 = vmatpush1.bf16.msra.mxu0 %v4047_v21  ;;  %3866 = vmatpush1.bf16.msra.mxu1 %v4047_v21  ;;  %v4108_v21 = vld [vmem:[%s5433_s16 + $0xe4] ss:$8 sps:$4 sm:$0xff]  }
  0xfc   : > { %1355 = vmatprep.subr.bf16.mxu0 %v4048_v22  ;;  %3851 = vmatprep.subr.bf16.mxu1 %v4048_v22  ;;  %v4195_v22 = vld [vmem:[%s5433_s16 + $0x334] ss:$8 sps:$4 sm:$0xff]  }
  0xff   : > { %1356 = vmatpush1.bf16.msra.mxu0 %v4050_v23  ;;  %3867 = vmatpush1.bf16.msra.mxu1 %v4050_v23  ;;  %v4197_v23 = vld [vmem:[%s5433_s16 + $0x330] ss:$8 sps:$4 sm:$0xff]  }
 0x100   : > { %1357 = vmatprep.subr.bf16.mxu0 %v4051_v24  ;;  %3852 = vmatprep.subr.bf16.mxu1 %v4051_v24  ;;  %v4110_v24 = vld [vmem:[%s5433_s16 + $0xe0] ss:$8 sps:$4 sm:$0xff]  }
 0x103   : > { %1358 = vmatpush1.bf16.msra.mxu0 %v4053_v25  ;;  %3868 = vmatpush1.bf16.msra.mxu1 %v4053_v25  ;;  %v4111_v25 = vld [vmem:[%s5433_s16 + $0xf4] ss:$8 sps:$4 sm:$0xff]  }
 0x104   : > { %1359 = vmatprep.subr.bf16.mxu0 %v4054_v26  ;;  %3853 = vmatprep.subr.bf16.mxu1 %v4054_v26  ;;  %v4201_v26 = vld [vmem:[%s5433_s16 + $0x344] ss:$8 sps:$4 sm:$0xff]  }
 0x107   : > { %1360 = vmatpush1.bf16.msra.mxu0 %v4056_v27  ;;  %3869 = vmatpush1.bf16.msra.mxu1 %v4056_v27  ;;  %v4203_v27 = vld [vmem:[%s5433_s16 + $0x340] ss:$8 sps:$4 sm:$0xff]  }
 0x108   : > { %1361 = vmatprep.subr.bf16.mxu0 %v4057_v28  ;;  %3854 = vmatprep.subr.bf16.mxu1 %v4057_v28  ;;  %v4113_v28 = vld [vmem:[%s5433_s16 + $0xf0] ss:$8 sps:$4 sm:$0xff]  }
 0x10b   : > { %1362 = vmatpush1.bf16.msra.mxu0 %v4059_v29  ;;  %3870 = vmatpush1.bf16.msra.mxu1 %v4059_v29  ;;  %v4114_v29 = vld [vmem:[%s5433_s16 + $0x104] ss:$8 sps:$4 sm:$0xff]  }
 0x10c   : > { %1363 = vmatprep.subr.bf16.mxu0 %v4060_v30  ;;  %3855 = vmatprep.subr.bf16.mxu1 %v4060_v30  ;;  %v4207_v30 = vld [vmem:[%s5433_s16 + $0x354] ss:$8 sps:$4 sm:$0xff]  }
 0x10f   : > { %1364 = vmatpush1.bf16.msra.mxu0 %v4062_v31  ;;  %3871 = vmatpush1.bf16.msra.mxu1 %v4062_v31  ;;  %v4209_v31 = vld [vmem:[%s5433_s16 + $0x350] ss:$8 sps:$4 sm:$0xff]  }
 0x110   : > { %1365 = vmatprep.subr.bf16.mxu0 %v4063_v32  ;;  %3856 = vmatprep.subr.bf16.mxu1 %v4063_v32  ;;  %v4116_v32 = vld [vmem:[%s5433_s16 + $0x100] ss:$8 sps:$4 sm:$0xff]  }
 0x113   : > { %1366 = vmatpush1.bf16.msra.mxu0 %v4065_v33  ;;  %3872 = vmatpush1.bf16.msra.mxu1 %v4065_v33  ;;  %v4117_v33 = vld [vmem:[%s5433_s16 + $0x114] ss:$8 sps:$4 sm:$0xff]  }
 0x116   : > { %1368 = vmatmul.mubr.bf16.vlgmr.msra.gmra.mrb[0].mxu0 %v4066_v34  ;;  %1758 = vmatmul.mubr.bf16.vlgmr.msra.gmra.mrb[0].mxu1 %v4123_v39  ;;  %v4213_v34 = vld [vmem:[%s5433_s16 + $0x364] ss:$8 sps:$4 sm:$0xff]   ;;  %v4221_v39 = vld [vmem:[%s5433_s16 + $0x370] ss:$8 sps:$4 sm:$0xff]  }
 0x117   : > { %1377 = vmatprep.mubr.bf16.mxu0 %v4069_v35  ;;  %1767 = vmatprep.mubr.bf16.mxu1 %v4129_v42  ;;  %v4215_v35 = vld [vmem:[%s5433_s16 + $0x360] ss:$8 sps:$4 sm:$0xff]   ;;  %v4225_v42 = vld [vmem:[%s5433_s16 + $0x384] ss:$8 sps:$4 sm:$0xff]  }
 0x11e   : > { %1378 = vmatmul.mubr.bf16.gmra.mrb[4].mxu0 %v4071_v36  ;;  %1768 = vmatmul.mubr.bf16.gmra.mrb[4].mxu1 %v4131_v43  ;;  %v4119_v36 = vld [vmem:[%s5433_s16 + $0x110] ss:$8 sps:$4 sm:$0xff]   ;;  %v4227_v43 = vld [vmem:[%s5433_s16 + $0x380] ss:$8 sps:$4 sm:$0xff]  }
 0x11f   : > { %1387 = vmatprep.mubr.bf16.mxu0 %v4072_v37  ;;  %1777 = vmatprep.mubr.bf16.mxu1 %v4135_v46  ;;  %v4120_v37 = vld [vmem:[%s5433_s16 + $0x124] ss:$8 sps:$4 sm:$0xff]   ;;  %v4231_v46 = vld [vmem:[%s5433_s16 + $0x394] ss:$8 sps:$4 sm:$0xff]  }
 0x126   : > { %1388 = vmatmul.mubr.bf16.gmra.mrb[8].mxu0 %v4074_v40  ;;  %1778 = vmatmul.mubr.bf16.gmra.mrb[8].mxu1 %v4137_v47  ;;  %v4122_v40 = vld [vmem:[%s5433_s16 + $0x120] ss:$8 sps:$4 sm:$0xff]   ;;  %v4233_v47 = vld [vmem:[%s5433_s16 + $0x390] ss:$8 sps:$4 sm:$0xff]  }
 0x127   : > { %1397 = vmatprep.mubr.bf16.mxu0 %v4075_v41  ;;  %1787 = vmatprep.mubr.bf16.mxu1 %v4141_v50  ;;  %v4126_v41 = vld [vmem:[%s5433_s16 + $0x134] ss:$8 sps:$4 sm:$0xff]   ;;  %v4237_v50 = vld [vmem:[%s5433_s16 + $0x3a4] ss:$8 sps:$4 sm:$0xff]  }
 0x12e   : > { %1398 = vmatmul.mubr.bf16.gmra.mrb[12].mxu0 %v4077_v44  ;;  %1788 = vmatmul.mubr.bf16.gmra.mrb[12].mxu1 %v4143_v51  ;;  %v4128_v44 = vld [vmem:[%s5433_s16 + $0x130] ss:$8 sps:$4 sm:$0xff]   ;;  %v4239_v51 = vld [vmem:[%s5433_s16 + $0x3a0] ss:$8 sps:$4 sm:$0xff]  }
 0x12f   : > { %1407 = vmatprep.mubr.bf16.mxu0 %v4078_v45  ;;  %1797 = vmatprep.mubr.bf16.mxu1 %v4147_v54  ;;  %v4132_v45 = vld [vmem:[%s5433_s16 + $0x144] ss:$8 sps:$4 sm:$0xff]   ;;  %v4243_v54 = vld [vmem:[%s5433_s16 + $0x3b4] ss:$8 sps:$4 sm:$0xff]  }
 0x136   : > { %1408 = vmatmul.mubr.bf16.gmra.mrb[16].mxu0 %v4080_v48  ;;  %1798 = vmatmul.mubr.bf16.gmra.mrb[16].mxu1 %v4149_v55  ;;  %v4134_v48 = vld [vmem:[%s5433_s16 + $0x140] ss:$8 sps:$4 sm:$0xff]   ;;  %v4245_v55 = vld [vmem:[%s5433_s16 + $0x3b0] ss:$8 sps:$4 sm:$0xff]  }
 0x137   : > { %1417 = vmatprep.mubr.bf16.mxu0 %v4081_v49  ;;  %1807 = vmatprep.mubr.bf16.mxu1 %v4153_v58  ;;  %v4138_v49 = vld [vmem:[%s5433_s16 + $0x154] ss:$8 sps:$4 sm:$0xff]   ;;  %v4246_v58 = vld [vmem:[%s5433_s16 + $0x3c4] ss:$8 sps:$4 sm:$0xff]  }
 0x13e   : > { %1418 = vmatmul.mubr.bf16.gmra.mrb[20].mxu0 %v4083_v52  ;;  %1808 = vmatmul.mubr.bf16.gmra.mrb[20].mxu1 %v4155_v59  ;;  %v4140_v52 = vld [vmem:[%s5433_s16 + $0x150] ss:$8 sps:$4 sm:$0xff]   ;;  %v4248_v59 = vld [vmem:[%s5433_s16 + $0x3c0] ss:$8 sps:$4 sm:$0xff]  }
 0x13f   : > { %1427 = vmatprep.mubr.bf16.mxu0 %v4084_v53  ;;  %1817 = vmatprep.mubr.bf16.mxu1 %v4159_v62  ;;  %v4144_v53 = vld [vmem:[%s5433_s16 + $0x164] ss:$8 sps:$4 sm:$0xff]   ;;  %v4249_v62 = vld [vmem:[%s5433_s16 + $0x3d4] ss:$8 sps:$4 sm:$0xff]  }
 0x146   : > { %1428 = vmatmul.mubr.bf16.gmra.mrb[24].mxu0 %v4086_v56  ;;  %1818 = vmatmul.mubr.bf16.gmra.mrb[24].mxu1 %v4161_v63  ;;  %v4146_v56 = vld [vmem:[%s5433_s16 + $0x160] ss:$8 sps:$4 sm:$0xff]   ;;  %v4251_v63 = vld [vmem:[%s5433_s16 + $0x3d0] ss:$8 sps:$4 sm:$0xff]  }
 0x147   : > { %1437 = vmatprep.mubr.bf16.mxu0 %v4087_v57  ;;  %1827 = vmatprep.mubr.bf16.mxu1 %v4165_v2  ;;  %v4150_v57 = vld [vmem:[%s5433_s16 + $0x174] ss:$8 sps:$4 sm:$0xff]   ;;  %v4252_v2 = vld [vmem:[%s5433_s16 + $0x3e4] ss:$8 sps:$4 sm:$0xff]  }
 0x14e   : > { %1438 = vmatmul.mubr.bf16.gmra.mrb[28].mxu0 %v4089_v60  ;;  %1828 = vmatmul.mubr.bf16.gmra.mrb[28].mxu1 %v4167_v3  ;;  %v4152_v60 = vld [vmem:[%s5433_s16 + $0x170] ss:$8 sps:$4 sm:$0xff]   ;;  %v4254_v3 = vld [vmem:[%s5433_s16 + $0x3e0] ss:$8 sps:$4 sm:$0xff]  }
 0x14f   : > { %1447 = vmatprep.mubr.bf16.mxu0 %v4090_v61  ;;  %1837 = vmatprep.mubr.bf16.mxu1 %v4171_v6  ;;  %v4156_v61 = vld [vmem:[%s5433_s16 + $0x184] ss:$8 sps:$4 sm:$0xff]  }
 0x150   : > { %v4168_v6 = vld [vmem:[%s5433_s16 + $0x1a4] ss:$8 sps:$4 sm:$0xff]  }
 0x156   : > { %1448 = vmatmul.mubr.bf16.gmra.mrb[32].mxu0 %v4092_v0  ;;  %1838 = vmatmul.mubr.bf16.gmra.mrb[32].mxu1 %v4173_v7  ;;  %v4158_v0 = vld [vmem:[%s5433_s16 + $0x180] ss:$8 sps:$4 sm:$0xff]  }
 0x157   : > { %1457 = vmatprep.mubr.bf16.mxu0 %v4093_v1  ;;  %1847 = vmatprep.mubr.bf16.mxu1 %v4177_v10  ;;  %v4162_v1 = vld [vmem:[%s5433_s16 + $0x194] ss:$8 sps:$4 sm:$0xff]   ;;  %v4170_v10 = vld [vmem:[%s5433_s16 + $0x1a0] ss:$8 sps:$4 sm:$0xff]  }
 0x15e   : > { %1458 = vmatmul.mubr.bf16.gmra.mrb[36].mxu0 %v4095_v4  ;;  %1848 = vmatmul.mubr.bf16.gmra.mrb[36].mxu1 %v4179_v11  ;;  %v4164_v4 = vld [vmem:[%s5433_s16 + $0x190] ss:$8 sps:$4 sm:$0xff]  }
 0x15f   : > { %1467 = vmatprep.mubr.bf16.mxu0 %v4096_v5  ;;  %1857 = vmatprep.mubr.bf16.mxu1 %v4183_v14  ;;  %v525_v5 = vlaneseq }
 0x161   : > { %v5558_v7 = vshrl.u32 %v525_v5, 7 }
 0x163   : > { %6827 = vst [vmem:[#allocation24_spill] sm:$0xff] %v5558_v7  ;;  %v6761_v11 = vsub.s32 0, %v5558_v7 }
 0x166   : > { %1468 = vmatmul.mubr.bf16.gmra.mrb[40].mxu0 %v4098_v8  ;;  %1858 = vmatmul.mubr.bf16.gmra.mrb[40].mxu1 %v4185_v15  ;;  %v4255_v8 = vld [vmem:[%s5433_s16 + $0x3f4] ss:$8 sps:$4 sm:$0xff]   ;;  %v6762_v15 = vsub.s32 1, %v5558_v7 }
 0x167   : > { %1477 = vmatprep.mubr.bf16.mxu0 %v4099_v9  ;;  %1867 = vmatprep.mubr.bf16.mxu1 %v4189_v18  ;;  %v4257_v9 = vld [vmem:[%s5433_s16 + $0x3f0] ss:$8 sps:$4 sm:$0xff]  }
 0x16e   : > { %1478 = vmatmul.mubr.bf16.gmra.mrb[44].mxu0 %v4101_v12  ;;  %1868 = vmatmul.mubr.bf16.gmra.mrb[44].mxu1 %v4191_v19  ;;  %v523_v12 = vld [vmem:[#allocation9] sm:$0x3] }
 0x16f   : > { %1487 = vmatprep.mubr.bf16.mxu0 %v4102_v13  ;;  %1877 = vmatprep.mubr.bf16.mxu1 %v4195_v22  ;;  %v4174_v13 = vld [vmem:[%s5433_s16 + $0x1b4] ss:$8 sps:$4 sm:$0xff]   ;;  %v5567_v14 = vrot.slane %v523_v12, %v6761_v11  ;;  %v5573_v18 = vrot.slane %v523_v12, %v6762_v15  ;;  %v4180_v22 = vld [vmem:[%s5433_s16 + $0x1c4] ss:$8 sps:$4 sm:$0xff]  }
 0x170   : > { %v4240_v11 = vld [vmem:[%s5433_s16 + $0x264] ss:$8 sps:$4 sm:$0xff]  }
 0x176   : > { %1488 = vmatmul.mubr.bf16.gmra.mrb[48].mxu0 %v4104_v16  ;;  %1878 = vmatmul.mubr.bf16.gmra.mrb[48].mxu1 %v4197_v23 }
 0x177   : > { %1497 = vmatprep.mubr.bf16.mxu0 %v4105_v17  ;;  %1887 = vmatprep.mubr.bf16.mxu1 %v4201_v26 }
 0x17e   : > { %1498 = vmatmul.mubr.bf16.gmra.mrb[52].mxu0 %v4107_v20  ;;  %1888 = vmatmul.mubr.bf16.gmra.mrb[52].mxu1 %v4203_v27  ;;  %v4176_v20 = vld [vmem:[%s5433_s16 + $0x1b0] ss:$8 sps:$4 sm:$0xff]  }
 0x17f   : > { %1507 = vmatprep.mubr.bf16.mxu0 %v4108_v21  ;;  %1897 = vmatprep.mubr.bf16.mxu1 %v4207_v30 }
 0x186   : > { %1508 = vmatmul.mubr.bf16.gmra.mrb[56].mxu0 %v4110_v24  ;;  %1898 = vmatmul.mubr.bf16.gmra.mrb[56].mxu1 %v4209_v31 }
 0x187   : > { %1517 = vmatprep.mubr.bf16.mxu0 %v4111_v25  ;;  %1907 = vmatprep.mubr.bf16.mxu1 %v4213_v34  ;;  %v4186_v34 = vld [vmem:[%s5433_s16 + $0x1d4] ss:$8 sps:$4 sm:$0xff]  }
 0x18e   : > { %1518 = vmatmul.mubr.bf16.gmra.mrb[60].mxu0 %v4113_v28  ;;  %1908 = vmatmul.mubr.bf16.gmra.mrb[60].mxu1 %v4215_v35 }
 0x18f   : > { %1527 = vmatprep.mubr.bf16.mxu0 %v4114_v29  ;;  %1917 = vmatprep.mubr.bf16.mxu1 %v4219_v38 }
 0x196   : > { %1528 = vmatmul.mubr.bf16.gmra.mrb[64].mxu0 %v4116_v32  ;;  %1918 = vmatmul.mubr.bf16.gmra.mrb[64].mxu1 %v4221_v39  ;;  %v4182_v32 = vld [vmem:[%s5433_s16 + $0x1c0] ss:$8 sps:$4 sm:$0xff]  }
 0x197   : > { %1537 = vmatprep.mubr.bf16.mxu0 %v4117_v33  ;;  %1927 = vmatprep.mubr.bf16.mxu1 %v4225_v42 }
 0x19e   : > { %1538 = vmatmul.mubr.bf16.gmra.mrb[68].mxu0 %v4119_v36  ;;  %1928 = vmatmul.mubr.bf16.gmra.mrb[68].mxu1 %v4227_v43 }
 0x19f   : > { %1547 = vmatprep.mubr.bf16.mxu0 %v4120_v37  ;;  %1937 = vmatprep.mubr.bf16.mxu1 %v4231_v46 }
 0x1a6   : > { %1548 = vmatmul.mubr.bf16.gmra.mrb[72].mxu0 %v4122_v40  ;;  %1938 = vmatmul.mubr.bf16.gmra.mrb[72].mxu1 %v4233_v47 }
 0x1a7   : > { %1557 = vmatprep.mubr.bf16.mxu0 %v4126_v41  ;;  %1947 = vmatprep.mubr.bf16.mxu1 %v4237_v50 }
 0x1ae   : > { %1558 = vmatmul.mubr.bf16.gmra.mrb[76].mxu0 %v4128_v44  ;;  %1948 = vmatmul.mubr.bf16.gmra.mrb[76].mxu1 %v4239_v51 }
 0x1af   : > { %1567 = vmatprep.mubr.bf16.mxu0 %v4132_v45  ;;  %1957 = vmatprep.mubr.bf16.mxu1 %v4243_v54  ;;  %v4188_v54 = vld [vmem:[%s5433_s16 + $0x1d0] ss:$8 sps:$4 sm:$0xff]  }
 0x1b6   : > { %1568 = vmatmul.mubr.bf16.gmra.mrb[80].mxu0 %v4134_v48  ;;  %1958 = vmatmul.mubr.bf16.gmra.mrb[80].mxu1 %v4245_v55 }
 0x1b7   : > { %1577 = vmatprep.mubr.bf16.mxu0 %v4138_v49  ;;  %1967 = vmatprep.mubr.bf16.mxu1 %v4246_v58 }
 0x1be   : > { %1578 = vmatmul.mubr.bf16.gmra.mrb[84].mxu0 %v4140_v52  ;;  %1968 = vmatmul.mubr.bf16.gmra.mrb[84].mxu1 %v4248_v59  ;;  %v4192_v59 = vld [vmem:[%s5433_s16 + $0x1e4] ss:$8 sps:$4 sm:$0xff]  }
 0x1bf   : > { %1587 = vmatprep.mubr.bf16.mxu0 %v4144_v53  ;;  %1977 = vmatprep.mubr.bf16.mxu1 %v4249_v62 }
 0x1c6   : > { %1588 = vmatmul.mubr.bf16.gmra.mrb[88].mxu0 %v4146_v56  ;;  %1978 = vmatmul.mubr.bf16.gmra.mrb[88].mxu1 %v4251_v63 }
 0x1c7   : > { %1597 = vmatprep.mubr.bf16.mxu0 %v4150_v57  ;;  %1987 = vmatprep.mubr.bf16.mxu1 %v4252_v2 }
 0x1ce   : > { %1598 = vmatmul.mubr.bf16.gmra.mrb[92].mxu0 %v4152_v60  ;;  %1988 = vmatmul.mubr.bf16.gmra.mrb[92].mxu1 %v4254_v3 }
 0x1cf   : > { %1607 = vmatprep.mubr.bf16.mxu0 %v4156_v61  ;;  %1997 = vmatprep.mubr.bf16.mxu1 %v4255_v8 }
 0x1d6   : > { %1608 = vmatmul.mubr.bf16.gmra.mrb[96].mxu0 %v4158_v0  ;;  %1998 = vmatmul.mubr.bf16.gmra.mrb[96].mxu1 %v4257_v9 }
 0x1d7   : > { %1617 = vmatprep.mubr.bf16.mxu0 %v4162_v1 }
 0x1de   : > { %1618 = vmatmul.mubr.bf16.gmra.mrb[100].mxu0 %v4164_v4 }
 0x1df   : > { %1627 = vmatprep.mubr.bf16.mxu0 %v4168_v6 }
 0x1e6   : > { %1628 = vmatmul.mubr.bf16.gmra.mrb[104].mxu0 %v4170_v10 }
 0x1e7   : > { %1637 = vmatprep.mubr.bf16.mxu0 %v4174_v13 }
 0x1e9   : > { %v1369_v16 = vpop.f32.mrb[0].mxu0  ;;  %v1759_v38 = vpop.f32.mrb[0].mxu1 }
 0x1ea   : > { %v1370_v17 = vadd.f32 %v1369_v16, %v5567_v14  ;;  %v1371_v19 = vpop.f32.mrb[1].mxu0  ;;  %v1761_v40 = vpop.f32.mrb[1].mxu1  ;;  %v1760_v44 = vadd.f32 %v1759_v38, %v5567_v14 }
 0x1eb   : > { %v1373_v21 = vpop.f32.mrb[2].mxu0  ;;  %v1372_v26 = vadd.f32 %v1371_v19, %v5573_v18  ;;  %v1763_v43 = vpop.f32.mrb[2].mxu1  ;;  %v1762_v9 = vadd.f32 %v1761_v40, %v5573_v18 }
 0x1ec   : > { %v2008_v23 = vmul.f32 0.5, %v1370_v17  ;;  %v1374_v24 = vadd.f32 %v1373_v21, %v5567_v14  ;;  %v1375_v25 = vpop.f32.mrb[3].mxu0  ;;  %v1764_v45 = vadd.f32 %v1763_v43, %v5567_v14  ;;  %v2086_v49 = vmul.f32 0.5, %v1760_v44  ;;  %v1765_v60 = vpop.f32.mrb[3].mxu1 }
 0x1ed   : > { %v1376_v28 = vadd.f32 %v1375_v25, %v5573_v18  ;;  %v1766_v19 = vadd.f32 %v1765_v60, %v5573_v18 }
 0x1ee   : > { %4258 = vtanh.f32 %v2008_v23  ;;  %v2009_v27 = vmul.f32 0.5, %v1374_v24  ;;  %1638 = vmatmul.mubr.bf16.gmra.mrb[108].mxu0 %v4176_v20  ;;  %v2087_v50 = vmul.f32 0.5, %v1764_v45 }
 0x1ef   : > { %1647 = vmatprep.mubr.bf16.mxu0 %v4180_v22 }
 0x1f0   : > { %4260 = vtanh.f32 %v2009_v27  ;;  %v4194_v27 = vld [vmem:[%s5433_s16 + $0x1e0] ss:$8 sps:$4 sm:$0xff]  }
 0x1f1   : > { %v1379_v29 = vpop.f32.mrb[4].mxu0  ;;  %4262 = vtanh.f32 %v1372_v26  ;;  %v1769_v1 = vpop.f32.mrb[4].mxu1 }
 0x1f2   : > { %v1380_v30 = vadd.f32 %v1379_v29, %v5567_v14  ;;  %v1381_v31 = vpop.f32.mrb[5].mxu0  ;;  %4264 = vtanh.f32 %v1376_v28  ;;  %v1771_v4 = vpop.f32.mrb[5].mxu1  ;;  %v1770_v13 = vadd.f32 %v1769_v1, %v5567_v14 }
 0x1f3   : > { %v1383_v33 = vpop.f32.mrb[6].mxu0  ;;  %v1382_v39 = vadd.f32 %v1381_v31, %v5573_v18  ;;  %v1773_v10 = vpop.f32.mrb[6].mxu1 }
 0x1f4   : > { %v2010_v35 = vmul.f32 0.5, %v1380_v30  ;;  %v1384_v36 = vadd.f32 %v1383_v33, %v5567_v14  ;;  %v1385_v37 = vpop.f32.mrb[7].mxu0  ;;  %v1774_v16 = vadd.f32 %v1773_v10, %v5567_v14  ;;  %v2088_v23 = vmul.f32 0.5, %v1770_v13  ;;  %v4204_v10 = vld [vmem:[%s5433_s16 + $0x204] ss:$8 sps:$4 sm:$0xff]  }
 0x1f5   : > { %v1386_v42 = vadd.f32 %v1385_v37, %v5573_v18 }
 0x1f6   : > { %4266 = vtanh.f32 %v2010_v35  ;;  %v2011_v41 = vmul.f32 0.5, %v1384_v36  ;;  %1648 = vmatmul.mubr.bf16.gmra.mrb[112].mxu0 %v4182_v32  ;;  %v2089_v28 = vmul.f32 0.5, %v1774_v16  ;;  %v1775_v35 = vpop.f32.mrb[7].mxu1 }
 0x1f7   : > { %1657 = vmatprep.mubr.bf16.mxu0 %v4186_v34  ;;  %v4198_v34 = vld [vmem:[%s5433_s16 + $0x1f4] ss:$8 sps:$4 sm:$0xff]  }
 0x1f8   : > { %v4259_v46 = vpop.eup %4258  ;;  %4268 = vtanh.f32 %v2011_v41 }
 0x1f9   : > { %v2264_v47 = vadd.f32 1.0, %v4259_v46  ;;  %4270 = vtanh.f32 %v1382_v39  ;;  %v1389_v48 = vpop.f32.mrb[8].mxu0  ;;  %v1779_v40 = vpop.f32.mrb[8].mxu1 }
 0x1fa   : > { %v4261_v51 = vpop.eup %4260  ;;  %4272 = vtanh.f32 %v1386_v42  ;;  %v1390_v52 = vadd.f32 %v1389_v48, %v5567_v14  ;;  %v1391_v53 = vpop.f32.mrb[9].mxu0 }
 0x1fb   : > { %v2392_v55 = vmul.f32 0.5, %v2264_v47  ;;  %v2265_v56 = vadd.f32 1.0, %v4261_v51  ;;  %v1392_v57 = vadd.f32 %v1391_v53, %v5573_v18  ;;  %v1393_v58 = vpop.f32.mrb[10].mxu0  ;;  %4274 = vtanh.f32 %v2086_v49  ;;  %v4263_v61 = vpop.eup %4262 }
 0x1fc   : > { %v2012_v62 = vmul.f32 0.5, %v1390_v52  ;;  %v1394_v63 = vadd.f32 %v1393_v58, %v5567_v14  ;;  %v1395_v0 = vpop.f32.mrb[11].mxu0  ;;  %4276 = vtanh.f32 %v2087_v50  ;;  %v4265_v5 = vpop.eup %4264  ;;  %v1772_v49 = vadd.f32 %v1771_v4, %v5573_v18 }
 0x1fd   : > { %v2393_v2 = vmul.f32 0.5, %v2265_v56  ;;  %v5593_v3 = vmul.f32 %v4263_v61, %v2392_v55  ;;  %v1396_v8 = vadd.f32 %v1395_v0, %v5573_v18  ;;  %v1781_v45 = vpop.f32.mrb[9].mxu1  ;;  %v1776_v52 = vadd.f32 %v1775_v35, %v5573_v18  ;;  %v4200_v0 = vld [vmem:[%s5433_s16 + $0x1f0] ss:$8 sps:$4 sm:$0xff]  }
 0x1fe   : > { %4278 = vtanh.f32 %v2012_v62  ;;  %v2013_v6 = vmul.f32 0.5, %v1394_v63  ;;  %1658 = vmatmul.mubr.bf16.gmra.mrb[116].mxu0 %v4188_v54  ;;  %v1783_v50 = vpop.f32.mrb[10].mxu1  ;;  %v1780_v55 = vadd.f32 %v1779_v40, %v5567_v14 }
 0x1ff   : > { %4280 = vtanh.f32 %v1392_v57  ;;  %1667 = vmatprep.mubr.bf16.mxu0 %v4192_v59  ;;  %v5597_v12 = vmul.f32 %v4265_v5, %v2393_v2  ;;  %v1784_v2 = vadd.f32 %v1783_v50, %v5567_v14  ;;  %v1785_v13 = vpop.f32.mrb[11].mxu1 }
 0x200   : > { %v4267_v17 = vpop.eup %4266  ;;  %4282 = vtanh.f32 %v2013_v6  ;;  %v2090_v1 = vmul.f32 0.5, %v1780_v55 }
 0x201   : > { %v2266_v20 = vadd.f32 1.0, %v4267_v17  ;;  %v1399_v21 = vpop.f32.mrb[12].mxu0  ;;  %4284 = vtanh.f32 %v1762_v9 }
 0x202   : > { %v4269_v24 = vpop.eup %4268  ;;  %4286 = vtanh.f32 %v1396_v8  ;;  %v1400_v25 = vadd.f32 %v1399_v21, %v5567_v14  ;;  %v1401_v26 = vpop.f32.mrb[13].mxu0 }
 0x203   : > { %v4271_v29 = vpop.eup %4270  ;;  %v2394_v30 = vmul.f32 0.5, %v2266_v20  ;;  %v2267_v31 = vadd.f32 1.0, %v4269_v24  ;;  %v1402_v32 = vadd.f32 %v1401_v26, %v5573_v18  ;;  %v1403_v33 = vpop.f32.mrb[14].mxu0  ;;  %4288 = vtanh.f32 %v2088_v23 }
 0x204   : > { %v4273_v36 = vpop.eup %4272  ;;  %v2014_v37 = vmul.f32 0.5, %v1400_v25  ;;  %v1404_v38 = vadd.f32 %v1403_v33, %v5567_v14  ;;  %v1405_v39 = vpop.f32.mrb[15].mxu0  ;;  %4290 = vtanh.f32 %v2089_v28  ;;  %v1782_v33 = vadd.f32 %v1781_v45, %v5573_v18 }
 0x205   : > { %v4275_v41 = vpop.eup %4274  ;;  %v2395_v42 = vmul.f32 0.5, %v2267_v31  ;;  %v1406_v43 = vadd.f32 %v1405_v39, %v5573_v18  ;;  %v5610_v44 = vmul.f32 %v4271_v29, %v2394_v30  ;;  %4292 = vtanh.f32 %v1766_v19  ;;  %v1789_v21 = vpop.f32.mrb[12].mxu1 }
 0x206   : > { %v4277_v46 = vpop.eup %4276  ;;  %4294 = vtanh.f32 %v2014_v37  ;;  %v2015_v47 = vmul.f32 0.5, %v1404_v38  ;;  %1668 = vmatmul.mubr.bf16.gmra.mrb[120].mxu0 %v4194_v27  ;;  %v2342_v48 = vadd.f32 1.0, %v4275_v41  ;;  %v1791_v29 = vpop.f32.mrb[13].mxu1  ;;  %v2091_v38 = vmul.f32 0.5, %v1784_v2 }
 0x207   : > { %4296 = vtanh.f32 %v1402_v32  ;;  %1677 = vmatprep.mubr.bf16.mxu0 %v4198_v34  ;;  %v5613_v51 = vmul.f32 %v4273_v36, %v2395_v42  ;;  %v2343_v60 = vadd.f32 1.0, %v4277_v46  ;;  %v1793_v34 = vpop.f32.mrb[14].mxu1  ;;  %v1786_v41 = vadd.f32 %v1785_v13, %v5573_v18 }
 0x208   : > { %v4279_v53 = vpop.eup %4278  ;;  %4298 = vtanh.f32 %v2015_v47  ;;  %v2470_v54 = vmul.f32 0.5, %v2342_v48  ;;  %v1790_v42 = vadd.f32 %v1789_v21, %v5567_v14  ;;  %v1794_v48 = vadd.f32 %v1793_v34, %v5567_v14 }
 0x209   : > { %v4281_v56 = vpop.eup %4280  ;;  %v2268_v57 = vadd.f32 1.0, %v4279_v53  ;;  %v1409_v58 = vpop.f32.mrb[16].mxu0  ;;  %4300 = vtanh.f32 %v1772_v49  ;;  %v5630_v28 = vmul.f32 0.5, %v2343_v60  ;;  %v4206_v53 = vld [vmem:[%s5433_s16 + $0x200] ss:$8 sps:$4 sm:$0xff]  }
 0x20a   : > { %v4283_v61 = vpop.eup %4282  ;;  %4302 = vtanh.f32 %v1406_v43  ;;  %v1410_v62 = vadd.f32 %v1409_v58, %v5567_v14  ;;  %v1411_v63 = vpop.f32.mrb[17].mxu0  ;;  %v2092_v55 = vmul.f32 0.5, %v1790_v42 }
 0x20b   : > { %v4285_v4 = vpop.eup %4284  ;;  %v2396_v5 = vmul.f32 0.5, %v2268_v57  ;;  %v2269_v6 = vadd.f32 1.0, %v4283_v61  ;;  %v1412_v8 = vadd.f32 %v1411_v63, %v5573_v18  ;;  %v1413_v9 = vpop.f32.mrb[18].mxu0  ;;  %4304 = vtanh.f32 %v1776_v52 }
 0x20c   : > { %v4287_v16 = vpop.eup %4286  ;;  %v2016_v17 = vmul.f32 0.5, %v1410_v62  ;;  %v1414_v19 = vadd.f32 %v1413_v9, %v5567_v14  ;;  %v1415_v20 = vpop.f32.mrb[19].mxu0  ;;  %4306 = vtanh.f32 %v2090_v1  ;;  %v5625_v23 = vmul.f32 %v4285_v4, %v2470_v54  ;;  %v4210_v62 = vld [vmem:[%s5433_s16 + $0x214] ss:$8 sps:$4 sm:$0xff]  }
 0x20d   : > { %v4289_v24 = vpop.eup %4288  ;;  %v2397_v25 = vmul.f32 0.5, %v2269_v6  ;;  %v1416_v26 = vadd.f32 %v1415_v20, %v5573_v18  ;;  %v5628_v27 = vmul.f32 %v4281_v56, %v2396_v5  ;;  %v1795_v63 = vpop.f32.mrb[15].mxu1  ;;  %v1792_v20 = vadd.f32 %v1791_v29, %v5573_v18 }
 0x20e   : > { %6828 = vst [vmem:[#allocation25_spill] sm:$0xff] %v5625_v23  ;;  %v4291_v30 = vpop.eup %4290  ;;  %4308 = vtanh.f32 %v2016_v17  ;;  %v2017_v31 = vmul.f32 0.5, %v1414_v19  ;;  %1678 = vmatmul.mubr.bf16.gmra.mrb[124].mxu0 %v4200_v0  ;;  %v2344_v32 = vadd.f32 1.0, %v4289_v24  ;;  %v1799_v5 = vpop.f32.mrb[16].mxu1 }
 0x20f   : > { %v4293_v35 = vpop.eup %4292  ;;  %4310 = vtanh.f32 %v1412_v8  ;;  %1687 = vmatprep.mubr.bf16.mxu0 %v4204_v10  ;;  %v5633_v36 = vmul.f32 %v4287_v16, %v2397_v25  ;;  %v2345_v37 = vadd.f32 1.0, %v4291_v30  ;;  %v1801_v16 = vpop.f32.mrb[17].mxu1  ;;  %v2093_v25 = vmul.f32 0.5, %v1794_v48 }
 0x210   : > { %v4295_v39 = vpop.eup %4294  ;;  %4312 = vtanh.f32 %v2017_v31  ;;  %v2472_v40 = vmul.f32 0.5, %v2344_v32  ;;  %v1803_v21 = vpop.f32.mrb[18].mxu1  ;;  %v1796_v31 = vadd.f32 %v1795_v63, %v5573_v18 }
 0x211   : > { %v4297_v43 = vpop.eup %4296  ;;  %v2270_v46 = vadd.f32 1.0, %v4295_v39  ;;  %4314 = vtanh.f32 %v1416_v26  ;;  %v1419_v45 = vpop.f32.mrb[20].mxu0  ;;  %v2473_v54 = vmul.f32 0.5, %v2345_v37  ;;  %v1800_v26 = vadd.f32 %v1799_v5, %v5567_v14 }
 0x212   : > { %v4299_v49 = vpop.eup %4298  ;;  %v1420_v50 = vadd.f32 %v1419_v45, %v5567_v14  ;;  %v1421_v52 = vpop.f32.mrb[21].mxu0  ;;  %4316 = vtanh.f32 %v1782_v33  ;;  %v5658_v33 = vmul.f32 %v4293_v35, %v5630_v28  ;;  %v1804_v45 = vadd.f32 %v1803_v21, %v5567_v14 }
 0x213   : > { %v4301_v56 = vpop.eup %4300  ;;  %v2398_v57 = vmul.f32 0.5, %v2270_v46  ;;  %v2271_v58 = vadd.f32 1.0, %v4299_v49  ;;  %v1422_v60 = vadd.f32 %v1421_v52, %v5573_v18  ;;  %v1423_v61 = vpop.f32.mrb[22].mxu0  ;;  %4318 = vtanh.f32 %v2091_v38  ;;  %v4216_v52 = vld [vmem:[%s5433_s16 + $0x224] ss:$8 sps:$4 sm:$0xff]  }
 0x214   : > { %v4303_v0 = vpop.eup %4302  ;;  %v2018_v1 = vmul.f32 0.5, %v1420_v50  ;;  %v1424_v2 = vadd.f32 %v1423_v61, %v5567_v14  ;;  %v1425_v4 = vpop.f32.mrb[23].mxu0  ;;  %4320 = vtanh.f32 %v1786_v41  ;;  %v5645_v6 = vmul.f32 %v4301_v56, %v2472_v40  ;;  %6831 = vst [vmem:[#allocation28_spill] sm:$0xff] %v5658_v33 }
 0x215   : > { %v4305_v8 = vpop.eup %4304  ;;  %v2399_v9 = vmul.f32 0.5, %v2271_v58  ;;  %v1426_v10 = vadd.f32 %v1425_v4, %v5573_v18  ;;  %v5648_v13 = vmul.f32 %v4297_v43, %v2398_v57  ;;  %4322 = vtanh.f32 %v2092_v55  ;;  %v4212_v43 = vld [vmem:[%s5433_s16 + $0x210] ss:$8 sps:$4 sm:$0xff]  }
 0x216   : > { %6829 = vst [vmem:[#allocation26_spill] sm:$0xff] %v5645_v6  ;;  %v4307_v17 = vpop.eup %4306  ;;  %4324 = vtanh.f32 %v2018_v1  ;;  %v2019_v19 = vmul.f32 0.5, %v1424_v2  ;;  %1688 = vmatmul.mubr.bf16.gmra.mrb[128].mxu0 %v4206_v53  ;;  %v5655_v32 = vmul.f32 %v4305_v8, %v2473_v54  ;;  %v2094_v46 = vmul.f32 0.5, %v1800_v26  ;;  %v1805_v53 = vpop.f32.mrb[19].mxu1 }
 0x217   : > { %4326 = vtanh.f32 %v1422_v60  ;;  %1697 = vmatprep.mubr.bf16.mxu0 %v4210_v62  ;;  %v5651_v24 = vmul.f32 %v4303_v0, %v2399_v9  ;;  %v2346_v39 = vadd.f32 1.0, %v4307_v17  ;;  %v1809_v58 = vpop.f32.mrb[20].mxu1  ;;  %v1802_v5 = vadd.f32 %v1801_v16, %v5573_v18 }
 0x218   : > { %v4309_v30 = vpop.eup %4308  ;;  %4328 = vtanh.f32 %v2019_v19  ;;  %6830 = vst [vmem:[#allocation27_spill] sm:$0xff] %v5655_v32  ;;  %v1811_v1 = vpop.f32.mrb[21].mxu1  ;;  %v2095_v17 = vmul.f32 0.5, %v1804_v45  ;;  %v1806_v21 = vadd.f32 %v1805_v53, %v5573_v18 }
 0x219   : > { %v4311_v34 = vpop.eup %4310  ;;  %v2272_v29 = vadd.f32 1.0, %v4309_v30  ;;  %4330 = vtanh.f32 %v1426_v10  ;;  %v1429_v37 = vpop.f32.mrb[24].mxu0 }
 0x21a   : > { %v4313_v40 = vpop.eup %4312  ;;  %v1430_v41 = vadd.f32 %v1429_v37, %v5567_v14  ;;  %v1431_v42 = vpop.f32.mrb[25].mxu0  ;;  %4332 = vtanh.f32 %v1792_v20  ;;  %v2474_v20 = vmul.f32 0.5, %v2346_v39 }
 0x21b   : > { %v4315_v28 = vpop.eup %4314  ;;  %v2400_v35 = vmul.f32 0.5, %v2272_v29  ;;  %v2273_v48 = vadd.f32 1.0, %v4313_v40  ;;  %v1432_v49 = vadd.f32 %v1431_v42, %v5573_v18  ;;  %v1433_v50 = vpop.f32.mrb[26].mxu0  ;;  %4334 = vtanh.f32 %v2093_v25 }
 0x21c   : > { %v4317_v54 = vpop.eup %4316  ;;  %v2020_v55 = vmul.f32 0.5, %v1430_v41  ;;  %v1434_v56 = vadd.f32 %v1433_v50, %v5567_v14  ;;  %v1435_v57 = vpop.f32.mrb[27].mxu0  ;;  %4336 = vtanh.f32 %v1796_v31  ;;  %v1810_v25 = vadd.f32 %v1809_v58, %v5567_v14  ;;  %v4218_v41 = vld [vmem:[%s5433_s16 + $0x220] ss:$8 sps:$4 sm:$0xff]  }
 0x21d   : > { %v4319_v61 = vpop.eup %4318  ;;  %v2401_v62 = vmul.f32 0.5, %v2273_v48  ;;  %v1436_v63 = vadd.f32 %v1435_v57, %v5573_v18  ;;  %v5671_v0 = vmul.f32 %v4311_v34, %v2400_v35  ;;  %4338 = vtanh.f32 %v2094_v46  ;;  %v1813_v8 = vpop.f32.mrb[22].mxu1  ;;  %v4222_v48 = vld [vmem:[%s5433_s16 + $0x234] ss:$8 sps:$4 sm:$0xff]  }
 0x21e   : > { %v5673_v2 = vpop.eup %4320  ;;  %4340 = vtanh.f32 %v2020_v55  ;;  %v2021_v4 = vmul.f32 0.5, %v1434_v56  ;;  %1698 = vmatmul.mubr.bf16.gmra.mrb[132].mxu0 %v4212_v43  ;;  %v2347_v34 = vadd.f32 1.0, %v4319_v61  ;;  %v2096_v39 = vmul.f32 0.5, %v1810_v25 }
 0x21f   : > { %v5676_v9 = vpop.eup %4322  ;;  %4342 = vtanh.f32 %v1432_v49  ;;  %1707 = vmatprep.mubr.bf16.mxu0 %v4216_v52  ;;  %v5678_v10 = vmul.f32 %v4315_v28, %v2401_v62  ;;  %v1814_v42 = vadd.f32 %v1813_v8, %v5567_v14  ;;  %v1815_v49 = vpop.f32.mrb[23].mxu1  ;;  %v5692_v57 = vmul.f32 %v4317_v54, %v2474_v20 }
 0x220   : > { %v4325_v19 = vpop.eup %4324  ;;  %4344 = vtanh.f32 %v2021_v4  ;;  %v1819_v56 = vpop.f32.mrb[24].mxu1 }
 0x221   : > { %v4327_v26 = vpop.eup %4326  ;;  %v2274_v30 = vadd.f32 1.0, %v4325_v19  ;;  %4346 = vtanh.f32 %v1436_v63  ;;  %v1439_v16 = vpop.f32.mrb[28].mxu0  ;;  %6832 = vst [vmem:[#allocation29_spill] sm:$0xff] %v5692_v57  ;;  %v2097_v20 = vmul.f32 0.5, %v1814_v42  ;;  %v4224_v42 = vld [vmem:[%s5433_s16 + $0x230] ss:$8 sps:$4 sm:$0xff]  }
 0x222   : > { %v4329_v29 = vpop.eup %4328  ;;  %v1440_v37 = vadd.f32 %v1439_v16, %v5567_v14  ;;  %v1441_v40 = vpop.f32.mrb[29].mxu0  ;;  %4348 = vtanh.f32 %v1802_v5  ;;  %v1820_v16 = vadd.f32 %v1819_v56, %v5567_v14 }
 0x223   : > { %v4331_v43 = vpop.eup %4330  ;;  %v2402_v46 = vmul.f32 0.5, %v2274_v30  ;;  %v2275_v45 = vadd.f32 1.0, %v4329_v29  ;;  %v1442_v28 = vadd.f32 %v1441_v40, %v5573_v18  ;;  %v1443_v35 = vpop.f32.mrb[30].mxu0  ;;  %4350 = vtanh.f32 %v2095_v17 }
 0x224   : > { %v5689_v50 = vpop.eup %4332  ;;  %v2022_v52 = vmul.f32 0.5, %v1440_v37  ;;  %v1444_v53 = vadd.f32 %v1443_v35, %v5567_v14  ;;  %v1445_v55 = vpop.f32.mrb[31].mxu0  ;;  %4352 = vtanh.f32 %v1806_v21  ;;  %v1812_v17 = vadd.f32 %v1811_v1, %v5573_v18 }
 0x225   : > { %v5694_v58 = vpop.eup %4334  ;;  %v2403_v61 = vmul.f32 0.5, %v2275_v45  ;;  %v1446_v62 = vadd.f32 %v1445_v55, %v5573_v18  ;;  %v5697_v63 = vmul.f32 %v4327_v26, %v2402_v46  ;;  %4354 = vtanh.f32 %v2096_v39  ;;  %v1821_v4 = vpop.f32.mrb[25].mxu1 }
 0x226   : > { %v5699_v5 = vpop.eup %4336  ;;  %4356 = vtanh.f32 %v2022_v52  ;;  %v2023_v8 = vmul.f32 0.5, %v1444_v53  ;;  %1708 = vmatmul.mubr.bf16.gmra.mrb[136].mxu0 %v4218_v41  ;;  %v1823_v19 = vpop.f32.mrb[26].mxu1  ;;  %v2475_v26 = vmul.f32 0.5, %v2347_v34  ;;  %v1816_v30 = vadd.f32 %v1815_v49, %v5573_v18  ;;  %v4228_v52 = vld [vmem:[%s5433_s16 + $0x244] ss:$8 sps:$4 sm:$0xff]  }
 0x227   : > { %v5702_v21 = vpop.eup %4338  ;;  %4358 = vtanh.f32 %v1442_v28  ;;  %1717 = vmatprep.mubr.bf16.mxu0 %v4222_v48  ;;  %v5704_v54 = vmul.f32 %v4331_v43, %v2403_v61  ;;  %v2098_v46 = vmul.f32 0.5, %v1820_v16  ;;  %v1824_v34 = vadd.f32 %v1823_v19, %v5567_v14  ;;  %v1825_v53 = vpop.f32.mrb[27].mxu1 }
 0x228   : > { %v4341_v25 = vpop.eup %4340  ;;  %4360 = vtanh.f32 %v2023_v8  ;;  %v1829_v8 = vpop.f32.mrb[28].mxu1 }
 0x229   : > { %v4343_v29 = vpop.eup %4342  ;;  %v2276_v37 = vadd.f32 1.0, %v4341_v25  ;;  %4362 = vtanh.f32 %v1446_v62  ;;  %v1449_v1 = vpop.f32.mrb[32].mxu0 }
 0x22a   : > { %v4345_v41 = vpop.eup %4344  ;;  %v1450_v39 = vadd.f32 %v1449_v1, %v5567_v14  ;;  %v1451_v43 = vpop.f32.mrb[33].mxu0  ;;  %4364 = vtanh.f32 %v1812_v17  ;;  %v5719_v17 = vmul.f32 %v5673_v2, %v2475_v26  ;;  %v2099_v26 = vmul.f32 0.5, %v1824_v34 }
 0x22b   : > { %v4347_v45 = vpop.eup %4346  ;;  %v2404_v28 = vmul.f32 0.5, %v2276_v37  ;;  %v2277_v35 = vadd.f32 1.0, %v4345_v41  ;;  %v1452_v48 = vadd.f32 %v1451_v43, %v5573_v18  ;;  %v1453_v49 = vpop.f32.mrb[34].mxu0  ;;  %4366 = vtanh.f32 %v2097_v20 }
 0x22c   : > { %v5715_v55 = vpop.eup %4348  ;;  %v2024_v56 = vmul.f32 0.5, %v1450_v39  ;;  %v1454_v61 = vadd.f32 %v1453_v49, %v5567_v14  ;;  %v1455_v62 = vpop.f32.mrb[35].mxu0  ;;  %4368 = vtanh.f32 %v1816_v30  ;;  %6833 = vst [vmem:[#allocation30_spill] sm:$0xff] %v5719_v17  ;;  %v1822_v30 = vadd.f32 %v1821_v4, %v5573_v18  ;;  %v4242_v17 = vld [vmem:[%s5433_s16 + $0x260] ss:$8 sps:$4 sm:$0xff]  }
 0x22d   : > { %v5721_v19 = vpop.eup %4350  ;;  %v2405_v25 = vmul.f32 0.5, %v2277_v35  ;;  %v1456_v16 = vadd.f32 %v1455_v62, %v5573_v18  ;;  %v5724_v37 = vmul.f32 %v4343_v29, %v2404_v28  ;;  %4370 = vtanh.f32 %v2098_v46  ;;  %v1831_v20 = vpop.f32.mrb[29].mxu1 }
 0x22e   : > { %v5726_v1 = vpop.eup %4352  ;;  %4372 = vtanh.f32 %v2024_v56  ;;  %v2025_v41 = vmul.f32 0.5, %v1454_v61  ;;  %1718 = vmatmul.mubr.bf16.gmra.mrb[140].mxu0 %v4224_v42  ;;  %v1833_v39 = vpop.f32.mrb[30].mxu1  ;;  %v1826_v46 = vadd.f32 %v1825_v53, %v5573_v18  ;;  %v1830_v28 = vadd.f32 %v1829_v8, %v5567_v14  ;;  %v4230_v56 = vld [vmem:[%s5433_s16 + $0x240] ss:$8 sps:$4 sm:$0xff]  }
 0x22f   : > { %v5729_v43 = vpop.eup %4354  ;;  %4374 = vtanh.f32 %v1452_v48  ;;  %1727 = vmatprep.mubr.bf16.mxu0 %v4228_v52  ;;  %v5731_v2 = vmul.f32 %v4347_v45, %v2405_v25  ;;  %v2348_v48 = vadd.f32 1.0, %v5676_v9  ;;  %v1834_v53 = vadd.f32 %v1833_v39, %v5567_v14  ;;  %v1835_v60 = vpop.f32.mrb[31].mxu1 }
 0x230   : > { %v4357_v29 = vpop.eup %4356  ;;  %4376 = vtanh.f32 %v2025_v41  ;;  %v2100_v61 = vmul.f32 0.5, %v1830_v28 }
 0x231   : > { %v4359_v35 = vpop.eup %4358  ;;  %v2278_v49 = vadd.f32 1.0, %v4357_v29  ;;  %4378 = vtanh.f32 %v1456_v16  ;;  %v1459_v4 = vpop.f32.mrb[36].mxu0  ;;  %v4234_v29 = vld [vmem:[%s5433_s16 + $0x254] ss:$8 sps:$4 sm:$0xff]  }
 0x232   : > { %v4361_v52 = vpop.eup %4360  ;;  %v1460_v45 = vadd.f32 %v1459_v4, %v5567_v14  ;;  %v1461_v34 = vpop.f32.mrb[37].mxu0  ;;  %4380 = vtanh.f32 %v1822_v30 }
 0x233   : > { %v4363_v62 = vpop.eup %4362  ;;  %v2406_v8 = vmul.f32 0.5, %v2278_v49  ;;  %v2279_v25 = vadd.f32 1.0, %v4361_v52  ;;  %v1462_v16 = vadd.f32 %v1461_v34, %v5573_v18  ;;  %v1463_v41 = vpop.f32.mrb[38].mxu0  ;;  %4382 = vtanh.f32 %v2099_v26 }
 0x234   : > { %v5743_v42 = vpop.eup %4364  ;;  %v2026_v9 = vmul.f32 0.5, %v1460_v45  ;;  %v1464_v4 = vadd.f32 %v1463_v41, %v5567_v14  ;;  %v1465_v40 = vpop.f32.mrb[39].mxu0  ;;  %4384 = vtanh.f32 %v1826_v46  ;;  %v2476_v46 = vmul.f32 0.5, %v2348_v48 }
 0x235   : > { %v1839_v30 = vpop.f32.mrb[32].mxu1  ;;  %v5748_v28 = vpop.eup %4366  ;;  %v2407_v49 = vmul.f32 0.5, %v2279_v25  ;;  %v1466_v52 = vadd.f32 %v1465_v40, %v5573_v18  ;;  %v5751_v34 = vmul.f32 %v4359_v35, %v2406_v8  ;;  %4386 = vtanh.f32 %v2100_v61 }
 0x236   : > { %v5753_v26 = vpop.f32.mrb[33].mxu1  ;;  %v5755_v31 = vpop.eup %4368  ;;  %4388 = vtanh.f32 %v2026_v9  ;;  %v2027_v45 = vmul.f32 0.5, %v1464_v4  ;;  %1728 = vmatmul.mubr.bf16.gmra.mrb[144].mxu0 %v4230_v56  ;;  %v1832_v41 = vadd.f32 %v1831_v20, %v5573_v18  ;;  %v2349_v40 = vadd.f32 1.0, %v5694_v58 }
 0x237   : > { %v1843_v38 = vpop.f32.mrb[34].mxu1  ;;  %v5758_v39 = vpop.eup %4370  ;;  %4390 = vtanh.f32 %v1462_v16  ;;  %1737 = vmatprep.mubr.bf16.mxu0 %v4234_v29  ;;  %v5760_v25 = vmul.f32 %v4363_v62, %v2407_v49  ;;  %v2101_v35 = vmul.f32 0.5, %v1834_v53  ;;  %v2350_v8 = vadd.f32 1.0, %v5702_v21  ;;  %v4236_v49 = vld [vmem:[%s5433_s16 + $0x250] ss:$8 sps:$4 sm:$0xff]  }
 0x238   : > { %v4373_v61 = vpop.eup %4372  ;;  %4392 = vtanh.f32 %v2027_v45  ;;  %v1836_v56 = vadd.f32 %v1835_v60, %v5573_v18  ;;  %v1840_v48 = vadd.f32 %v1839_v30, %v5567_v14  ;;  %v2351_v58 = vadd.f32 1.0, %v5721_v19  ;;  %v1845_v62 = vpop.f32.mrb[35].mxu1 }
 0x239   : > { %v4375_v20 = vpop.eup %4374  ;;  %v2280_v9 = vadd.f32 1.0, %v4373_v61  ;;  %4394 = vtanh.f32 %v1466_v52  ;;  %v1469_v16 = vpop.f32.mrb[40].mxu0  ;;  %v1844_v60 = vadd.f32 %v1843_v38, %v5567_v14  ;;  %v5778_v38 = vmul.f32 %v5689_v50, %v2476_v46  ;;  %v5792_v50 = vld [vmem:[%s5426_s13] sm:$0xff] }
 0x23a   : > { %v4377_v29 = vpop.eup %4376  ;;  %v1470_v53 = vadd.f32 %v1469_v16, %v5567_v14  ;;  %v1471_v4 = vpop.f32.mrb[41].mxu0  ;;  %4396 = vtanh.f32 %v1832_v41  ;;  %v2102_v21 = vmul.f32 0.5, %v1840_v48 }
 0x23b   : > { %v4379_v30 = vpop.eup %4378  ;;  %v2408_v45 = vmul.f32 0.5, %v2280_v9  ;;  %v2281_v61 = vadd.f32 1.0, %v4377_v29  ;;  %v1472_v52 = vadd.f32 %v1471_v4, %v5573_v18  ;;  %v1473_v47 = vpop.f32.mrb[42].mxu0  ;;  %4398 = vtanh.f32 %v2101_v35  ;;  %6834 = vst [vmem:[#allocation31_spill] sm:$0xff] %v5778_v38 }
 0x23c   : > { %v5774_v59 = vpop.eup %4380  ;;  %v2028_v19 = vmul.f32 0.5, %v1470_v53  ;;  %v1474_v16 = vadd.f32 %v1473_v47, %v5567_v14  ;;  %v1475_v22 = vpop.f32.mrb[43].mxu0  ;;  %4400 = vtanh.f32 %v1836_v56  ;;  %v5782_v4 = vmul.f32 0.5, %v2349_v40 }
 0x23d   : > { %v1849_v41 = vpop.f32.mrb[36].mxu1  ;;  %v5780_v48 = vpop.eup %4382  ;;  %v2409_v9 = vmul.f32 0.5, %v2281_v61  ;;  %v2664_v29 = vmul.f32 %v4375_v20, %v2408_v45  ;;  %4402 = vtanh.f32 %v2102_v21  ;;  %v1476_v56 = vadd.f32 %v1475_v22, %v5573_v18 }
 0x23e   : > { %v5784_v35 = vpop.f32.mrb[37].mxu1  ;;  %v5786_v15 = vpop.eup %4384  ;;  %4404 = vtanh.f32 %v2028_v19  ;;  %v2029_v47 = vmul.f32 0.5, %v1474_v16  ;;  %1738 = vmatmul.mubr.bf16.gmra.mrb[148].mxu0 %v4236_v49  ;;  %v5789_v53 = vmul.f32 0.5, %v2350_v8  ;;  %v6835_v20 = vsub.s32 1, %v5558_v7 }
 0x23f   : > { %v5794_v46 = vpop.f32.mrb[38].mxu1  ;;  %v5796_v61 = vpop.eup %4386  ;;  %4406 = vtanh.f32 %v1472_v52  ;;  %v2665_v40 = vmul.f32 %v4379_v30, %v2409_v9  ;;  %1747 = vmatprep.mubr.bf16.mxu0 %v4240_v11  ;;  %v1842_v49 = vadd.f32 %v5753_v26, %v5573_v18  ;;  %v5803_v8 = vmul.f32 0.5, %v2351_v58 }
 0x240   : > { %v2850_v21 = vrot.slane %v5792_v50, %v6835_v20  ;;  %v4389_v22 = vpop.eup %4388  ;;  %4408 = vtanh.f32 %v2029_v47  ;;  %v2352_v45 = vadd.f32 1.0, %v5729_v43  ;;  %v2103_v19 = vmul.f32 0.5, %v1844_v60 }
 0x241   : > { %v4391_v16 = vpop.eup %4390  ;;  %v2282_v57 = vadd.f32 1.0, %v4389_v22  ;;  %v1479_v52 = vpop.f32.mrb[44].mxu0  ;;  %v2784_v30 = vpack.c.bf16 %v2665_v40, %v2664_v29  ;;  %v1846_v11 = vadd.f32 %v1845_v62, %v5573_v18  ;;  %4410 = vtanh.f32 %v1476_v56 }
 0x242   : > { %vm2876_vm0 = vcmp.eq.s32.totalorder %v2850_v21, %v5558_v7  ;;  %v4393_v9 = vpop.eup %4392  ;;  %v1480_v26 = vadd.f32 %v1479_v52, %v5567_v14  ;;  %v1481_v20 = vpop.f32.mrb[45].mxu0  ;;  %v2353_v58 = vadd.f32 1.0, %v5748_v28  ;;  %v6766_v29 = vmov 1.0|1.0  }
 0x243   : > { %vm3695_vm1 = vmpackc.low %vm2876_vm0, %vm2876_vm0  ;;  %v4395_v47 = vpop.eup %4394  ;;  %v2410_v43 = vmul.f32 0.5, %v2282_v57  ;;  %v2283_v60 = vadd.f32 1.0, %v4393_v9  ;;  %v1482_v22 = vadd.f32 %v1481_v20, %v5573_v18  ;;  %v1483_v6 = vpop.f32.mrb[46].mxu0  ;;  %3753 = vmatprep.subr.bf16.mxu1 %v2784_v30  ;;  %4412 = vtanh.f32 %v1842_v49 }
 0x244   : > { %3696 = vmatprep.mubr.msk.bf16.mxu1 %vm3695_vm1, %v6766_v29  ;;  %v1855_v62 = vpop.f32.mrb[39].mxu1  ;;  %v5813_v56 = vpop.eup %4396  ;;  %v2030_v40 = vmul.f32 0.5, %v1480_v26  ;;  %v1484_v21 = vadd.f32 %v1483_v6, %v5567_v14  ;;  %v6836_v28 = vpack.c.bf16 %v5597_v12, %v5593_v3  ;;  %4414 = vtanh.f32 %v2103_v19 }
 0x245   : > { %v1485_v57 = vpop.f32.mrb[47].mxu0  ;;  %v1850_v52 = vadd.f32 %v1849_v41, %v5567_v14  ;;  %v1859_v9 = vpop.f32.mrb[40].mxu1  ;;  %v2411_v20 = vmul.f32 0.5, %v2283_v60  ;;  %v2666_v29 = vmul.f32 %v4391_v16, %v2410_v43  ;;  %4416 = vtanh.f32 %v1846_v11 }
 0x246   : > { %3754 = vmatpush3.bf16.msra.mxu1 %v6836_v28  ;;  %v5820_v30 = vpop.eup %4398  ;;  %v1486_v49 = vadd.f32 %v1485_v57, %v5573_v18  ;;  %v5823_v32 = vpop.f32.mrb[41].mxu1  ;;  %4418 = vtanh.f32 %v2030_v40  ;;  %v2031_v6 = vmul.f32 0.5, %v1484_v21  ;;  %1748 = vmatmul.mubr.bf16.gmra.mrb[152].mxu0 %v4242_v17  ;;  %v2354_v3 = vadd.f32 1.0, %v5758_v39 }
 0x247   : > { %v5825_v26 = vpop.eup %4400  ;;  %v2104_v12 = vmul.f32 0.5, %v1850_v52  ;;  %v1863_v19 = vpop.f32.mrb[42].mxu1  ;;  %4420 = vtanh.f32 %v1482_v22  ;;  %v2667_v28 = vmul.f32 %v4395_v47, %v2411_v20  ;;  %v5830_v60 = vmul.f32 0.5, %v2352_v45 }
 0x248   : > { %6837 = vst [vmem:[#allocation32_spill] sm:$0xff] %v5825_v26  ;;  %v5828_v41 = vpop.eup %4402  ;;  %v5832_v57 = vmul.f32 0.5, %v2353_v58  ;;  %4422 = vtanh.f32 %v2031_v6  ;;  %v2355_v11 = vadd.f32 1.0, %v5780_v48  ;;  %v1852_v43 = vadd.f32 %v5784_v35, %v5573_v18 }
 0x249   : > { %v4405_v16 = vpop.eup %4404  ;;  %v1854_v17 = vadd.f32 %v5794_v46, %v5567_v14  ;;  %4424 = vtanh.f32 %v1486_v49  ;;  %v1489_v21 = vpop.f32.mrb[48].mxu0  ;;  %v2785_v22 = vpack.c.bf16 %v2667_v28, %v2666_v29  ;;  %v1856_v45 = vadd.f32 %v1855_v62, %v5573_v18 }
 0x24a   : > { %v4407_v39 = vpop.eup %4406  ;;  %v2284_v40 = vadd.f32 1.0, %v4405_v16  ;;  %v1490_v58 = vadd.f32 %v1489_v21, %v5567_v14  ;;  %v1491_v52 = vpop.f32.mrb[49].mxu0  ;;  %v5841_v20 = vmul.f32 0.5, %v2354_v3  ;;  %v2356_v48 = vadd.f32 1.0, %v5796_v61 }
 0x24b   : > { %v4409_v47 = vpop.eup %4408  ;;  %4426 = vtanh.f32 %v2104_v12  ;;  %v1493_v33 = vpop.f32.mrb[50].mxu0  ;;  %3755 = vmatprep.subr.bf16.mxu1 %v2785_v22  ;;  %v2105_v46 = vmul.f32 0.5, %v1854_v17  ;;  %v1860_v49 = vadd.f32 %v1859_v9, %v5567_v14  ;;  %v6838_v21 = vpack.c.bf16 %v5613_v51, %v5610_v44 }
 0x24c   : > { %v2412_v35 = vmul.f32 0.5, %v2284_v40  ;;  %v2285_v6 = vadd.f32 1.0, %v4409_v47  ;;  %v1865_v16 = vpop.f32.mrb[43].mxu1  ;;  %v4411_v29 = vpop.eup %4410  ;;  %v2032_v28 = vmul.f32 0.5, %v1490_v58  ;;  %v1494_v62 = vadd.f32 %v1493_v33, %v5567_v14 }
 0x24d   : > { %3756 = vmatpush3.bf16.msra.mxu1 %v6838_v21  ;;  %v1495_v3 = vpop.f32.mrb[51].mxu0  ;;  %v5849_v23 = vmul.f32 0.5, %v2355_v11  ;;  %4428 = vtanh.f32 %v1852_v43  ;;  %v1869_v61 = vpop.f32.mrb[44].mxu1  ;;  %v1492_v17 = vadd.f32 %v1491_v52, %v5573_v18  ;;  %v6840_v51 = vsub.s32 0, %v5558_v7 }
 0x24e   : > { %v5851_v12 = vpop.eup %4412  ;;  %v2413_v40 = vmul.f32 0.5, %v2285_v6  ;;  %v2668_v9 = vmul.f32 %v4407_v39, %v2412_v35  ;;  %4430 = vtanh.f32 %v1856_v45  ;;  %v5854_v22 = vpop.f32.mrb[45].mxu1  ;;  %v2033_v33 = vmul.f32 0.5, %v1494_v62 }
 0x24f   : > { %6839 = vst [vmem:[#allocation33_spill] sm:$0xff] %v5851_v12  ;;  %v4415_v47 = vpop.eup %4414  ;;  %4432 = vtanh.f32 %v2032_v28  ;;  %v1496_v44 = vadd.f32 %v1495_v3, %v5573_v18  ;;  %v5860_v11 = vrot.slane %v5792_v50, %v6840_v51  ;;  %v1873_v43 = vpop.f32.mrb[46].mxu1  ;;  %v2106_v52 = vmul.f32 0.5, %v1860_v49 }
 0x250   : > { %v5862_v58 = vpop.eup %4416  ;;  %v2669_v6 = vmul.f32 %v4411_v29, %v2413_v40  ;;  %4434 = vtanh.f32 %v2105_v46  ;;  %v1864_v39 = vadd.f32 %v1863_v19, %v5567_v14  ;;  %v5865_v35 = vmul.f32 0.5, %v2356_v48 }
 0x251   : > { %6841 = vst [vmem:[#allocation34_spill] sm:$0xff] %v5862_v58  ;;  %v4419_v45 = vpop.eup %4418  ;;  %4436 = vtanh.f32 %v2033_v33  ;;  %v2357_v28 = vadd.f32 1.0, %v5820_v30  ;;  %v1862_v62 = vadd.f32 %v5823_v32, %v5573_v18  ;;  %v1499_v51 = vpop.f32.mrb[52].mxu0  ;;  %v2358_v49 = vadd.f32 1.0, %v5828_v41 }
 0x252   : > { %v4421_v21 = vpop.eup %4420  ;;  %v2286_v3 = vadd.f32 1.0, %v4419_v45  ;;  %4438 = vtanh.f32 %v1492_v17  ;;  %v2786_v12 = vpack.c.bf16 %v2669_v6, %v2668_v9  ;;  %v2107_v58 = vmul.f32 0.5, %v1864_v39  ;;  %v1501_v19 = vpop.f32.mrb[53].mxu0 }
 0x253   : > { %v4423_v29 = vpop.eup %4422  ;;  %4440 = vtanh.f32 %v1496_v44  ;;  %v1500_v46 = vadd.f32 %v1499_v51, %v5567_v14  ;;  %v1866_v48 = vadd.f32 %v1865_v16, %v5573_v18  ;;  %v1503_v26 = vpop.f32.mrb[54].mxu0  ;;  %v1870_v32 = vadd.f32 %v1869_v61, %v5567_v14 }
 0x254   : > { %v4425_v40 = vpop.eup %4424  ;;  %v2414_v30 = vmul.f32 0.5, %v2286_v3  ;;  %v2287_v33 = vadd.f32 1.0, %v4423_v29  ;;  %3757 = vmatprep.subr.bf16.mxu1 %v2786_v12  ;;  %4442 = vtanh.f32 %v2106_v52  ;;  %v1875_v17 = vpop.f32.mrb[47].mxu1  ;;  %v1504_v44 = vadd.f32 %v1503_v26, %v5567_v14 }
 0x255   : > { %v4427_v9 = vpop.eup %4426  ;;  %v2034_v6 = vmul.f32 0.5, %v1500_v46  ;;  %v6842_v39 = vpack.c.bf16 %v5633_v36, %v5628_v27  ;;  %v1505_v41 = vpop.f32.mrb[55].mxu0  ;;  %4444 = vtanh.f32 %v1862_v62  ;;  %v1874_v16 = vadd.f32 %v1873_v43, %v5567_v14 }
 0x256   : > { %v1879_v45 = vpop.f32.mrb[48].mxu1  ;;  %v2415_v3 = vmul.f32 0.5, %v2287_v33  ;;  %v1502_v12 = vadd.f32 %v1501_v19, %v5573_v18  ;;  %v2670_v52 = vmul.f32 %v4421_v21, %v2414_v30  ;;  %4446 = vtanh.f32 %v2107_v58 }
 0x257   : > { %3758 = vmatpush3.bf16.msra.mxu1 %v6842_v39  ;;  %v5880_v61 = vpop.f32.mrb[49].mxu1  ;;  %v5882_v51 = vpop.eup %4428  ;;  %4448 = vtanh.f32 %v2034_v6  ;;  %v2035_v26 = vmul.f32 0.5, %v1504_v44  ;;  %v1506_v29 = vadd.f32 %v1505_v41, %v5573_v18  ;;  %v5885_v27 = vmul.f32 0.5, %v2357_v28 }
 0x258   : > { %v1883_v36 = vpop.f32.mrb[50].mxu1  ;;  %v5887_v62 = vpop.eup %4430  ;;  %v2671_v43 = vmul.f32 %v4425_v40, %v2415_v3  ;;  %v5889_v46 = vmul.f32 0.5, %v2358_v49  ;;  %4450 = vtanh.f32 %v1866_v48  ;;  %v2108_v19 = vmul.f32 0.5, %v1870_v32 }
 0x259   : > { %6843 = vst [vmem:[#allocation35_spill] sm:$0xff] %v5887_v62  ;;  %v4433_v21 = vpop.eup %4432  ;;  %4452 = vtanh.f32 %v2035_v26  ;;  %v2359_v58 = vadd.f32 1.0, %v4415_v47  ;;  %v1872_v30 = vadd.f32 %v5854_v22, %v5573_v18  ;;  %v5895_v33 = vmul.f32 %v5699_v5, %v5782_v4  ;;  %v1509_v44 = vpop.f32.mrb[56].mxu0 }
 0x25a   : > { %v4435_v28 = vpop.eup %4434  ;;  %v2288_v6 = vadd.f32 1.0, %v4433_v21  ;;  %4454 = vtanh.f32 %v1502_v12  ;;  %v2787_v39 = vpack.c.bf16 %v2671_v43, %v2670_v52  ;;  %v2109_v40 = vmul.f32 0.5, %v1874_v16  ;;  %v1511_v32 = vpop.f32.mrb[57].mxu0 }
 0x25b   : > { %6844 = vst [vmem:[#allocation36_spill] sm:$0xff] %v5895_v33  ;;  %v4437_v49 = vpop.eup %4436  ;;  %4456 = vtanh.f32 %v1506_v29  ;;  %v1510_v48 = vadd.f32 %v1509_v44, %v5567_v14  ;;  %v2360_v41 = vadd.f32 1.0, %v4427_v9  ;;  %v1876_v47 = vadd.f32 %v1875_v17, %v5573_v18  ;;  %v1513_v62 = vpop.f32.mrb[58].mxu0 }
 0x25c   : > { %v4439_v3 = vpop.eup %4438  ;;  %v2416_v22 = vmul.f32 0.5, %v2288_v6  ;;  %v2289_v26 = vadd.f32 1.0, %v4437_v49  ;;  %3759 = vmatprep.subr.bf16.mxu1 %v2787_v39  ;;  %4458 = vtanh.f32 %v2108_v19  ;;  %v1880_v5 = vadd.f32 %v1879_v45, %v5567_v14  ;;  %v1885_v4 = vpop.f32.mrb[51].mxu1 }
 0x25d   : > { %v4441_v12 = vpop.eup %4440  ;;  %v2036_v52 = vmul.f32 0.5, %v1510_v48  ;;  %v1514_v16 = vadd.f32 %v1513_v62, %v5567_v14  ;;  %v6845_v29 = vpack.c.bf16 %v5651_v24, %v5648_v13  ;;  %v1515_v9 = vpop.f32.mrb[59].mxu0  ;;  %4460 = vtanh.f32 %v1872_v30 }
 0x25e   : > { %v1884_v17 = vadd.f32 %v1883_v36, %v5567_v14  ;;  %v1889_v43 = vpop.f32.mrb[52].mxu1  ;;  %v4443_v21 = vpop.eup %4442  ;;  %v2417_v6 = vmul.f32 0.5, %v2289_v26  ;;  %v1512_v19 = vadd.f32 %v1511_v32, %v5573_v18  ;;  %v2672_v44 = vmul.f32 %v4439_v3, %v2416_v22 }
 0x25f   : > { %3760 = vmatpush3.bf16.msra.mxu1 %v6845_v29  ;;  %4462 = vtanh.f32 %v2109_v40  ;;  %v5906_v45 = vpop.f32.mrb[53].mxu1  ;;  %v5908_v39 = vpop.eup %4444  ;;  %v2037_v62 = vmul.f32 0.5, %v1514_v16  ;;  %v1516_v13 = vadd.f32 %v1515_v9, %v5573_v18  ;;  %v5911_v24 = vmul.f32 0.5, %v2359_v58 }
 0x260   : > { %4464 = vtanh.f32 %v2036_v52  ;;  %v1893_v30 = vpop.f32.mrb[54].mxu1  ;;  %v4447_v49 = vpop.eup %4446  ;;  %v2673_v36 = vmul.f32 %v4441_v12, %v2417_v6  ;;  %v5913_v48 = vmul.f32 0.5, %v2360_v41  ;;  %v2110_v26 = vmul.f32 0.5, %v1880_v5 }
 0x261   : > { %4466 = vtanh.f32 %v1876_v47  ;;  %v4449_v32 = vpop.eup %4448  ;;  %v2361_v40 = vadd.f32 1.0, %v4435_v28  ;;  %v1882_v3 = vadd.f32 %v5880_v61, %v5573_v18  ;;  %v2111_v22 = vmul.f32 0.5, %v1884_v17  ;;  %v1519_v58 = vpop.f32.mrb[60].mxu0 }
 0x262   : > { %4468 = vtanh.f32 %v2037_v62  ;;  %v5917_v52 = vpop.eup %4450  ;;  %v2290_v16 = vadd.f32 1.0, %v4449_v32  ;;  %v2788_v29 = vpack.c.bf16 %v2673_v36, %v2672_v44  ;;  %v1520_v47 = vadd.f32 %v1519_v58, %v5567_v14  ;;  %v1521_v5 = vpop.f32.mrb[61].mxu0 }
 0x263   : > { %4470 = vtanh.f32 %v1512_v19  ;;  %v4453_v41 = vpop.eup %4452  ;;  %v2362_v9 = vadd.f32 1.0, %v4443_v21  ;;  %v1886_v28 = vadd.f32 %v1885_v4, %v5573_v18  ;;  %v1523_v62 = vpop.f32.mrb[62].mxu0  ;;  %v1890_v19 = vadd.f32 %v1889_v43, %v5567_v14 }
 0x264   : > { %4472 = vtanh.f32 %v1516_v13  ;;  %v4455_v6 = vpop.eup %4454  ;;  %v2418_v61 = vmul.f32 0.5, %v2290_v16  ;;  %v2291_v17 = vadd.f32 1.0, %v4453_v41  ;;  %3761 = vmatprep.subr.bf16.mxu1 %v2788_v29  ;;  %v1895_v44 = vpop.f32.mrb[55].mxu1  ;;  %v2038_v32 = vmul.f32 0.5, %v1520_v47 }
 0x265   : > { %4474 = vtanh.f32 %v2110_v26  ;;  %v4457_v36 = vpop.eup %4456  ;;  %v1524_v12 = vadd.f32 %v1523_v62, %v5567_v14  ;;  %v6846_v13 = vpack.c.bf16 %v5678_v10, %v5671_v0  ;;  %v1525_v21 = vpop.f32.mrb[63].mxu0  ;;  %v1894_v4 = vadd.f32 %v1893_v30, %v5567_v14 }
 0x266   : > { %4476 = vtanh.f32 %v1882_v3  ;;  %v1899_v16 = vpop.f32.mrb[56].mxu1  ;;  %v4459_v58 = vpop.eup %4458  ;;  %v2419_v41 = vmul.f32 0.5, %v2291_v17  ;;  %v1522_v26 = vadd.f32 %v1521_v5, %v5573_v18  ;;  %v2674_v29 = vmul.f32 %v4455_v6, %v2418_v61 }
 0x267   : > { %3762 = vmatpush3.bf16.msra.mxu1 %v6846_v13  ;;  %4478 = vtanh.f32 %v2111_v22  ;;  %v5930_v43 = vpop.f32.mrb[57].mxu1  ;;  %v5932_v47 = vpop.eup %4460  ;;  %v2039_v62 = vmul.f32 0.5, %v1524_v12  ;;  %v1526_v0 = vadd.f32 %v1525_v21, %v5573_v18  ;;  %v5935_v10 = vmul.f32 0.5, %v2361_v40 }
 0x268   : > { %4480 = vtanh.f32 %v2038_v32  ;;  %v1903_v3 = vpop.f32.mrb[58].mxu1  ;;  %v2675_v30 = vmul.f32 %v4457_v36, %v2419_v41  ;;  %v5937_v38 = vmul.f32 0.5, %v2362_v9  ;;  %v2112_v17 = vmul.f32 0.5, %v1890_v19 }
 0x269   : > { %v4463_v13 = vpop.eup %4462  ;;  %4482 = vtanh.f32 %v1886_v28  ;;  %v2363_v22 = vadd.f32 1.0, %v4447_v49  ;;  %v1892_v6 = vadd.f32 %v5906_v45, %v5573_v18  ;;  %v2113_v61 = vmul.f32 0.5, %v1894_v4  ;;  %v1529_v21 = vpop.f32.mrb[64].mxu0 }
 0x26a   : > { %v4465_v5 = vpop.eup %4464  ;;  %4484 = vtanh.f32 %v2039_v62  ;;  %v2789_v40 = vpack.c.bf16 %v2675_v30, %v2674_v29  ;;  %v5945_v36 = vmul.f32 %v5715_v55, %v5789_v53  ;;  %v1530_v28 = vadd.f32 %v1529_v21, %v5567_v14  ;;  %v1531_v19 = vpop.f32.mrb[65].mxu0 }
 0x26b   : > { %v5941_v32 = vpop.eup %4466  ;;  %v2292_v12 = vadd.f32 1.0, %v4465_v5  ;;  %4486 = vtanh.f32 %v1522_v26  ;;  %v2364_v49 = vadd.f32 1.0, %v4459_v58  ;;  %v1896_v41 = vadd.f32 %v1895_v44, %v5573_v18  ;;  %v1533_v5 = vpop.f32.mrb[66].mxu0 }
 0x26c   : > { %6847 = vst [vmem:[#allocation37_spill] sm:$0xff] %v5945_v36  ;;  %v4469_v9 = vpop.eup %4468  ;;  %4488 = vtanh.f32 %v1526_v0  ;;  %3763 = vmatprep.subr.bf16.mxu1 %v2789_v40  ;;  %v1900_v26 = vadd.f32 %v1899_v16, %v5567_v14  ;;  %v1905_v29 = vpop.f32.mrb[59].mxu1  ;;  %v6848_v55 = vpack.c.bf16 %v5704_v54, %v5697_v63  ;;  %v2040_v53 = vmul.f32 0.5, %v1530_v28 }
 0x26d   : > { %v4471_v45 = vpop.eup %4470  ;;  %v2420_v4 = vmul.f32 0.5, %v2292_v12  ;;  %v2293_v62 = vadd.f32 1.0, %v4469_v9  ;;  %4490 = vtanh.f32 %v2112_v17  ;;  %v1534_v0 = vadd.f32 %v1533_v5, %v5567_v14  ;;  %v1535_v58 = vpop.f32.mrb[67].mxu0 }
 0x26e   : > { %v4473_v30 = vpop.eup %4472  ;;  %3764 = vmatpush3.bf16.msra.mxu1 %v6848_v55  ;;  %4492 = vtanh.f32 %v1892_v6  ;;  %v1904_v44 = vadd.f32 %v1903_v3, %v5567_v14  ;;  %v1909_v12 = vpop.f32.mrb[60].mxu1  ;;  %v1532_v17 = vadd.f32 %v1531_v19, %v5573_v18  ;;  %v1536_v54 = vadd.f32 %v1535_v58, %v5573_v18 }
 0x26f   : > { %v4475_v21 = vpop.eup %4474  ;;  %v2421_v40 = vmul.f32 0.5, %v2293_v62  ;;  %v2676_v9 = vmul.f32 %v4471_v45, %v2420_v4  ;;  %4494 = vtanh.f32 %v2113_v61  ;;  %v5956_v16 = vpop.f32.mrb[61].mxu1  ;;  %v2041_v63 = vmul.f32 0.5, %v1534_v0 }
 0x270   : > { %v5958_v33 = vpop.eup %4476  ;;  %4496 = vtanh.f32 %v2040_v53  ;;  %v5961_v28 = vmul.f32 0.5, %v2363_v22  ;;  %v1913_v6 = vpop.f32.mrb[62].mxu1  ;;  %v5963_v55 = vmul.f32 0.5, %v2364_v49  ;;  %v2114_v62 = vmul.f32 0.5, %v1900_v26 }
 0x271   : > { %6849 = vst [vmem:[#allocation38_spill] sm:$0xff] %v5958_v33  ;;  %v4479_v5 = vpop.eup %4478  ;;  %v2677_v3 = vmul.f32 %v4473_v30, %v2421_v40  ;;  %4498 = vtanh.f32 %v1896_v41  ;;  %v2365_v61 = vadd.f32 1.0, %v4463_v13  ;;  %v1902_v45 = vadd.f32 %v5930_v43, %v5573_v18  ;;  %v1539_v58 = vpop.f32.mrb[68].mxu0 }
 0x272   : > { %v4481_v19 = vpop.eup %4480  ;;  %4500 = vtanh.f32 %v2041_v63  ;;  %v2115_v4 = vmul.f32 0.5, %v1904_v44  ;;  %vm2875_vm2 = vcmp.eq.s32.totalorder %v5860_v11, %v5558_v7  ;;  %v5973_v49 = vmul.f32 %v5726_v1, %v5803_v8  ;;  %v1541_v26 = vpop.f32.mrb[69].mxu0 }
 0x273   : > { %v5967_v53 = vpop.eup %4482  ;;  %v2294_v0 = vadd.f32 1.0, %v4481_v19  ;;  %4502 = vtanh.f32 %v1532_v17  ;;  %v2790_v22 = vpack.c.bf16 %v2677_v3, %v2676_v9  ;;  %v1540_v13 = vadd.f32 %v1539_v58, %v5567_v14  ;;  %v1543_v9 = vpop.f32.mrb[70].mxu0  ;;  %vm6014_vm3 = vmpackc.low %vm2875_vm2, %vm2875_vm2 }
 0x274   : > { %6850 = vst [vmem:[#allocation39_spill] sm:$0xff] %v5967_v53  ;;  %6851 = vst [vmem:[#allocation40_spill] sm:$0xff] %v5973_v49  ;;  %v4485_v41 = vpop.eup %4484  ;;  %4504 = vtanh.f32 %v1536_v54  ;;  %v2366_v43 = vadd.f32 1.0, %v4475_v21  ;;  %v1906_v30 = vadd.f32 %v1905_v29, %v5573_v18  ;;  %v1910_v63 = vadd.f32 %v1909_v12, %v5567_v14  ;;  %v5978_v3 = vpop.f32.mrb[63].mxu1 }
 0x275   : > { %v4487_v44 = vpop.eup %4486  ;;  %v2422_v40 = vmul.f32 0.5, %v2294_v0  ;;  %v2295_v17 = vadd.f32 1.0, %v4485_v41  ;;  %3765 = vmatprep.subr.bf16.mxu1 %v2790_v22  ;;  %4506 = vtanh.f32 %v2114_v62  ;;  %v6852_v8 = vpack.c.bf16 %v5731_v2, %v5724_v37  ;;  %v1545_v19 = vpop.f32.mrb[71].mxu0 }
 0x276   : > { %v4489_v1 = vpop.eup %4488  ;;  %v2042_v54 = vmul.f32 0.5, %v1540_v13  ;;  %v1544_v21 = vadd.f32 %v1543_v9, %v5567_v14  ;;  %4508 = vtanh.f32 %v1902_v45  ;;  %v1914_v29 = vadd.f32 %v1913_v6, %v5567_v14  ;;  %v1919_v0 = vpop.f32.mrb[64].mxu1 }
 0x277   : > { %3766 = vmatpush3.bf16.msra.mxu1 %v6852_v8  ;;  %v4491_v22 = vpop.eup %4490  ;;  %v2423_v58 = vmul.f32 0.5, %v2295_v17  ;;  %v1542_v62 = vadd.f32 %v1541_v26, %v5573_v18  ;;  %v2678_v12 = vmul.f32 %v4487_v44, %v2422_v40  ;;  %4510 = vtanh.f32 %v2115_v4  ;;  %v5986_v41 = vpop.f32.mrb[65].mxu1 }
 0x278   : > { %v5988_v53 = vpop.eup %4492  ;;  %4512 = vtanh.f32 %v2042_v54  ;;  %v2043_v37 = vmul.f32 0.5, %v1544_v21  ;;  %v1546_v2 = vadd.f32 %v1545_v19, %v5573_v18  ;;  %v5991_v13 = vmul.f32 0.5, %v2365_v61  ;;  %v5993_v45 = vpop.f32.mrb[66].mxu1 }
 0x279   : > { %6853 = vst [vmem:[#allocation41_spill] sm:$0xff] %v5988_v53  ;;  %v4495_v6 = vpop.eup %4494  ;;  %v2679_v9 = vmul.f32 %v4489_v1, %v2423_v58  ;;  %v5995_v8 = vmul.f32 0.5, %v2366_v43  ;;  %4514 = vtanh.f32 %v1906_v30  ;;  %v2116_v26 = vmul.f32 0.5, %v1910_v63  ;;  %v1549_v19 = vpop.f32.mrb[72].mxu0 }
 0x27a   : > { %v4497_v44 = vpop.eup %4496  ;;  %4516 = vtanh.f32 %v2043_v37  ;;  %v2367_v4 = vadd.f32 1.0, %v4479_v5  ;;  %v2117_v40 = vmul.f32 0.5, %v1914_v29  ;;  %v2857_v17 = vsub.s32 3, %v5558_v7  ;;  %v1551_v1 = vpop.f32.mrb[73].mxu0 }
 0x27b   : > { %v5998_v54 = vpop.eup %4498  ;;  %v2296_v21 = vadd.f32 1.0, %v4497_v44  ;;  %4518 = vtanh.f32 %v1542_v62  ;;  %v2791_v61 = vpack.c.bf16 %v2679_v9, %v2678_v12  ;;  %v2368_v53 = vadd.f32 1.0, %v4491_v22  ;;  %v1553_v37 = vpop.f32.mrb[74].mxu0 }
 0x27c   : > { %6854 = vst [vmem:[#allocation42_spill] sm:$0xff] %v5998_v54  ;;  %v4501_v33 = vpop.eup %4500  ;;  %4520 = vtanh.f32 %v1546_v2  ;;  %v1550_v43 = vadd.f32 %v1549_v19, %v5567_v14  ;;  %v2369_v30 = vadd.f32 1.0, %v4495_v6  ;;  %v2858_v63 = vrot.slane %v5792_v50, %v2857_v17  ;;  %v6004_v12 = vpop.f32.mrb[67].mxu1 }
 0x27d   : > { %v4503_v58 = vpop.eup %4502  ;;  %v2424_v5 = vmul.f32 0.5, %v2296_v21  ;;  %v2297_v29 = vadd.f32 1.0, %v4501_v33  ;;  %3767 = vmatprep.subr.bf16.mxu1 %v2791_v61  ;;  %4522 = vtanh.f32 %v2116_v26  ;;  %v1912_v62 = vadd.f32 %v5956_v16, %v5573_v18  ;;  %v1555_v50 = vpop.f32.mrb[75].mxu0 }
 0x27e   : > { %v4505_v22 = vpop.eup %4504  ;;  %v6855_v2 = vpack.c.bf16 %v5760_v25, %v5751_v34  ;;  %v2044_v9 = vmul.f32 0.5, %v1550_v43  ;;  %v1554_v6 = vadd.f32 %v1553_v37, %v5567_v14  ;;  %vm2878_vm4 = vcmp.eq.s32.totalorder %v2858_v63, %v5558_v7  ;;  %v1929_v26 = vpop.f32.mrb[68].mxu1 }
 0x27f   : > { %v1920_v16 = vadd.f32 %v1919_v0, %v5567_v14  ;;  %v4507_v44 = vpop.eup %4506  ;;  %v2425_v34 = vmul.f32 0.5, %v2297_v29  ;;  %v1552_v25 = vadd.f32 %v1551_v1, %v5573_v18  ;;  %v6021_v17 = vmul.f32 %v4503_v58, %v2424_v5  ;;  %vm6023_vm5 = vmpackc.low %vm2878_vm4, %vm2878_vm4  ;;  %v6027_v11 = vpop.f32.mrb[69].mxu1 }
 0x280   : > { %3768 = vmatpush3.bf16.msra.mxu1 %v6855_v2  ;;  %4524 = vtanh.f32 %v2117_v40  ;;  %v6029_v61 = vpop.eup %4508  ;;  %v2045_v19 = vmul.f32 0.5, %v1554_v6  ;;  %v1556_v0 = vadd.f32 %v1555_v50, %v5573_v18  ;;  %v6032_v43 = vmul.f32 0.5, %v2367_v4  ;;  %v1933_v63 = vpop.f32.mrb[70].mxu1 }
 0x281   : > { %6860 = vst [vmem:[#allocation43_spill] sm:$0xff] %v6029_v61  ;;  %4526 = vtanh.f32 %v2044_v9  ;;  %v4511_v29 = vpop.eup %4510  ;;  %v6861_v1 = vmov 1.0|1.0   ;;  %v6037_v40 = vmul.f32 %v4505_v22, %v2425_v34  ;;  %v6039_v58 = vmul.f32 0.5, %v2368_v53 }
 0x282   : > { %4528 = vtanh.f32 %v1912_v62  ;;  %v1916_v5 = vadd.f32 %v5978_v3, %v5573_v18  ;;  %v4513_v37 = vpop.eup %4512  ;;  %v6043_v2 = vmul.f32 0.5, %v2369_v30  ;;  %v2118_v4 = vmul.f32 0.5, %v1920_v16  ;;  %v1559_v62 = vpop.f32.mrb[76].mxu0 }
 0x283   : > { %3698 = vmatmul.mubr.msk.bf16.vlgmr.msra.gmra.mrb[100].mxu1 %vm6014_vm3, %v6861_v1  ;;  %6862 = vst [vmem:[#allocation44_spill] sm:$0xff] %v6039_v58  ;;  %4530 = vtanh.f32 %v2045_v19  ;;  %v1924_v9 = vadd.f32 %v5993_v45, %v5567_v14  ;;  %v6050_v22 = vpop.eup %4514  ;;  %v2298_v53 = vadd.f32 1.0, %v4513_v37  ;;  %v1922_v30 = vadd.f32 %v5986_v41, %v5573_v18  ;;  %v1561_v33 = vpop.f32.mrb[77].mxu0 }
 0x284   : > { %6863 = vst [vmem:[#allocation45_spill] sm:$0xff] %v6043_v2  ;;  %3700 = vmatprep.mubr.msk.bf16.mxu1 %vm6023_vm5, %v6861_v1  ;;  %6864 = vst [vmem:[#allocation46_spill] sm:$0xff] %v6050_v22  ;;  %4532 = vtanh.f32 %v1552_v25  ;;  %v4517_v6 = vpop.eup %4516  ;;  %v1560_v50 = vadd.f32 %v1559_v62, %v5567_v14  ;;  %v2370_v16 = vadd.f32 1.0, %v4507_v44  ;;  %v2371_v34 = vadd.f32 1.0, %v4511_v29  ;;  %v1563_v1 = vpop.f32.mrb[78].mxu0 }
 0x285   : > { %4534 = vtanh.f32 %v1556_v0  ;;  %v4519_v21 = vpop.eup %4518  ;;  %v2426_v45 = vmul.f32 0.5, %v2298_v53  ;;  %v2299_v19 = vadd.f32 1.0, %v4517_v6  ;;  %v2119_v25 = vmul.f32 0.5, %v1924_v9  ;;  %v6057_v37 = vpop.f32.mrb[71].mxu1 }
 0x286   : > { %4536 = vtanh.f32 %v1916_v5  ;;  %v4521_v7 = vpop.eup %4520  ;;  %v2046_v3 = vmul.f32 0.5, %v1560_v50  ;;  %v1564_v22 = vadd.f32 %v1563_v1, %v5567_v14  ;;  %v1565_v41 = vpop.f32.mrb[79].mxu0  ;;  %v1930_v0 = vadd.f32 %v1929_v26, %v5567_v14 }
 0x287   : > { %4538 = vtanh.f32 %v2118_v4  ;;  %v1939_v62 = vpop.f32.mrb[72].mxu1  ;;  %v4523_v61 = vpop.eup %4522  ;;  %v2427_v44 = vmul.f32 0.5, %v2299_v19  ;;  %v1562_v29 = vadd.f32 %v1561_v33, %v5573_v18  ;;  %v6062_v53 = vmul.f32 %v4519_v21, %v2426_v45 }
 0x288   : > { %4540 = vtanh.f32 %v1922_v30  ;;  %v6064_v5 = vpop.f32.mrb[73].mxu1  ;;  %v2047_v9 = vmul.f32 0.5, %v1564_v22  ;;  %v1566_v6 = vadd.f32 %v1565_v41, %v5573_v18  ;;  %v6067_v50 = vmul.f32 0.5, %v2370_v16 }
 0x289   : > { %4542 = vtanh.f32 %v2046_v3  ;;  %v1943_v1 = vpop.f32.mrb[74].mxu1  ;;  %v6069_v54 = vmul.f32 %v4521_v7, %v2427_v44  ;;  %v6071_v26 = vmul.f32 0.5, %v2371_v34  ;;  %v1926_v33 = vadd.f32 %v6004_v12, %v5573_v18  ;;  %v1569_v19 = vpop.f32.mrb[80].mxu0 }
 0x28a   : > { %6865 = vst [vmem:[#allocation47_spill] sm:$0xff] %v6067_v50  ;;  %v4525_v4 = vpop.eup %4524  ;;  %4544 = vtanh.f32 %v2119_v25  ;;  %v2372_v30 = vadd.f32 1.0, %v4523_v61  ;;  %v2120_v45 = vmul.f32 0.5, %v1930_v0  ;;  %v1934_v22 = vadd.f32 %v1933_v63, %v5567_v14  ;;  %v1571_v41 = vpop.f32.mrb[81].mxu0 }
 0x28b   : > { %6866 = vst [vmem:[#allocation48_spill] sm:$0xff] %v6071_v26  ;;  %v4527_v21 = vpop.eup %4526  ;;  %4546 = vtanh.f32 %v2047_v9  ;;  %v1570_v12 = vadd.f32 %v1569_v19, %v5567_v14  ;;  %v2373_v61 = vadd.f32 1.0, %v4525_v4  ;;  %v1940_v19 = vadd.f32 %v1939_v62, %v5567_v14 }
 0x28c   : > { %v6076_v3 = vpop.eup %4528  ;;  %v2300_v16 = vadd.f32 1.0, %v4527_v21  ;;  %4548 = vtanh.f32 %v1562_v29  ;;  %v2121_v0 = vmul.f32 0.5, %v1934_v22  ;;  %v1932_v29 = vadd.f32 %v6027_v11, %v5573_v18  ;;  %v6085_v21 = vpop.f32.mrb[75].mxu1 }
 0x28d   : > { %6867 = vst [vmem:[#allocation49_spill] sm:$0xff] %v6076_v3  ;;  %v4531_v25 = vpop.eup %4530  ;;  %4550 = vtanh.f32 %v1566_v6  ;;  %v1573_v3 = vpop.f32.mrb[82].mxu0  ;;  %v2048_v26 = vmul.f32 0.5, %v1570_v12  ;;  %v6097_v49 = vmul.f32 0.5, %v2372_v30  ;;  %v6110_v30 = vmul.f32 %v5743_v42, %v5830_v60 }
 0x28e   : > { %v4533_v44 = vpop.eup %4532  ;;  %v2428_v63 = vmul.f32 0.5, %v2300_v16  ;;  %v2301_v9 = vadd.f32 1.0, %v4531_v25  ;;  %4552 = vtanh.f32 %v1926_v33  ;;  %v1574_v34 = vadd.f32 %v1573_v3, %v5567_v14  ;;  %v1575_v6 = vpop.f32.mrb[83].mxu0 }
 0x28f   : > { %v4535_v7 = vpop.eup %4534  ;;  %4554 = vtanh.f32 %v2120_v45  ;;  %v1949_v4 = vpop.f32.mrb[76].mxu1  ;;  %v1572_v25 = vadd.f32 %v1571_v41, %v5573_v18  ;;  %v1576_v3 = vadd.f32 %v1575_v6, %v5573_v18  ;;  %6869 = vst [vmem:[#allocation51_spill] sm:$0xff] %v6097_v49  ;;  %v1936_v41 = vadd.f32 %v6057_v37, %v5573_v18  ;;  %6872 = vst [vmem:[#allocation54_spill] sm:$0xff] %v6110_v30 }
 0x290   : > { %v6089_v22 = vpop.eup %4536  ;;  %v2429_v16 = vmul.f32 0.5, %v2301_v9  ;;  %v6092_v33 = vmul.f32 %v4533_v44, %v2428_v63  ;;  %4556 = vtanh.f32 %v2121_v0  ;;  %v6094_v11 = vpop.f32.mrb[77].mxu1  ;;  %v2049_v12 = vmul.f32 0.5, %v1574_v34 }
 0x291   : > { %6868 = vst [vmem:[#allocation50_spill] sm:$0xff] %v6089_v22  ;;  %v4539_v36 = vpop.eup %4538  ;;  %4558 = vtanh.f32 %v2048_v26  ;;  %v1953_v45 = vpop.f32.mrb[78].mxu1  ;;  %v1944_v0 = vadd.f32 %v1943_v1, %v5567_v14  ;;  %v6106_v63 = vmul.f32 0.5, %v2373_v61  ;;  %v2122_v26 = vmul.f32 0.5, %v1940_v19 }
 0x292   : > { %v6099_v62 = vpop.eup %4540  ;;  %v6101_v50 = vmul.f32 %v4535_v7, %v2429_v16  ;;  %4560 = vtanh.f32 %v1932_v29  ;;  %v1579_v7 = vpop.f32.mrb[84].mxu0  ;;  %v1942_v37 = vadd.f32 %v6064_v5, %v5573_v18  ;;  %v2374_v19 = vadd.f32 1.0, %v4539_v36 }
 0x293   : > { %6870 = vst [vmem:[#allocation52_spill] sm:$0xff] %v6099_v62  ;;  %v4543_v44 = vpop.eup %4542  ;;  %4562 = vtanh.f32 %v2049_v12  ;;  %6871 = vst [vmem:[#allocation53_spill] sm:$0xff] %v6106_v63  ;;  %v1580_v61 = vadd.f32 %v1579_v7, %v5567_v14  ;;  %v1581_v6 = vpop.f32.mrb[85].mxu0  ;;  %v6119_v42 = vmul.f32 %v5755_v31, %v5832_v57 }
 0x294   : > { %v4545_v34 = vpop.eup %4544  ;;  %v2302_v9 = vadd.f32 1.0, %v4543_v44  ;;  %4564 = vtanh.f32 %v1572_v25  ;;  %v1583_v12 = vpop.f32.mrb[86].mxu0  ;;  %v2123_v44 = vmul.f32 0.5, %v1944_v0 }
 0x295   : > { %v4547_v1 = vpop.eup %4546  ;;  %4566 = vtanh.f32 %v1576_v3  ;;  %6873 = vst [vmem:[#allocation55_spill] sm:$0xff] %v6119_v42  ;;  %v6121_v29 = vpop.f32.mrb[79].mxu1  ;;  %v2050_v5 = vmul.f32 0.5, %v1580_v61  ;;  %v1584_v3 = vadd.f32 %v1583_v12, %v5567_v14  ;;  %v1950_v12 = vadd.f32 %v1949_v4, %v5567_v14 }
 0x296   : > { %v4549_v60 = vpop.eup %4548  ;;  %v2430_v16 = vmul.f32 0.5, %v2302_v9  ;;  %v2303_v25 = vadd.f32 1.0, %v4547_v1  ;;  %4568 = vtanh.f32 %v1936_v41  ;;  %v1585_v22 = vpop.f32.mrb[87].mxu0  ;;  %v1582_v9 = vadd.f32 %v1581_v6, %v5573_v18 }
 0x297   : > { %v4551_v62 = vpop.eup %4550  ;;  %4570 = vtanh.f32 %v2122_v26  ;;  %v6126_v7 = vpop.f32.mrb[80].mxu1  ;;  %v2051_v61 = vmul.f32 0.5, %v1584_v3  ;;  %v1586_v26 = vadd.f32 %v1585_v22, %v5573_v18  ;;  %v1946_v6 = vadd.f32 %v6085_v21, %v5573_v18 }
 0x298   : > { %v6128_v31 = vpop.eup %4552  ;;  %v2431_v57 = vmul.f32 0.5, %v2303_v25  ;;  %v6131_v41 = vmul.f32 %v4549_v60, %v2430_v16  ;;  %4572 = vtanh.f32 %v1942_v37  ;;  %v6133_v0 = vpop.f32.mrb[81].mxu1  ;;  %v2375_v25 = vadd.f32 1.0, %v4545_v34 }
 0x299   : > { %6874 = vst [vmem:[#allocation56_spill] sm:$0xff] %v6128_v31  ;;  %v4555_v1 = vpop.eup %4554  ;;  %4574 = vtanh.f32 %v2050_v5  ;;  %v6137_v36 = vpop.f32.mrb[82].mxu1  ;;  %v6143_v60 = vmul.f32 0.5, %v2374_v19  ;;  %v2124_v16 = vmul.f32 0.5, %v1950_v12  ;;  %v1954_v5 = vadd.f32 %v1953_v45, %v5567_v14 }
 0x29a   : > { %6875 = vst [vmem:[#allocation57_spill] sm:$0xff] %v6131_v41  ;;  %v4557_v30 = vpop.eup %4556  ;;  %v6139_v42 = vmul.f32 %v4551_v62, %v2431_v57  ;;  %4576 = vtanh.f32 %v2123_v44  ;;  %v1589_v3 = vpop.f32.mrb[88].mxu0  ;;  %v1952_v34 = vadd.f32 %v6094_v11, %v5573_v18  ;;  %v2376_v57 = vadd.f32 1.0, %v4555_v1 }
 0x29b   : > { %v4559_v37 = vpop.eup %4558  ;;  %4578 = vtanh.f32 %v2051_v61  ;;  %6877 = vst [vmem:[#allocation59_spill] sm:$0xff] %v6143_v60  ;;  %v1590_v21 = vadd.f32 %v1589_v3, %v5567_v14  ;;  %v1591_v19 = vpop.f32.mrb[89].mxu0  ;;  %v2377_v61 = vadd.f32 1.0, %v4557_v30 }
 0x29c   : > { %6876 = vst [vmem:[#allocation58_spill] sm:$0xff] %v6139_v42  ;;  %v6146_v22 = vpop.eup %4560  ;;  %v2304_v4 = vadd.f32 1.0, %v4559_v37  ;;  %4580 = vtanh.f32 %v1582_v9  ;;  %v1593_v60 = vpop.f32.mrb[90].mxu0  ;;  %v2125_v9 = vmul.f32 0.5, %v1954_v5 }
 0x29d   : > { %v4563_v44 = vpop.eup %4562  ;;  %4582 = vtanh.f32 %v1586_v26  ;;  %v6153_v37 = vpop.f32.mrb[83].mxu1  ;;  %v2052_v62 = vmul.f32 0.5, %v1590_v21  ;;  %v1594_v49 = vadd.f32 %v1593_v60, %v5567_v14  ;;  %v6158_v26 = vmul.f32 %v5774_v59, %v5841_v20 }
 0x29e   : > { %v4565_v12 = vpop.eup %4564  ;;  %v2432_v45 = vmul.f32 0.5, %v2304_v4  ;;  %v2305_v31 = vadd.f32 1.0, %v4563_v44  ;;  %4584 = vtanh.f32 %v1946_v6  ;;  %v1595_v11 = vpop.f32.mrb[91].mxu0  ;;  %v1592_v6 = vadd.f32 %v1591_v19, %v5573_v18 }
 0x29f   : > { %v4567_v63 = vpop.eup %4566  ;;  %4586 = vtanh.f32 %v2124_v16  ;;  %6878 = vst [vmem:[#allocation60_spill] sm:$0xff] %v6158_v26  ;;  %v6160_v1 = vpop.f32.mrb[84].mxu1  ;;  %v2053_v60 = vmul.f32 0.5, %v1594_v49  ;;  %v1596_v16 = vadd.f32 %v1595_v11, %v5573_v18  ;;  %v6172_v59 = vmul.f32 %v5786_v15, %v5849_v23 }
 0x2a0   : > { %v6162_v30 = vpop.eup %4568  ;;  %v2433_v4 = vmul.f32 0.5, %v2305_v31  ;;  %v6165_v5 = vmul.f32 %v4565_v12, %v2432_v45  ;;  %4588 = vtanh.f32 %v1952_v34  ;;  %v6167_v3 = vpop.f32.mrb[85].mxu1  ;;  %v6180_v19 = vmul.f32 0.5, %v2375_v25 }
 0x2a1   : > { %v4571_v44 = vpop.eup %4570  ;;  %4590 = vtanh.f32 %v2052_v62  ;;  %6880 = vst [vmem:[#allocation62_spill] sm:$0xff] %v6172_v59  ;;  %v6174_v20 = vpop.f32.mrb[86].mxu1  ;;  %v1960_v34 = vadd.f32 %v6126_v7, %v5567_v14  ;;  %v6184_v49 = vmul.f32 0.5, %v2376_v57  ;;  %v1956_v15 = vadd.f32 %v6121_v29, %v5573_v18 }
 0x2a2   : > { %6879 = vst [vmem:[#allocation61_spill] sm:$0xff] %v6165_v5  ;;  %v6176_v21 = vpop.eup %4572  ;;  %v6178_v31 = vmul.f32 %v4567_v63, %v2433_v4  ;;  %6882 = vst [vmem:[#allocation64_spill] sm:$0xff] %v6180_v19  ;;  %4592 = vtanh.f32 %v2125_v9  ;;  %v1599_v63 = vpop.f32.mrb[92].mxu0  ;;  %v1962_v7 = vadd.f32 %v6133_v0, %v5573_v18  ;;  %v6195_v4 = vmul.f32 0.5, %v2377_v61 }
 0x2a3   : > { %v4575_v62 = vpop.eup %4574  ;;  %4594 = vtanh.f32 %v2053_v60  ;;  %v1600_v57 = vadd.f32 %v1599_v63, %v5567_v14  ;;  %v1601_v11 = vpop.f32.mrb[93].mxu0  ;;  %v2378_v29 = vadd.f32 1.0, %v4571_v44  ;;  %v1964_v59 = vadd.f32 %v6137_v36, %v5567_v14 }
 0x2a4   : > { %6881 = vst [vmem:[#allocation63_spill] sm:$0xff] %v6178_v31  ;;  %v4577_v12 = vpop.eup %4576  ;;  %v2306_v45 = vadd.f32 1.0, %v4575_v62  ;;  %4596 = vtanh.f32 %v1592_v6  ;;  %v1603_v62 = vpop.f32.mrb[94].mxu0  ;;  %v2126_v6 = vmul.f32 0.5, %v1960_v34 }
 0x2a5   : > { %v4579_v9 = vpop.eup %4578  ;;  %4598 = vtanh.f32 %v1596_v16  ;;  %v6199_v25 = vpop.f32.mrb[87].mxu1  ;;  %v2054_v0 = vmul.f32 0.5, %v1600_v57  ;;  %v1604_v16 = vadd.f32 %v1603_v62, %v5567_v14  ;;  %v2379_v63 = vadd.f32 1.0, %v4577_v12 }
 0x2a6   : > { %v4581_v60 = vpop.eup %4580  ;;  %v2434_v23 = vmul.f32 0.5, %v2306_v45  ;;  %v2307_v26 = vadd.f32 1.0, %v4579_v9  ;;  %v1605_v5 = vpop.f32.mrb[95].mxu0  ;;  %4600 = vtanh.f32 %v1956_v15  ;;  %v1602_v45 = vadd.f32 %v1601_v11, %v5573_v18 }
 0x2a7   : > { %v4583_v19 = vpop.eup %4582  ;;  %v1979_v61 = vpop.f32.mrb[88].mxu1  ;;  %4602 = vtanh.f32 %v1962_v7  ;;  %v2055_v2 = vmul.f32 0.5, %v1604_v16  ;;  %v1606_v57 = vadd.f32 %v1605_v5, %v5573_v18  ;;  %v6212_v12 = vmul.f32 %v5813_v56, %v5865_v35  ;;  %v6886_v7 = vld [vmem:[#allocation32_spill] sm:$0xff] }
 0x2a8   : > { %v6202_v31 = vpop.eup %4584  ;;  %v2435_v44 = vmul.f32 0.5, %v2307_v26  ;;  %v6205_v9 = vmul.f32 %v4581_v60, %v2434_v23  ;;  %v6207_v34 = vpop.f32.mrb[89].mxu1  ;;  %4604 = vtanh.f32 %v2054_v0  ;;  %v2127_v23 = vmul.f32 0.5, %v1964_v59 }
 0x2a9   : > { %v4587_v36 = vpop.eup %4586  ;;  %6884 = vst [vmem:[#allocation66_spill] sm:$0xff] %v6212_v12  ;;  %v6214_v15 = vpop.f32.mrb[90].mxu1  ;;  %4606 = vtanh.f32 %v2126_v6  ;;  %v6222_v11 = vmul.f32 %v6886_v7, %v5885_v27  ;;  %v6224_v0 = vmul.f32 0.5, %v2378_v29  ;;  %v1966_v56 = vadd.f32 %v6153_v37, %v5573_v18 }
 0x2aa   : > { %6883 = vst [vmem:[#allocation65_spill] sm:$0xff] %v6205_v9  ;;  %v6216_v62 = vpop.eup %4588  ;;  %v6218_v26 = vmul.f32 %v4583_v19, %v2435_v44  ;;  %4608 = vtanh.f32 %v2055_v2  ;;  %v1970_v35 = vadd.f32 %v6160_v1, %v5567_v14  ;;  %v1609_v19 = vpop.f32.mrb[96].mxu0  ;;  %v1972_v27 = vadd.f32 %v6167_v3, %v5573_v18 }
 0x2ab   : > { %6887 = vst [vmem:[#allocation32_spill] sm:$0xff] %v6222_v11  ;;  %v4591_v60 = vpop.eup %4590  ;;  %4610 = vtanh.f32 %v1602_v45  ;;  %v1610_v2 = vadd.f32 %v1609_v19, %v5567_v14  ;;  %v1611_v29 = vpop.f32.mrb[97].mxu0  ;;  %v6235_v44 = vmul.f32 0.5, %v2379_v63  ;;  %v1974_v63 = vadd.f32 %v6174_v20, %v5567_v14 }
 0x2ac   : > { %6885 = vst [vmem:[#allocation67_spill] sm:$0xff] %v6218_v26  ;;  %v4593_v5 = vpop.eup %4592  ;;  %v2308_v16 = vadd.f32 1.0, %v4591_v60  ;;  %4612 = vtanh.f32 %v1606_v57  ;;  %v1613_v60 = vpop.f32.mrb[98].mxu0  ;;  %v2128_v58 = vmul.f32 0.5, %v1970_v35  ;;  %v1612_v37 = vadd.f32 %v1611_v29, %v5573_v18  ;;  %v6890_v29 = vld [vmem:[#allocation33_spill] sm:$0xff] }
 0x2ad   : > { %v4595_v6 = vpop.eup %4594  ;;  %4614 = vtanh.f32 %v2127_v23  ;;  %v6239_v59 = vpop.f32.mrb[91].mxu1  ;;  %v2056_v3 = vmul.f32 0.5, %v1610_v2  ;;  %v1614_v57 = vadd.f32 %v1613_v60, %v5567_v14  ;;  %v1980_v20 = vadd.f32 %v1979_v61, %v5567_v14 }
 0x2ae   : > { %v4597_v1 = vpop.eup %4596  ;;  %v2436_v7 = vmul.f32 0.5, %v2308_v16  ;;  %v2309_v45 = vadd.f32 1.0, %v4595_v6  ;;  %v1615_v26 = vpop.f32.mrb[99].mxu0  ;;  %4616 = vtanh.f32 %v1966_v56  ;;  %v2380_v6 = vadd.f32 1.0, %v4587_v36 }
 0x2af   : > { %v4599_v9 = vpop.eup %4598  ;;  %4618 = vtanh.f32 %v1972_v27  ;;  %v2057_v23 = vmul.f32 0.5, %v1614_v57  ;;  %v1616_v35 = vadd.f32 %v1615_v26, %v5573_v18  ;;  %v2129_v56 = vmul.f32 0.5, %v1974_v63  ;;  %v6892_v26 = vld [vmem:[#allocation34_spill] sm:$0xff] }
 0x2b0   : > { %v2437_v19 = vmul.f32 0.5, %v2309_v45  ;;  %v6245_v12 = vmul.f32 %v4597_v1, %v2436_v7  ;;  %v6247_v16 = vpop.eup %4600  ;;  %4620 = vtanh.f32 %v2056_v3  ;;  %v1976_v27 = vadd.f32 %v6199_v25, %v5573_v18 }
 0x2b1   : > { %v6250_v2 = vpop.eup %4602  ;;  %4622 = vtanh.f32 %v2128_v58  ;;  %v6259_v1 = vmul.f32 %v6890_v29, %v5889_v46  ;;  %v6263_v36 = vmul.f32 %v6892_v26, %v5911_v24  ;;  %v1619_v58 = vpop.f32.mrb[100].mxu0  ;;  %v2381_v3 = vadd.f32 1.0, %v4593_v5 }
 0x2b2   : > { %6888 = vst [vmem:[#allocation68_spill] sm:$0xff] %v6245_v12  ;;  %v6252_v60 = vmul.f32 %v4599_v9, %v2437_v19  ;;  %v4605_v45 = vpop.eup %4604  ;;  %4624 = vtanh.f32 %v2057_v23  ;;  %v1620_v25 = vadd.f32 %v1619_v58, %v5567_v14  ;;  %v1621_v63 = vpop.f32.mrb[101].mxu0  ;;  %v2130_v19 = vmul.f32 0.5, %v1980_v20 }
 0x2b3   : > { %6891 = vst [vmem:[#allocation33_spill] sm:$0xff] %v6259_v1  ;;  %6893 = vst [vmem:[#allocation34_spill] sm:$0xff] %v6263_v36  ;;  %v4607_v7 = vpop.eup %4606  ;;  %v2310_v9 = vadd.f32 1.0, %v4605_v45  ;;  %4626 = vtanh.f32 %v1612_v37  ;;  %v1622_v45 = vadd.f32 %v1621_v63, %v5573_v18  ;;  %v1623_v37 = vpop.f32.mrb[102].mxu0 }
 0x2b4   : > { %6889 = vst [vmem:[#allocation69_spill] sm:$0xff] %v6252_v60  ;;  %v4609_v57 = vpop.eup %4608  ;;  %4628 = vtanh.f32 %v1616_v35  ;;  %v2058_v11 = vmul.f32 0.5, %v1620_v25  ;;  %v1624_v5 = vadd.f32 %v1623_v37, %v5567_v14  ;;  %v1625_v61 = vpop.f32.mrb[103].mxu0  ;;  %v6272_v35 = vmul.f32 0.5, %v2380_v6 }
 0x2b5   : > { %v4611_v23 = vpop.eup %4610  ;;  %v2438_v24 = vmul.f32 0.5, %v2310_v9  ;;  %v2311_v29 = vadd.f32 1.0, %v4609_v57  ;;  %4630 = vtanh.f32 %v2129_v56  ;;  %v1626_v12 = vadd.f32 %v1625_v61, %v5573_v18 }
 0x2b6   : > { %v4613_v26 = vpop.eup %4612  ;;  %4632 = vtanh.f32 %v1976_v27  ;;  %v2059_v57 = vmul.f32 0.5, %v1624_v5  ;;  %v6279_v56 = vmul.f32 0.5, %v2381_v3  ;;  %v1984_v25 = vadd.f32 %v6214_v15, %v5567_v14 }
 0x2b7   : > { %v4615_v58 = vpop.eup %4614  ;;  %v2439_v20 = vmul.f32 0.5, %v2311_v29  ;;  %v6275_v46 = vmul.f32 %v4611_v23, %v2438_v24  ;;  %4634 = vtanh.f32 %v2130_v19  ;;  %v2382_v27 = vadd.f32 1.0, %v4607_v7  ;;  %v1989_v23 = vpop.f32.mrb[92].mxu1 }
 0x2b8   : > { %v6277_v9 = vpop.eup %4616  ;;  %4636 = vtanh.f32 %v2058_v11  ;;  %v1982_v61 = vadd.f32 %v6207_v34, %v5573_v18  ;;  %v2131_v24 = vmul.f32 0.5, %v1984_v25  ;;  %v1990_v37 = vadd.f32 %v1989_v23, %v5567_v14  ;;  %v1991_v5 = vpop.f32.mrb[93].mxu1 }
 0x2b9   : > { %6894 = vst [vmem:[#allocation70_spill] sm:$0xff] %v6275_v46  ;;  %v6283_v63 = vpop.eup %4618  ;;  %4638 = vtanh.f32 %v1622_v45  ;;  %v6285_v6 = vmul.f32 %v4613_v26, %v2439_v20  ;;  %v1629_v45 = vpop.f32.mrb[104].mxu0  ;;  %v2383_v26 = vadd.f32 1.0, %v4615_v58  ;;  %v6297_v3 = vmul.f32 %v6146_v22, %v6184_v49 }
 0x2ba   : > { %v4621_v19 = vpop.eup %4620  ;;  %4640 = vtanh.f32 %v2059_v57  ;;  %v1993_v20 = vpop.f32.mrb[94].mxu1  ;;  %v1630_v36 = vadd.f32 %v1629_v45, %v5567_v14  ;;  %v2132_v25 = vmul.f32 0.5, %v1990_v37  ;;  %v1986_v7 = vadd.f32 %v6239_v59, %v5573_v18 }
 0x2bb   : > { %6895 = vst [vmem:[#allocation71_spill] sm:$0xff] %v6285_v6  ;;  %v4623_v15 = vpop.eup %4622  ;;  %v2312_v1 = vadd.f32 1.0, %v4621_v19  ;;  %4642 = vtanh.f32 %v1626_v12  ;;  %v1631_v57 = vpop.f32.mrb[105].mxu0  ;;  %6898 = vst [vmem:[#allocation72_spill] sm:$0xff] %v6297_v3  ;;  %v6303_v58 = vmul.f32 %v6162_v30, %v6195_v4  ;;  %v6318_v42 = vmul.f32 0.5, %v2382_v27 }
 0x2bc   : > { %v4625_v34 = vpop.eup %4624  ;;  %4644 = vtanh.f32 %v2131_v24  ;;  %v1995_v23 = vpop.f32.mrb[95].mxu1  ;;  %v2060_v37 = vmul.f32 0.5, %v1630_v36  ;;  %v2384_v49 = vadd.f32 1.0, %v4623_v15  ;;  %v1632_v60 = vadd.f32 %v1631_v57, %v5573_v18 }
 0x2bd   : > { %v4627_v11 = vpop.eup %4626  ;;  %v2440_v19 = vmul.f32 0.5, %v2312_v1  ;;  %v2313_v12 = vadd.f32 1.0, %v4625_v34  ;;  %v1633_v29 = vpop.f32.mrb[106].mxu0  ;;  %6899 = vst [vmem:[#allocation73_spill] sm:$0xff] %v6303_v58  ;;  %4646 = vtanh.f32 %v2132_v25  ;;  %v1992_v57 = vadd.f32 %v1991_v5, %v5573_v18 }
 0x2be   : > { %v6305_v45 = vpop.f32.mrb[96].mxu1  ;;  %v4629_v24 = vpop.eup %4628  ;;  %v1634_v46 = vadd.f32 %v1633_v29, %v5567_v14  ;;  %4648 = vtanh.f32 %v1982_v61  ;;  %v6321_v61 = vmul.f32 0.5, %v2383_v26 }
 0x2bf   : > { %v1635_v22 = vpop.f32.mrb[107].mxu0  ;;  %v6308_v6 = vpop.f32.mrb[97].mxu1  ;;  %v2441_v34 = vmul.f32 0.5, %v2313_v12  ;;  %v2696_v59 = vmul.f32 %v4627_v11, %v2440_v19  ;;  %4650 = vtanh.f32 %v2060_v37  ;;  %v6323_v19 = vmul.f32 0.5, %v2384_v49 }
 0x2c0   : > { %v4631_v1 = vpop.eup %4630  ;;  %v6311_v41 = vpop.f32.mrb[98].mxu1  ;;  %v2061_v4 = vmul.f32 0.5, %v1634_v46  ;;  %v1636_v36 = vadd.f32 %v1635_v22, %v5573_v18  ;;  %4652 = vtanh.f32 %v1986_v7  ;;  %v1994_v46 = vadd.f32 %v1993_v20, %v5567_v14 }
 0x2c1   : > { %v6313_v30 = vpop.eup %4632  ;;  %v2697_v25 = vmul.f32 %v4629_v24, %v2441_v34  ;;  %v1639_v22 = vpop.f32.mrb[108].mxu0  ;;  %v2385_v3 = vadd.f32 1.0, %v4631_v1 }
 0x2c2   : > { %6900 = vst [vmem:[#allocation74_spill] sm:$0xff] %v6313_v30  ;;  %v4635_v15 = vpop.eup %4634  ;;  %4654 = vtanh.f32 %v2061_v4  ;;  %v1640_v27 = vadd.f32 %v1639_v22, %v5567_v14  ;;  %v1641_v7 = vpop.f32.mrb[109].mxu0  ;;  %v2133_v34 = vmul.f32 0.5, %v1994_v46 }
 0x2c3   : > { %v4637_v11 = vpop.eup %4636  ;;  %4656 = vtanh.f32 %v1632_v60  ;;  %v2800_v29 = vpack.c.bf16 %v2697_v25, %v2696_v59  ;;  %v2386_v5 = vadd.f32 1.0, %v4635_v15  ;;  %v1642_v49 = vadd.f32 %v1641_v7, %v5573_v18  ;;  %v1643_v30 = vpop.f32.mrb[110].mxu0 }
 0x2c4   : > { %v4639_v12 = vpop.eup %4638  ;;  %v2314_v37 = vadd.f32 1.0, %v4637_v11  ;;  %4658 = vtanh.f32 %v1636_v36  ;;  %v6328_v20 = vpop.f32.mrb[99].mxu1  ;;  %v2062_v59 = vmul.f32 0.5, %v1640_v27  ;;  %v1644_v1 = vadd.f32 %v1643_v30, %v5567_v14 }
 0x2c5   : > { %v4641_v24 = vpop.eup %4640  ;;  %3775 = vmatprep.subr.bf16.mxu1 %v2800_v29  ;;  %4660 = vtanh.f32 %v1992_v57  ;;  %v6901_v36 = vpack.c.bf16 %v6037_v40, %v6021_v17  ;;  %v1645_v15 = vpop.f32.mrb[111].mxu0  ;;  %v1996_v25 = vadd.f32 %v1995_v23, %v5573_v18  ;;  %v6336_v22 = vmul.f32 0.5, %v2385_v3 }
 0x2c6   : > { %v4643_v4 = vpop.eup %4642  ;;  %v2442_v26 = vmul.f32 0.5, %v2314_v37  ;;  %v2315_v58 = vadd.f32 1.0, %v4641_v24  ;;  %4662 = vtanh.f32 %v2133_v34  ;;  %v1646_v46 = vadd.f32 %v1645_v15, %v5573_v18 }
 0x2c7   : > { %v4645_v60 = vpop.eup %4644  ;;  %3776 = vmatpush3.bf16.msra.mxu1 %v6901_v36  ;;  %4664 = vtanh.f32 %v1642_v49  ;;  %v2063_v37 = vmul.f32 0.5, %v1644_v1  ;;  %v6340_v40 = vmul.f32 0.5, %v2386_v5  ;;  %v6344_v23 = vmul.f32 %v5882_v51, %v5913_v48 }
 0x2c8   : > { %v2443_v11 = vmul.f32 0.5, %v2315_v58  ;;  %v2698_v29 = vmul.f32 %v4639_v12, %v2442_v26  ;;  %v4647_v57 = vpop.eup %4646  ;;  %4666 = vtanh.f32 %v2062_v59  ;;  %v2387_v24 = vadd.f32 1.0, %v4645_v60  ;;  %v6902_v12 = vld [vmem:[#allocation35_spill] sm:$0xff] }
 0x2c9   : > { %v6338_v30 = vpop.eup %4648  ;;  %4668 = vtanh.f32 %v1646_v46  ;;  %v2388_v27 = vadd.f32 1.0, %v4647_v57  ;;  %v6348_v7 = vmul.f32 %v6902_v12, %v5935_v10  ;;  %v2000_v3 = vadd.f32 %v6305_v45, %v5567_v14 }
 0x2ca   : > { %v2699_v17 = vmul.f32 %v4643_v4, %v2443_v11  ;;  %v4651_v58 = vpop.eup %4650  ;;  %4670 = vtanh.f32 %v2063_v37  ;;  %v1649_v4 = vpop.f32.mrb[112].mxu0  ;;  %v6354_v49 = vmul.f32 0.5, %v2387_v24  ;;  %v6361_v1 = vmul.f32 %v6176_v21, %v6224_v0 }
 0x2cb   : > { %v6352_v34 = vpop.eup %4652  ;;  %v2316_v26 = vadd.f32 1.0, %v4651_v58  ;;  %4672 = vtanh.f32 %v1996_v25  ;;  %v1650_v48 = vadd.f32 %v1649_v4, %v5567_v14  ;;  %v1651_v60 = vpop.f32.mrb[113].mxu0  ;;  %v2824_v59 = vpack.c.bf16 %v6348_v7, %v6344_v23 }
 0x2cc   : > { %v2801_v5 = vpack.c.bf16 %v2699_v17, %v2698_v29  ;;  %v4655_v51 = vpop.eup %4654  ;;  %v2134_v10 = vmul.f32 0.5, %v2000_v3  ;;  %v1652_v11 = vadd.f32 %v1651_v60, %v5573_v18  ;;  %v1653_v46 = vpop.f32.mrb[114].mxu0  ;;  %v6366_v25 = vmul.f32 %v6202_v31, %v6235_v44 }
 0x2cd   : > { %v4657_v45 = vpop.eup %4656  ;;  %v2444_v36 = vmul.f32 0.5, %v2316_v26  ;;  %v2317_v15 = vadd.f32 1.0, %v4655_v51  ;;  %v2064_v57 = vmul.f32 0.5, %v1650_v48  ;;  %v1654_v37 = vadd.f32 %v1653_v46, %v5567_v14  ;;  %v1655_v21 = vpop.f32.mrb[115].mxu0 }
 0x2ce   : > { %3777 = vmatprep.subr.bf16.mxu1 %v2801_v5  ;;  %v4659_v29 = vpop.eup %4658  ;;  %v6903_v24 = vpack.c.bf16 %v6069_v54, %v6062_v53  ;;  %4674 = vtanh.f32 %v2134_v10  ;;  %v2002_v0 = vadd.f32 %v6308_v6, %v5573_v18  ;;  %v1656_v31 = vadd.f32 %v1655_v21, %v5573_v18 }
 0x2cf   : > { %v6374_v17 = vpop.eup %4660  ;;  %v2445_v58 = vmul.f32 0.5, %v2317_v15  ;;  %4676 = vtanh.f32 %v1652_v11  ;;  %v2700_v44 = vmul.f32 %v4657_v45, %v2444_v36  ;;  %v2065_v3 = vmul.f32 0.5, %v1654_v37 }
 0x2d0   : > { %3778 = vmatpush3.bf16.msra.mxu1 %v6903_v24  ;;  %v4663_v12 = vpop.eup %4662  ;;  %4678 = vtanh.f32 %v2064_v57  ;;  %v2833_v26 = vpack.c.bf16 %v6366_v25, %v6361_v1  ;;  %v2004_v54 = vadd.f32 %v6311_v41, %v5567_v14  ;;  %v6381_v6 = vmul.f32 0.5, %v2388_v27 }
 0x2d1   : > { %v4665_v53 = vpop.eup %4664  ;;  %4680 = vtanh.f32 %v1656_v31  ;;  %v2701_v4 = vmul.f32 %v4659_v29, %v2445_v58  ;;  %v6385_v5 = vmul.f32 %v5908_v39, %v5937_v38  ;;  %v6389_v60 = vmul.f32 %v5917_v52, %v5961_v28  ;;  %v1659_v36 = vpop.f32.mrb[116].mxu0 }
 0x2d2   : > { %v4667_v51 = vpop.eup %4666  ;;  %4682 = vtanh.f32 %v2065_v3  ;;  %v2135_v48 = vmul.f32 0.5, %v2004_v54  ;;  %v6393_v10 = vmul.f32 %v6216_v62, %v6272_v35  ;;  %v2389_v15 = vadd.f32 1.0, %v4663_v12  ;;  %v1661_v39 = vpop.f32.mrb[117].mxu0 }
 0x2d3   : > { %v4669_v41 = vpop.eup %4668  ;;  %v2318_v45 = vadd.f32 1.0, %v4667_v51  ;;  %v2802_v27 = vpack.c.bf16 %v2701_v4, %v2700_v44  ;;  %4684 = vtanh.f32 %v2002_v0  ;;  %v1660_v38 = vadd.f32 %v1659_v36, %v5567_v14  ;;  %v1663_v57 = vpop.f32.mrb[118].mxu0  ;;  %v6905_v51 = vld [vmem:[#allocation38_spill] sm:$0xff] }
 0x2d4   : > { %v4671_v11 = vpop.eup %4670  ;;  %4686 = vtanh.f32 %v2135_v48  ;;  %v2825_v46 = vpack.c.bf16 %v6389_v60, %v6385_v5  ;;  %v6400_v52 = vmul.f32 %v6247_v16, %v6279_v56  ;;  %v1662_v29 = vadd.f32 %v1661_v39, %v5573_v18  ;;  %v1665_v16 = vpop.f32.mrb[119].mxu0 }
 0x2d5   : > { %v6402_v28 = vpop.eup %4672  ;;  %v2446_v62 = vmul.f32 0.5, %v2318_v45  ;;  %v2319_v35 = vadd.f32 1.0, %v4671_v11  ;;  %3779 = vmatprep.subr.bf16.mxu1 %v2802_v27  ;;  %v6407_v37 = vmul.f32 %v5932_v47, %v5963_v55  ;;  %v2066_v24 = vmul.f32 0.5, %v1660_v38 }
 0x2d6   : > { %v1664_v21 = vadd.f32 %v1663_v57, %v5567_v14  ;;  %v6904_v0 = vpack.c.bf16 %v6101_v50, %v6092_v33  ;;  %v2834_v56 = vpack.c.bf16 %v6400_v52, %v6393_v10  ;;  %v6417_v58 = vmul.f32 %v5941_v32, %v5991_v13  ;;  %v6907_v57 = vld [vmem:[#allocation74_spill] sm:$0xff] }
 0x2d7   : > { %v2447_v31 = vmul.f32 0.5, %v2319_v35  ;;  %4688 = vtanh.f32 %v1662_v29  ;;  %v1666_v47 = vadd.f32 %v1665_v16, %v5573_v18  ;;  %v2702_v55 = vmul.f32 %v4665_v53, %v2446_v62 }
 0x2d8   : > { %3780 = vmatpush3.bf16.msra.mxu1 %v6904_v0  ;;  %v4675_v44 = vpop.eup %4674  ;;  %4690 = vtanh.f32 %v2066_v24  ;;  %v2067_v12 = vmul.f32 0.5, %v1664_v21  ;;  %v2826_v50 = vpack.c.bf16 %v6417_v58, %v6407_v37  ;;  %v2006_v33 = vadd.f32 %v6328_v20, %v5573_v18  ;;  %v6906_v20 = vld [vmem:[#allocation39_spill] sm:$0xff] }
 0x2d9   : > { %v4677_v3 = vpop.eup %4676  ;;  %4692 = vtanh.f32 %v1666_v47  ;;  %v2703_v54 = vmul.f32 %v4669_v41, %v2447_v31  ;;  %v2517_v4 = vmul.f32 0.5, %v2389_v15  ;;  %v6426_v32 = vmul.f32 %v6250_v2, %v6318_v42  ;;  %v1669_v27 = vpop.f32.mrb[120].mxu0  ;;  %v6908_v31 = vld [vmem:[#allocation58_spill] sm:$0xff]  ;;  %v6909_v47 = vld [vmem:[#allocation57_spill] sm:$0xff] }
 0x2da   : > { %v4679_v13 = vpop.eup %4678  ;;  %4694 = vtanh.f32 %v2067_v12  ;;  %v6430_v53 = vmul.f32 %v6277_v9, %v6321_v61  ;;  %v6434_v48 = vmul.f32 %v6905_v51, %v5995_v8  ;;  %v6438_v45 = vmul.f32 %v6906_v20, %v6032_v43  ;;  %v1671_v38 = vpop.f32.mrb[121].mxu0 }
 0x2db   : > { %v4681_v41 = vpop.eup %4680  ;;  %v2320_v36 = vadd.f32 1.0, %v4679_v13  ;;  %v2803_v15 = vpack.c.bf16 %v2703_v54, %v2702_v55  ;;  %v2390_v42 = vadd.f32 1.0, %v4675_v44  ;;  %4696 = vtanh.f32 %v2006_v33  ;;  %v1673_v29 = vpop.f32.mrb[122].mxu0  ;;  %v6911_v55 = vld [vmem:[#allocation44_spill] sm:$0xff]  ;;  %v6912_v44 = vld [vmem:[#allocation41_spill] sm:$0xff]  ;;  %v6914_v54 = vld [vmem:[#allocation42_spill] sm:$0xff] }
 0x2dc   : > { %v4683_v2 = vpop.eup %4682  ;;  %v1670_v11 = vadd.f32 %v1669_v27, %v5567_v14  ;;  %v2835_v9 = vpack.c.bf16 %v6430_v53, %v6426_v32  ;;  %v2827_v8 = vpack.c.bf16 %v6438_v45, %v6434_v48  ;;  %v6447_v43 = vmul.f32 %v6283_v63, %v6323_v19  ;;  %v1675_v19 = vpop.f32.mrb[123].mxu0  ;;  %v6913_v33 = vld [vmem:[#allocation45_spill] sm:$0xff] }
 0x2dd   : > { %v6449_v61 = vpop.eup %4684  ;;  %v2448_v39 = vmul.f32 0.5, %v2320_v36  ;;  %v2321_v62 = vadd.f32 1.0, %v4683_v2  ;;  %v1672_v35 = vadd.f32 %v1671_v38, %v5573_v18  ;;  %3781 = vmatprep.subr.bf16.mxu1 %v2803_v15  ;;  %v6454_v24 = vmul.f32 %v6907_v57, %v6336_v22  ;;  %v6916_v57 = vld [vmem:[#allocation43_spill] sm:$0xff] }
 0x2de   : > { %v4687_v21 = vpop.eup %4686  ;;  %v2068_v0 = vmul.f32 0.5, %v1670_v11  ;;  %v1674_v16 = vadd.f32 %v1673_v29, %v5567_v14  ;;  %v6910_v63 = vpack.c.bf16 %v6908_v31, %v6909_v47  ;;  %v6462_v12 = vmul.f32 %v6912_v44, %v6911_v55  ;;  %v6917_v47 = vld [vmem:[#allocation48_spill] sm:$0xff]  ;;  %v6919_v44 = vld [vmem:[#allocation51_spill] sm:$0xff] }
 0x2df   : > { %v6466_v13 = vmul.f32 %v6914_v54, %v6913_v33  ;;  %v2449_v51 = vmul.f32 0.5, %v2321_v62  ;;  %4698 = vtanh.f32 %v1672_v35  ;;  %v1676_v22 = vadd.f32 %v1675_v19, %v5573_v18  ;;  %v6920_v33 = vld [vmem:[#allocation49_spill] sm:$0xff] }
 0x2e0   : > { %3782 = vmatpush3.bf16.msra.mxu1 %v6910_v63  ;;  %v2704_v20 = vmul.f32 %v4677_v3, %v2448_v39  ;;  %4700 = vtanh.f32 %v2068_v0  ;;  %v2069_v36 = vmul.f32 0.5, %v1674_v16  ;;  %v2391_v27 = vadd.f32 1.0, %v4687_v21  ;;  %v6915_v39 = vld [vmem:[#allocation47_spill] sm:$0xff]  ;;  %v6918_v63 = vld [vmem:[#allocation46_spill] sm:$0xff] }
 0x2e1   : > { %v4689_v2 = vpop.eup %4688  ;;  %4702 = vtanh.f32 %v1676_v22  ;;  %v2705_v11 = vmul.f32 %v4681_v41, %v2449_v51  ;;  %v6475_v29 = vmul.f32 %v6338_v30, %v6340_v40  ;;  %v2518_v35 = vmul.f32 0.5, %v2390_v42  ;;  %v1679_v16 = vpop.f32.mrb[124].mxu0 }
 0x2e2   : > { %v4691_v62 = vpop.eup %4690  ;;  %4704 = vtanh.f32 %v2069_v36  ;;  %v6479_v3 = vmul.f32 %v6352_v34, %v6354_v49  ;;  %v6483_v21 = vmul.f32 %v6916_v57, %v6915_v39  ;;  %v6487_v19 = vmul.f32 %v6918_v63, %v6917_v47  ;;  %v1681_v49 = vpop.f32.mrb[125].mxu0  ;;  %v6921_v39 = vld [vmem:[#allocation63_spill] sm:$0xff]  ;;  %v6922_v57 = vld [vmem:[#allocation61_spill] sm:$0xff] }
 0x2e3   : > { %v4693_v0 = vpop.eup %4692  ;;  %v2322_v41 = vadd.f32 1.0, %v4691_v62  ;;  %v2804_v31 = vpack.c.bf16 %v2705_v11, %v2704_v20  ;;  %v6491_v30 = vmul.f32 %v6374_v17, %v6381_v6  ;;  %v1680_v34 = vadd.f32 %v1679_v16, %v5567_v14  ;;  %v1683_v36 = vpop.f32.mrb[126].mxu0  ;;  %v6924_v47 = vld [vmem:[#allocation53_spill] sm:$0xff]  ;;  %v6927_v16 = vld [vmem:[#allocation52_spill] sm:$0xff] }
 0x2e4   : > { %v4695_v40 = vpop.eup %4694  ;;  %v6497_v55 = vmul.f32 %v6402_v28, %v2517_v4  ;;  %v6501_v54 = vmul.f32 %v6920_v33, %v6919_v44  ;;  %v2519_v17 = vmul.f32 0.5, %v2391_v27  ;;  %v1684_v62 = vadd.f32 %v1683_v36, %v5567_v14  ;;  %v1685_v4 = vpop.f32.mrb[127].mxu0 }
 0x2e5   : > { %v4697_v51 = vpop.eup %4696  ;;  %v2450_v22 = vmul.f32 0.5, %v2322_v41  ;;  %v2323_v20 = vadd.f32 1.0, %v4695_v40  ;;  %3783 = vmatprep.subr.bf16.mxu1 %v2804_v31  ;;  %v2070_v11 = vmul.f32 0.5, %v1680_v34  ;;  %v6923_v28 = vpack.c.bf16 %v6921_v39, %v6922_v57  ;;  %v6925_v41 = vld [vmem:[#allocation50_spill] sm:$0xff] }
 0x2e6   : > { %v6513_v63 = vmul.f32 %v6925_v41, %v6924_v47  ;;  %v1682_v27 = vadd.f32 %v1681_v49, %v5573_v18  ;;  %v2071_v34 = vmul.f32 0.5, %v1684_v62  ;;  %v6519_v33 = vmul.f32 %v6449_v61, %v2518_v35  ;;  %v6928_v49 = vld [vmem:[#allocation64_spill] sm:$0xff] }
 0x2e7   : > { %3784 = vmatpush3.bf16.msra.mxu1 %v6923_v28  ;;  %v2451_v31 = vmul.f32 0.5, %v2323_v20  ;;  %v2706_v40 = vmul.f32 %v4689_v2, %v2450_v22  ;;  %4706 = vtanh.f32 %v2070_v11  ;;  %v6521_v57 = vmul.f32 %v4697_v51, %v2519_v17  ;;  %v6926_v28 = vld [vmem:[#allocation59_spill] sm:$0xff]  ;;  %v6929_v22 = vld [vmem:[#allocation56_spill] sm:$0xff] }
 0x2e8   : > { %v6525_v47 = vmul.f32 %v6927_v16, %v6926_v28  ;;  %4708 = vtanh.f32 %v2071_v34  ;;  %v1686_v2 = vadd.f32 %v1685_v4, %v5573_v18  ;;  %v6530_v11 = vmul.f32 %v6929_v22, %v6928_v49 }
 0x2e9   : > { %v4699_v36 = vpop.eup %4698  ;;  %v2707_v39 = vmul.f32 %v4693_v0, %v2451_v31  ;;  %v1689_v61 = vpop.f32.mrb[128].mxu0  ;;  %4710 = vtanh.f32 %v1682_v27  ;;  %v6971_v23 = vpack.c.bf16 %v6454_v24, %v6447_v43  ;;  %v6972_v7 = vpack.c.bf16 %v6466_v13, %v6462_v12 }
 0x2ea   : > { %v4701_v20 = vpop.eup %4700  ;;  %v1690_v17 = vadd.f32 %v1689_v61, %v5567_v14  ;;  %v1691_v16 = vpop.f32.mrb[129].mxu0  ;;  %4712 = vtanh.f32 %v1686_v2  ;;  %v6974_v25 = vpack.c.bf16 %v6487_v19, %v6483_v21  ;;  %v6976_v10 = vpack.c.bf16 %v6513_v63, %v6501_v54  ;;  %v2907_v54 = vld [vmem:[#allocation2] sm:$0xff] }
 0x2eb   : > { %v4703_v62 = vpop.eup %4702  ;;  %v2324_v41 = vadd.f32 1.0, %v4701_v20  ;;  %v2805_v35 = vpack.c.bf16 %v2707_v39, %v2706_v40  ;;  %v1693_v28 = vpop.f32.mrb[130].mxu0  ;;  %v6930_v40 = vld [vmem:[#allocation67_spill] sm:$0xff]  ;;  %v6931_v39 = vld [vmem:[#allocation65_spill] sm:$0xff]  ;;  %v1692_v61 = vadd.f32 %v1691_v16, %v5573_v18  ;;  %v6977_v52 = vpack.c.bf16 %v6521_v57, %v6519_v33 }
 0x2ec   : > { %v4705_v51 = vpop.eup %4704  ;;  %v2072_v49 = vmul.f32 0.5, %v1690_v17  ;;  %v1694_v20 = vadd.f32 %v1693_v28, %v5567_v14  ;;  %v6932_v22 = vpack.c.bf16 %v6930_v40, %v6931_v39  ;;  %v1695_v0 = vpop.f32.mrb[131].mxu0  ;;  %v6933_v28 = vld [vmem:[#allocation24_spill] sm:$0xff] }
 0x2ed   : > { %v2452_v4 = vmul.f32 0.5, %v2324_v41  ;;  %v2325_v34 = vadd.f32 1.0, %v4705_v51  ;;  %3785 = vmatprep.subr.bf16.mxu1 %v2805_v35  ;;  %v1696_v35 = vadd.f32 %v1695_v0, %v5573_v18  ;;  %v2853_v42 = vsub.s32 2, %v6933_v28 }
 0x2ee   : > { %3786 = vmatpush3.bf16.msra.mxu1 %v6932_v22  ;;  %4714 = vtanh.f32 %v2072_v49  ;;  %v2073_v6 = vmul.f32 0.5, %v1694_v20  ;;  %v2869_v1 = vsub.s32 6, %v6933_v28 }
 0x2ef   : > { %v2453_v27 = vmul.f32 0.5, %v2325_v34  ;;  %v2708_v44 = vmul.f32 %v4699_v36, %v2452_v4  ;;  %v2865_v4 = vsub.s32 5, %v6933_v28 }
 0x2f0   : > { %4716 = vtanh.f32 %v2073_v6 }
 0x2f1   : > { %v2709_v31 = vmul.f32 %v4703_v62, %v2453_v27  ;;  %v4707_v41 = vpop.eup %4706  ;;  %v1699_v51 = vpop.f32.mrb[132].mxu0  ;;  %4718 = vtanh.f32 %v1692_v61  ;;  %v6551_v61 = vld [vmem:[%s5426_s13] sm:$0xff] }
 0x2f2   : > { %v2326_v2 = vadd.f32 1.0, %v4707_v41  ;;  %v4709_v38 = vpop.eup %4708  ;;  %v1700_v34 = vadd.f32 %v1699_v51, %v5567_v14  ;;  %v1701_v36 = vpop.f32.mrb[133].mxu0  ;;  %4720 = vtanh.f32 %v1696_v35  ;;  %v2854_v41 = vrot.slane %v6551_v61, %v2853_v42 }
 0x2f3   : > { %v2806_v17 = vpack.c.bf16 %v2709_v31, %v2708_v44  ;;  %v2327_v49 = vadd.f32 1.0, %v4709_v38  ;;  %v1703_v62 = vpop.f32.mrb[134].mxu0  ;;  %v4711_v6 = vpop.eup %4710  ;;  %v6934_v44 = vld [vmem:[#allocation69_spill] sm:$0xff]  ;;  %v6935_v31 = vld [vmem:[#allocation68_spill] sm:$0xff]  ;;  %v1702_v38 = vadd.f32 %v1701_v36, %v5573_v18  ;;  %v2866_v35 = vrot.slane %v6551_v61, %v2865_v4 }
 0x2f4   : > { %v2454_v16 = vmul.f32 0.5, %v2326_v2  ;;  %v2074_v0 = vmul.f32 0.5, %v1700_v34  ;;  %v1704_v20 = vadd.f32 %v1703_v62, %v5567_v14  ;;  %v6936_v40 = vpack.c.bf16 %v6934_v44, %v6935_v31  ;;  %v1705_v39 = vpop.f32.mrb[135].mxu0  ;;  %v4713_v2 = vpop.eup %4712 }
 0x2f5   : > { %3787 = vmatprep.subr.bf16.mxu1 %v2806_v17  ;;  %v2455_v22 = vmul.f32 0.5, %v2327_v49  ;;  %v1706_v62 = vadd.f32 %v1705_v39, %v5573_v18  ;;  %vm2877_vm6 = vcmp.eq.s32.totalorder %v2854_v41, %v6933_v28  ;;  %vm2880_vm7 = vcmp.eq.s32.totalorder %v2866_v35, %v6933_v28  ;;  %v6940_v35 = vld [vmem:[#allocation27_spill] sm:$0xff] }
 0x2f6   : > { %3788 = vmatpush3.bf16.msra.mxu1 %v6936_v40  ;;  %v2710_v27 = vmul.f32 %v4711_v6, %v2454_v16  ;;  %4722 = vtanh.f32 %v2074_v0  ;;  %v2075_v51 = vmul.f32 0.5, %v1704_v20  ;;  %vm3701_vm8 = vmpackc.low %vm2877_vm6, %vm2877_vm6  ;;  %v2870_v5 = vrot.slane %v6551_v61, %v2869_v1  ;;  %v4818_v1 = vld [vmem:[#allocation11 + $0xe8] ss:$16 sps:$4 sm:$0xff] (!%p3711_p8)  }
 0x2f7   : > { %v2711_v17 = vmul.f32 %v4713_v2, %v2455_v22  ;;  %v6937_v22 = vld [vmem:[#allocation71_spill] sm:$0xff]  ;;  %vm3703_vm9 = vmpackc.low %vm2880_vm7, %vm2880_vm7 }
 0x2f8   : > { %v4715_v34 = vpop.eup %4714  ;;  %4724 = vtanh.f32 %v2075_v51  ;;  %vm2881_vm14 = vcmp.eq.s32.totalorder %v2870_v5, %v6933_v28 }
 0x2f9   : > { %v2328_v44 = vadd.f32 1.0, %v4715_v34  ;;  %v1709_v31 = vpop.f32.mrb[136].mxu0  ;;  %v2807_v49 = vpack.c.bf16 %v2711_v17, %v2710_v27  ;;  %4726 = vtanh.f32 %v1702_v38  ;;  %v6938_v27 = vld [vmem:[#allocation70_spill] sm:$0xff]  ;;  %vm3709_vm15 = vmpackc.low %vm2881_vm14, %vm2881_vm14 }
 0x2fa   : > { %v4717_v16 = vpop.eup %4716  ;;  %v1710_v42 = vadd.f32 %v1709_v31, %v5567_v14  ;;  %v1711_v6 = vpop.f32.mrb[137].mxu0  ;;  %4728 = vtanh.f32 %v1706_v62  ;;  %v6939_v2 = vpack.c.bf16 %v6937_v22, %v6938_v27  ;;  %v6941_v17 = vld [vmem:[#allocation26_spill] sm:$0xff] }
 0x2fb   : > { %v2456_v36 = vmul.f32 0.5, %v2328_v44  ;;  %v2329_v0 = vadd.f32 1.0, %v4717_v16  ;;  %v1713_v4 = vpop.f32.mrb[138].mxu0  ;;  %3789 = vmatprep.subr.bf16.mxu1 %v2807_v49  ;;  %v4719_v20 = vpop.eup %4718  ;;  %v6942_v34 = vpack.c.bf16 %v6940_v35, %v6941_v17  ;;  %v1712_v31 = vadd.f32 %v1711_v6, %v5573_v18 }
 0x2fc   : > { %v2076_v40 = vmul.f32 0.5, %v1710_v42  ;;  %v1714_v39 = vadd.f32 %v1713_v4, %v5567_v14  ;;  %3790 = vmatpush3.bf16.msra.mxu1 %v6939_v2  ;;  %v1715_v51 = vpop.f32.mrb[139].mxu0  ;;  %v4721_v62 = vpop.eup %4720  ;;  %v6943_v16 = vmov 1.0|1.0  }
 0x2fd   : > { %v2457_v38 = vmul.f32 0.5, %v2329_v0  ;;  %3797 = vmatprep.subr.bf16.mxu1 %v6942_v34  ;;  %v2712_v44 = vmul.f32 %v4719_v20, %v2456_v36  ;;  %v1716_v41 = vadd.f32 %v1715_v51, %v5573_v18  ;;  %v6944_v51 = vld [vmem:[#allocation30_spill] sm:$0xff]  ;;  %v6945_v34 = vld [vmem:[#allocation29_spill] sm:$0xff] }
 0x2fe   : > { %4730 = vtanh.f32 %v2076_v40  ;;  %v2077_v49 = vmul.f32 0.5, %v1714_v39 }
 0x2ff   : > { %3702 = vmatmul.mubr.msk.bf16.vlgmr.msra.gmra.mrb[104].mxu1 %vm3701_vm8, %v6943_v16  ;;  %v2713_v42 = vmul.f32 %v4721_v62, %v2457_v38  ;;  %v6946_v62 = vpack.c.bf16 %v6944_v51, %v6945_v34 }
 0x300   : > { %v4723_v4 = vpop.eup %4722  ;;  %4732 = vtanh.f32 %v2077_v49  ;;  %3704 = vmatprep.mubr.msk.bf16.mxu1 %vm3703_vm9, %v6943_v16 }
 0x301   : > { %v2330_v0 = vadd.f32 1.0, %v4723_v4  ;;  %v1719_v22 = vpop.f32.mrb[140].mxu0  ;;  %v2808_v27 = vpack.c.bf16 %v2713_v42, %v2712_v44  ;;  %4734 = vtanh.f32 %v1712_v31 }
 0x302   : > { %v4725_v2 = vpop.eup %4724  ;;  %v1720_v36 = vadd.f32 %v1719_v22, %v5567_v14  ;;  %v1721_v20 = vpop.f32.mrb[141].mxu0  ;;  %4736 = vtanh.f32 %v1716_v41 }
 0x303   : > { %v2458_v40 = vmul.f32 0.5, %v2330_v0  ;;  %v2331_v6 = vadd.f32 1.0, %v4725_v2  ;;  %v1723_v39 = vpop.f32.mrb[142].mxu0  ;;  %3798 = vmatpush3.bf16.msra.mxu1 %v2808_v27  ;;  %v4727_v35 = vpop.eup %4726  ;;  %v1722_v4 = vadd.f32 %v1721_v20, %v5573_v18 }
 0x304   : > { %v2078_v38 = vmul.f32 0.5, %v1720_v36  ;;  %v1724_v17 = vadd.f32 %v1723_v39, %v5567_v14  ;;  %3799 = vmatprep.subr.bf16.mxu1 %v6946_v62  ;;  %v1725_v49 = vpop.f32.mrb[143].mxu0  ;;  %v4729_v31 = vpop.eup %4728  ;;  %v6947_v62 = vld [vmem:[#allocation36_spill] sm:$0xff] }
 0x305   : > { %v2459_v44 = vmul.f32 0.5, %v2331_v6  ;;  %v2714_v42 = vmul.f32 %v4727_v35, %v2458_v40  ;;  %v1726_v41 = vadd.f32 %v1725_v49, %v5573_v18 }
 0x306   : > { %4738 = vtanh.f32 %v2078_v38  ;;  %v2079_v0 = vmul.f32 0.5, %v1724_v17 }
 0x307   : > { %v2715_v22 = vmul.f32 %v4729_v31, %v2459_v44  ;;  %v6948_v44 = vld [vmem:[#allocation31_spill] sm:$0xff] }
 0x308   : > { %v4731_v2 = vpop.eup %4730  ;;  %4740 = vtanh.f32 %v2079_v0  ;;  %v6949_v49 = vpack.c.bf16 %v6947_v62, %v6948_v44 }
 0x309   : > { %v2332_v27 = vadd.f32 1.0, %v4731_v2  ;;  %v1729_v36 = vpop.f32.mrb[144].mxu0  ;;  %v2809_v39 = vpack.c.bf16 %v2715_v22, %v2714_v42  ;;  %4742 = vtanh.f32 %v1722_v4 }
 0x30a   : > { %v4733_v15 = vpop.eup %4732  ;;  %v1730_v51 = vadd.f32 %v1729_v36, %v5567_v14  ;;  %v1731_v34 = vpop.f32.mrb[145].mxu0  ;;  %4744 = vtanh.f32 %v1726_v41 }
 0x30b   : > { %v2460_v6 = vmul.f32 0.5, %v2332_v27  ;;  %v2333_v40 = vadd.f32 1.0, %v4733_v15  ;;  %v1733_v35 = vpop.f32.mrb[146].mxu0  ;;  %3800 = vmatpush3.bf16.msra.mxu1 %v2809_v39  ;;  %v4735_v38 = vpop.eup %4734  ;;  %v1732_v22 = vadd.f32 %v1731_v34, %v5573_v18 }
 0x30c   : > { %v2080_v20 = vmul.f32 0.5, %v1730_v51  ;;  %v1734_v17 = vadd.f32 %v1733_v35, %v5567_v14  ;;  %3801 = vmatprep.subr.bf16.mxu1 %v6949_v49  ;;  %v1735_v31 = vpop.f32.mrb[147].mxu0  ;;  %v4737_v4 = vpop.eup %4736  ;;  %v6950_v49 = vld [vmem:[#allocation40_spill] sm:$0xff] }
 0x30d   : > { %v2461_v42 = vmul.f32 0.5, %v2333_v40  ;;  %v2716_v0 = vmul.f32 %v4735_v38, %v2460_v6  ;;  %v1736_v41 = vadd.f32 %v1735_v31, %v5573_v18 }
 0x30e   : > { %4746 = vtanh.f32 %v2080_v20  ;;  %v2081_v2 = vmul.f32 0.5, %v1734_v17 }
 0x30f   : > { %v2717_v15 = vmul.f32 %v4737_v4, %v2461_v42  ;;  %v6951_v42 = vld [vmem:[#allocation37_spill] sm:$0xff] }
 0x310   : > { %v4739_v27 = vpop.eup %4738  ;;  %4748 = vtanh.f32 %v2081_v2  ;;  %v6952_v31 = vpack.c.bf16 %v6950_v49, %v6951_v42 }
 0x311   : > { %v2334_v36 = vadd.f32 1.0, %v4739_v27  ;;  %v1739_v39 = vpop.f32.mrb[148].mxu0  ;;  %v2810_v51 = vpack.c.bf16 %v2717_v15, %v2716_v0  ;;  %4750 = vtanh.f32 %v1732_v22 }
 0x312   : > { %v4741_v35 = vpop.eup %4740  ;;  %v1740_v62 = vadd.f32 %v1739_v39, %v5567_v14  ;;  %v1741_v44 = vpop.f32.mrb[149].mxu0  ;;  %4752 = vtanh.f32 %v1736_v41 }
 0x313   : > { %v2462_v40 = vmul.f32 0.5, %v2334_v36  ;;  %v2335_v6 = vadd.f32 1.0, %v4741_v35  ;;  %v1743_v38 = vpop.f32.mrb[150].mxu0  ;;  %3802 = vmatpush3.bf16.msra.mxu1 %v2810_v51  ;;  %v4743_v20 = vpop.eup %4742  ;;  %v1742_v15 = vadd.f32 %v1741_v44, %v5573_v18 }
 0x314   : > { %v2082_v34 = vmul.f32 0.5, %v1740_v62  ;;  %v1744_v17 = vadd.f32 %v1743_v38, %v5567_v14  ;;  %3803 = vmatprep.subr.bf16.mxu1 %v6952_v31  ;;  %v1745_v4 = vpop.f32.mrb[151].mxu0  ;;  %v4745_v22 = vpop.eup %4744  ;;  %v6953_v31 = vld [vmem:[#allocation55_spill] sm:$0xff] }
 0x315   : > { %v2463_v0 = vmul.f32 0.5, %v2335_v6  ;;  %v2718_v2 = vmul.f32 %v4743_v20, %v2462_v40  ;;  %v1746_v41 = vadd.f32 %v1745_v4, %v5573_v18 }
 0x316   : > { %4754 = vtanh.f32 %v2082_v34  ;;  %v2083_v27 = vmul.f32 0.5, %v1744_v17 }
 0x317   : > { %v2719_v36 = vmul.f32 %v4745_v22, %v2463_v0  ;;  %v6954_v0 = vld [vmem:[#allocation54_spill] sm:$0xff] }
 0x318   : > { %v4747_v39 = vpop.eup %4746  ;;  %4756 = vtanh.f32 %v2083_v27  ;;  %v6955_v4 = vpack.c.bf16 %v6953_v31, %v6954_v0 }
 0x319   : > { %v2336_v51 = vadd.f32 1.0, %v4747_v39  ;;  %v1749_v35 = vpop.f32.mrb[152].mxu0  ;;  %v2811_v62 = vpack.c.bf16 %v2719_v36, %v2718_v2  ;;  %4758 = vtanh.f32 %v1742_v15 }
 0x31a   : > { %v4749_v38 = vpop.eup %4748  ;;  %v1750_v49 = vadd.f32 %v1749_v35, %v5567_v14  ;;  %v1751_v42 = vpop.f32.mrb[153].mxu0  ;;  %4760 = vtanh.f32 %v1746_v41 }
 0x31b   : > { %v2464_v6 = vmul.f32 0.5, %v2336_v51  ;;  %v2337_v40 = vadd.f32 1.0, %v4749_v38  ;;  %v1753_v20 = vpop.f32.mrb[154].mxu0  ;;  %3804 = vmatpush3.bf16.msra.mxu1 %v2811_v62  ;;  %v4751_v34 = vpop.eup %4750  ;;  %v1752_v36 = vadd.f32 %v1751_v42, %v5573_v18 }
 0x31c   : > { %v2084_v44 = vmul.f32 0.5, %v1750_v49  ;;  %v1754_v17 = vadd.f32 %v1753_v20, %v5567_v14  ;;  %3805 = vmatprep.subr.bf16.mxu1 %v6955_v4  ;;  %v1755_v22 = vpop.f32.mrb[155].mxu0  ;;  %v4753_v15 = vpop.eup %4752 }
 0x31d   : > { %v2465_v2 = vmul.f32 0.5, %v2337_v40  ;;  %v2720_v27 = vmul.f32 %v4751_v34, %v2464_v6  ;;  %v1756_v41 = vadd.f32 %v1755_v22, %v5573_v18  ;;  %v6956_v6 = vld [vmem:[#allocation62_spill] sm:$0xff]  ;;  %v6957_v40 = vld [vmem:[#allocation60_spill] sm:$0xff] }
 0x31e   : > { %4762 = vtanh.f32 %v2084_v44  ;;  %v2085_v39 = vmul.f32 0.5, %v1754_v17  ;;  %v6958_v34 = vpack.c.bf16 %v6956_v6, %v6957_v40 }
 0x31f   : > { %v2721_v51 = vmul.f32 %v4753_v15, %v2465_v2 }
 0x320   : > { %v4755_v35 = vpop.eup %4754  ;;  %4764 = vtanh.f32 %v2085_v39  ;;  %v6959_v39 = vld [vmem:[#allocation32_spill] sm:$0xff] }
 0x321   : > { %v2338_v62 = vadd.f32 1.0, %v4755_v35  ;;  %v2812_v38 = vpack.c.bf16 %v2721_v51, %v2720_v27  ;;  %4766 = vtanh.f32 %v1752_v36  ;;  %v6960_v51 = vld [vmem:[#allocation66_spill] sm:$0xff] }
 0x322   : > { %v4757_v14 = vpop.eup %4756  ;;  %4768 = vtanh.f32 %v1756_v41  ;;  %v6961_v35 = vpack.c.bf16 %v6959_v39, %v6960_v51  ;;  %v2861_v41 = vsub.s32 4, %v6933_v28  ;;  %v4782_v39 = vld [vmem:[#allocation11 + $0x28] ss:$16 sps:$4 sm:$0xff] (!%p3711_p8)   ;;  %v4783_v51 = vld [vmem:[#allocation11 + $0x44] ss:$16 sps:$4 sm:$0xff] (!%p3711_p8)  }
 0x323   : > { %v2466_v49 = vmul.f32 0.5, %v2338_v62  ;;  %v2339_v20 = vadd.f32 1.0, %v4757_v14  ;;  %3806 = vmatpush3.bf16.msra.mxu1 %v2812_v38  ;;  %v4759_v31 = vpop.eup %4758  ;;  %v2873_v14 = vsub.s32 7, %v6933_v28 }
 0x324   : > { %3807 = vmatprep.subr.bf16.mxu1 %v6958_v34  ;;  %v4761_v17 = vpop.eup %4760  ;;  %v6962_v34 = vld [vmem:[#allocation34_spill] sm:$0xff] }
 0x325   : > { %v2467_v42 = vmul.f32 0.5, %v2339_v20  ;;  %v2722_v44 = vmul.f32 %v4759_v31, %v2466_v49  ;;  %v2862_v31 = vrot.slane %v6551_v61, %v2861_v41  ;;  %v2874_v40 = vrot.slane %v6551_v61, %v2873_v14  ;;  %v4775_v61 = vld [vmem:[#allocation11] ss:$16 sps:$4 sm:$0xff] (!%p3711_p8)   ;;  %v4791_v14 = vld [vmem:[#allocation11 + $0x6c] ss:$16 sps:$4 sm:$0xff] (!%p3711_p8)  }
 0x326   : > { %v4787_v41 = vld [vmem:[#allocation11 + $0x40] ss:$16 sps:$4 sm:$0xff] (!%p3711_p8)  }
 0x327   : > { %v2723_v0 = vmul.f32 %v4761_v17, %v2467_v42  ;;  %v6963_v42 = vld [vmem:[#allocation33_spill] sm:$0xff]  ;;  %vm2879_vm10 = vcmp.eq.s32.totalorder %v2862_v31, %v6933_v28  ;;  %vm2882_vm11 = vcmp.eq.s32.totalorder %v2874_v40, %v6933_v28  ;;  %v6965_v17 = vld [vmem:[#allocation28_spill] sm:$0xff]  ;;  %v5110_v28 = vmov (!%p3711_p8), 0  }
 0x328   : > { %v4763_v4 = vpop.eup %4762  ;;  %vm3705_vm12 = vmpackc.low %vm2879_vm10, %vm2879_vm10  ;;  %3300 = vmatprep.mubr.bf16.mxu0 (!%p3711_p8), %v5110_v28  ;;  %v4795_v31 = vld [vmem:[#allocation11 + $0x84] ss:$16 sps:$4 sm:$0xff] (!%p3711_p8)   ;;  %v4799_v40 = vld [vmem:[#allocation11 + $0x80] ss:$16 sps:$4 sm:$0xff] (!%p3711_p8)  }
 0x329   : > { %v2340_v2 = vadd.f32 1.0, %v4763_v4  ;;  %v2813_v18 = vpack.c.bf16 %v2723_v0, %v2722_v44  ;;  %v6964_v44 = vpack.c.bf16 %v6962_v34, %v6963_v42  ;;  %v6966_v0 = vld [vmem:[#allocation25_spill] sm:$0xff]  ;;  %vm3707_vm13 = vmpackc.low %vm2882_vm11, %vm2882_vm11  ;;  %v4801_v42 = vld [vmem:[#allocation11 + $0xa4] ss:$16 sps:$4 sm:$0xff] (!%p3711_p8)  }
 0x32a   : > { %v4765_v22 = vpop.eup %4764  ;;  %v6967_v4 = vpack.c.bf16 %v6965_v17, %v6966_v0  ;;  %v4800_v34 = vld [vmem:[#allocation11 + $0x88] ss:$16 sps:$4 sm:$0xff] (!%p3711_p8)   ;;  %v4805_v17 = vld [vmem:[#allocation11 + $0xa0] ss:$16 sps:$4 sm:$0xff] (!%p3711_p8)  }
 0x32b   : > { %v2468_v27 = vmul.f32 0.5, %v2340_v2  ;;  %v2341_v15 = vadd.f32 1.0, %v4765_v22  ;;  %3808 = vmatpush3.bf16.msra.mxu1 %v2813_v18  ;;  %v4767_v36 = vpop.eup %4766  ;;  %v6968_v2 = vld [vmem:[#allocation73_spill] sm:$0xff]  ;;  %v6969_v18 = vld [vmem:[#allocation72_spill] sm:$0xff] }
 0x32c   : > { %3809 = vmatprep.subr.bf16.mxu1 %v6961_v35  ;;  %v4769_v49 = vpop.eup %4768  ;;  %v6970_v22 = vpack.c.bf16 %v6968_v2, %v6969_v18  ;;  %v4785_v35 = vld [vmem:[#allocation11 + $0x4c] ss:$16 sps:$4 sm:$0xff] (!%p3711_p8)   ;;  %v4806_v0 = vld [vmem:[#allocation11 + $0xa8] ss:$16 sps:$4 sm:$0xff] (!%p3711_p8)   ;;  %v4811_v18 = vld [vmem:[#allocation11 + $0xc0] ss:$16 sps:$4 sm:$0xff] (!%p3711_p8)  }
 0x32d   : > { %v2469_v62 = vmul.f32 0.5, %v2341_v15  ;;  %v2724_v38 = vmul.f32 %v4767_v36, %v2468_v27  ;;  %v4777_v27 = vld [vmem:[#allocation11 + $0x24] ss:$16 sps:$4 sm:$0xff] (!%p3711_p8)   ;;  %v4779_v15 = vld [vmem:[#allocation11 + $0x2c] ss:$16 sps:$4 sm:$0xff] (!%p3711_p8)  }
 0x32e   : > { %v4781_v36 = vld [vmem:[#allocation11 + $0x20] ss:$16 sps:$4 sm:$0xff] (!%p3711_p8)   ;;  %v4809_v2 = vld [vmem:[#allocation11 + $0xcc] ss:$16 sps:$4 sm:$0xff] (!%p3711_p8)  }
 0x32f   : > { %v2725_v20 = vmul.f32 %v4769_v49, %v2469_v62  ;;  %v4788_v62 = vld [vmem:[#allocation11 + $0x48] ss:$16 sps:$4 sm:$0xff] (!%p3711_p8)   ;;  %v4793_v49 = vld [vmem:[#allocation11 + $0x60] ss:$16 sps:$4 sm:$0xff] (!%p3711_p8)  }
 0x331   : > { %v2814_v6 = vpack.c.bf16 %v2725_v20, %v2724_v38  ;;  %v4789_v38 = vld [vmem:[#allocation11 + $0x64] ss:$16 sps:$4 sm:$0xff] (!%p3711_p8)   ;;  %v4794_v20 = vld [vmem:[#allocation11 + $0x68] ss:$16 sps:$4 sm:$0xff] (!%p3711_p8)  }
 0x333   : > { %3810 = vmatpush3.bf16.msra.mxu1 %v2814_v6  ;;  %v4797_v6 = vld [vmem:[#allocation11 + $0x8c] ss:$16 sps:$4 sm:$0xff] (!%p3711_p8)  }
 0x334   : > { %3811 = vmatprep.subr.bf16.mxu1 %v6964_v44  ;;  %v4803_v44 = vld [vmem:[#allocation11 + $0xac] ss:$16 sps:$4 sm:$0xff] (!%p3711_p8)  }
 0x337   : > { %3812 = vmatpush3.bf16.msra.mxu1 %v6967_v4  ;;  %v4807_v4 = vld [vmem:[#allocation11 + $0xc4] ss:$16 sps:$4 sm:$0xff] (!%p3711_p8)  }
 0x338   : > { %3819 = vmatprep.subr.bf16.mxu1 %v6970_v22  ;;  %v4812_v22 = vld [vmem:[#allocation11 + $0xc8] ss:$16 sps:$4 sm:$0xff] (!%p3711_p8)  }
 0x33a   : > { %3706 = vmatmul.mubr.msk.bf16.vlgmr.msra.gmra.mrb[108].mxu1 %vm3705_vm12, %v6943_v16 }
 0x33b   : > { %3820 = vmatpush3.bf16.msra.mxu1 %v2824_v59  ;;  %3708 = vmatprep.mubr.msk.bf16.mxu1 %vm3707_vm13, %v6943_v16  ;;  %v6973_v59 = vpack.c.bf16 %v6479_v3, %v6475_v29 }
 0x33c   : > { %3821 = vmatprep.subr.bf16.mxu1 %v2833_v26  ;;  %v6975_v26 = vpack.c.bf16 %v6497_v55, %v6491_v30 }
 0x33f   : > { %3822 = vmatpush3.bf16.msra.mxu1 %v2825_v46 }
 0x340   : > { %3823 = vmatprep.subr.bf16.mxu1 %v2834_v56 }
 0x343   : > { %3824 = vmatpush3.bf16.msra.mxu1 %v2826_v50  ;;  %v6978_v50 = vpack.c.bf16 %v6530_v11, %v6525_v47  ;;  %v4771_v47 = vld [vmem:[#allocation11 + $0x4] ss:$16 sps:$4 sm:$0xff] (!%p3711_p8)   ;;  %v4773_v11 = vld [vmem:[#allocation11 + $0xc] ss:$16 sps:$4 sm:$0xff] (!%p3711_p8)  }
 0x344   : > { %3825 = vmatprep.subr.bf16.mxu1 %v2835_v9  ;;  %3268 = vmatprep.subr.bf16.mxu0 (!%p3711_p8), %v4771_v47 }
 0x345   : > { %3269 = vmatpush1.bf16.msra.mxu0 (!%p3711_p8), %v4775_v61 }
 0x346   : > { %3270 = vmatprep.subr.bf16.mxu0 (!%p3711_p8), %v4777_v27 }
 0x347   : > { %3826 = vmatpush3.bf16.msra.mxu1 %v2827_v8 }
 0x348   : > { %3827 = vmatprep.subr.bf16.mxu1 %v6971_v23  ;;  %v4813_v23 = vld [vmem:[#allocation11 + $0xe4] ss:$16 sps:$4 sm:$0xff] (!%p3711_p8)  }
 0x349   : > { %3271 = vmatpush1.bf16.msra.mxu0 (!%p3711_p8), %v4781_v36 }
 0x34a   : > { %3272 = vmatprep.subr.bf16.mxu0 (!%p3711_p8), %v4783_v51 }
 0x34b   : > { %3828 = vmatpush3.bf16.msra.mxu1 %v6972_v7  ;;  %v4815_v7 = vld [vmem:[#allocation11 + $0xec] ss:$16 sps:$4 sm:$0xff] (!%p3711_p8)  }
 0x34c   : > { %3829 = vmatprep.subr.bf16.mxu1 %v6973_v59  ;;  %v4817_v59 = vld [vmem:[#allocation11 + $0xe0] ss:$16 sps:$4 sm:$0xff] (!%p3711_p8)  }
 0x34d   : > { %3273 = vmatpush1.bf16.msra.mxu0 (!%p3711_p8), %v4787_v41 }
 0x34e   : > { %3274 = vmatprep.subr.bf16.mxu0 (!%p3711_p8), %v4789_v38 }
 0x34f   : > { %3830 = vmatpush3.bf16.msra.mxu1 %v6974_v25 }
 0x350   : > { %3831 = vmatprep.subr.bf16.mxu1 %v6975_v26 }
 0x351   : > { %3275 = vmatpush1.bf16.msra.mxu0 (!%p3711_p8), %v4793_v49 }
 0x352   : > { %3276 = vmatprep.subr.bf16.mxu0 (!%p3711_p8), %v4795_v31 }
 0x353   : > { %3832 = vmatpush3.bf16.msra.mxu1 %v6976_v10 }
 0x354   : > { %3833 = vmatprep.subr.bf16.mxu1 %v6977_v52 }
 0x355   : > { %3277 = vmatpush1.bf16.msra.mxu0 (!%p3711_p8), %v4799_v40 }
 0x356   : > { %v3769_v60 = vpop.f32.mrb[100].mxu1  ;;  %3278 = vmatprep.subr.bf16.mxu0 (!%p3711_p8), %v4801_v42 }
 0x357   : > { %v3770_v46 = vpop.f32.mrb[101].mxu1  ;;  %3834 = vmatpush3.bf16.msra.mxu1 %v6978_v50 }
 0x358   : > { %v3771_v37 = vadd.f32 %v3770_v46, %v3769_v60  ;;  %v3772_v56 = vpop.f32.mrb[102].mxu1  ;;  %3309 = vmatprep.subr.bf16.mxu1 (!%p3711_p8), %v4773_v11 }
 0x359   : > { %v3773_v58 = vpop.f32.mrb[103].mxu1  ;;  %3279 = vmatpush1.bf16.msra.mxu0 (!%p3711_p8), %v4805_v17 }
 0x35a   : > { %3710 = vmatmul.mubr.msk.bf16.vlgmr.msra.gmra.mrb[112].mxu1 %vm3709_vm15, %v6943_v16  ;;  %v4776_v16 = vld [vmem:[#allocation11 + $0x8] ss:$16 sps:$4 sm:$0xff] (!%p3711_p8)   ;;  %3280 = vmatprep.subr.bf16.mxu0 (!%p3711_p8), %v4807_v4 }
 0x35b   : > { %3341 = vmatprep.mubr.bf16.mxu1 (!%p3711_p8), %v5110_v28  ;;  %3310 = vmatpush1.bf16.msra.mxu1 (!%p3711_p8), %v4776_v16 }
 0x35c   : > { %3311 = vmatprep.subr.bf16.mxu1 (!%p3711_p8), %v4779_v15 }
 0x35d   : > { %3281 = vmatpush1.bf16.msra.mxu0 (!%p3711_p8), %v4811_v18 }
 0x35e   : > { %3282 = vmatprep.subr.bf16.mxu0 (!%p3711_p8), %v4813_v23 }
 0x35f   : > { %3312 = vmatpush1.bf16.msra.mxu1 (!%p3711_p8), %v4782_v39 }
 0x360   : > { %3313 = vmatprep.subr.bf16.mxu1 (!%p3711_p8), %v4785_v35 }
 0x361   : > { %3283 = vmatpush1.bf16.msra.mxu0 (!%p3711_p8), %v4817_v59 }
 0x363   : > { %3314 = vmatpush1.bf16.msra.mxu1 (!%p3711_p8), %v4788_v62 }
 0x364   : > { %3315 = vmatprep.subr.bf16.mxu1 (!%p3711_p8), %v4791_v14 }
 0x367   : > { %3316 = vmatpush1.bf16.msra.mxu1 (!%p3711_p8), %v4794_v20 }
 0x368   : > { %3317 = vmatprep.subr.bf16.mxu1 (!%p3711_p8), %v4797_v6 }
 0x36b   : > { %3318 = vmatpush1.bf16.msra.mxu1 (!%p3711_p8), %v4800_v34 }
 0x36c   : > { %3319 = vmatprep.subr.bf16.mxu1 (!%p3711_p8), %v4803_v44 }
 0x36f   : > { %3320 = vmatpush1.bf16.msra.mxu1 (!%p3711_p8), %v4806_v0 }
 0x370   : > { %3321 = vmatprep.subr.bf16.mxu1 (!%p3711_p8), %v4809_v2 }
 0x373   : > { %3322 = vmatpush1.bf16.msra.mxu1 (!%p3711_p8), %v4812_v22 }
 0x374   : > { %3323 = vmatprep.subr.bf16.mxu1 (!%p3711_p8), %v4815_v7 }
 0x377   : > { %3324 = vmatpush1.bf16.msra.mxu1 (!%p3711_p8), %v4818_v1 }
 0x3d2   : > { %v3791_v32 = vpop.f32.mrb[104].mxu1 }
 0x3d3   : > { %v3792_v53 = vpop.f32.mrb[105].mxu1 }
 0x3d4   : > { %v3793_v48 = vadd.f32 %v3792_v53, %v3791_v32  ;;  %v3794_v45 = vpop.f32.mrb[106].mxu1 }
 0x3d5   : > { %v3795_v9 = vpop.f32.mrb[107].mxu1 }
 0x3d6   : > { %v2983_v8 = vadd.f32 %v3793_v48, %v3771_v37 }
 0x40d   : > { %v3813_v43 = vpop.f32.mrb[108].mxu1 }
 0x40e   : > { %v3814_v24 = vpop.f32.mrb[109].mxu1 }
 0x40f   : > { %v3815_v12 = vadd.f32 %v3814_v24, %v3813_v43  ;;  %v3816_v13 = vpop.f32.mrb[110].mxu1 }
 0x410   : > { %v3817_v29 = vpop.f32.mrb[111].mxu1 }
 0x411   : > { %v3023_v3 = vadd.f32 %v3815_v12, %v2983_v8 }
 0x42d   : > { %v3835_v21 = vpop.f32.mrb[112].mxu1 }
 0x42e   : > { %v3836_v19 = vpop.f32.mrb[113].mxu1 }
 0x42f   : > { %v3837_v30 = vadd.f32 %v3836_v19, %v3835_v21  ;;  %v3838_v55 = vpop.f32.mrb[114].mxu1  ;;  %3073 = sbr.rel (%p3711_p8) target bundleno = 1302 (0x516), region = 68 }
 0x430   : > { %v3839_v63 = vpop.f32.mrb[115].mxu1 }
 0x431   : > { %v3063_v33 = vadd.f32 %v3837_v30, %v3023_v3 }
 0x433   : > { %v3068_v57 = vadd.f32 %v3063_v33, %v2907_v54 }
 0x435   : > { %3069 = vst [vmem:[#allocation2] sm:$0xff] %v3068_v57 }
 0x43c   : > { %v3074_v25 = vld [vmem:[#allocation2] sm:$0xff] }
 0x43d   : > { %v3075_v26 = vpack.c.bf16 %v3074_v25, %v3074_v25 }
 0x43f   : > { %3301 = vmatmul.mubr.bf16.vlgmr.msra.gmra.mrb[0].mxu0 %v3075_v26  ;;  %3342 = vmatmul.mubr.bf16.vlgmr.msra.gmra.mrb[0].mxu1 %v3075_v26 }
 0x512   : > { %v3302_v5 = vpop.f32.mrb[0].mxu0  ;;  %v3343_v60 = vpop.f32.mrb[0].mxu1 }
 0x513   : > { %3350 = vst [vmem:[%s5450_s21] sm:$0xff] %v3302_v5  ;;  %3352 = vst [vmem:[%s5450_s21 + $0x10] sm:$0xff] %v3343_v60  ;;  %v3304_v10 = vpop.f32.mrb[1].mxu0  ;;  %v3345_v46 = vpop.f32.mrb[1].mxu1 }
 0x514   : > { %3351 = vst [vmem:[%s5450_s21 + $0x8] sm:$0xff] %v3304_v10  ;;  %3353 = vst [vmem:[%s5450_s21 + $0x18] sm:$0xff] %v3345_v46  ;;  %v3306_v52 = vpop.f32.mrb[2].mxu0  ;;  %v3347_v37 = vpop.f32.mrb[2].mxu1 }
 0x515   : > { %v3307_v56 = vpop.f32.mrb[3].mxu0  ;;  %v3348_v58 = vpop.f32.mrb[3].mxu1 }
 0x516 PF: > { %s6979_s24 = sld [smem:[#allocation19_spill]]  ;;  %s6980_s29 = sld [smem:[#allocation21_spill]] }
 0x517   : > { %s6981_s30 = sld [smem:[#allocation78_spill]]  ;;  %s3369_s10 = sshll.u32 %s5450_s21, 4  ;;  %s3370_s10 = int_to_ptr.vmem [resolvable:$true] %s3369_s10 }
 0x518   : > { %s3355_s18 = scalar_lea.sflag [#allocation5], %s344_s9  ;;  %s4963_s26 = scalar_lea.vmem %s3370_s10, 512 }
 0x519   : > { %p4964_p12 = scmp.ne.s32.totalorder %s3370_s10, %s4963_s26  ;;  %s5111_s2 = smov [#allocation12]  }
 0x51a   : > { %s4967_s8 = sshll.u32 %s5111_s2, 4  ;;  %s4968_s8 = int_to_ptr.vmem [resolvable:$false] %s4967_s8 }
 0x51b   : > { %s4969_s13 = scalar_lea.vmem %s4968_s8, 1024  ;;  %p4970_p6 = scmp.lt.s32.totalorder %s3370_s10, %s4968_s8 }
 0x51c   : > { %s3752_s6 = sshll.u32 %s6979_s24, 9  ;;  %p6982_p2 = scmp.ne.s32.totalorder %s6980_s29, 0 }
 0x51d   : > { %s6683_s7 = scalar_lea.hbm %s6981_s30, %s3752_s6  ;;  %p4971_p13 = scmp.lt.s32.totalorder %s4969_s13, %s4963_s26 }
 0x51e   : > { %p4965_p9 = pnand %p4964_p12, %p6982_p2 }
 0x51f   : > { %p4972_p7 = por %p4971_p13, %p4970_p6 }
 0x520   : > { %p4966_p1 = pneg %p4965_p9 }
 0x522   : > { %p4973_p4 = pnand %p4972_p7, %p4966_p1 }
 0x524   : > { %4976 = shalt.err (!%p4973_p4)
}
 0x525   : > { %s4977_s14 = scalar_lea.hbm %s6683_s7, 512  ;;  %s4981_s16 = scalar_lea.hbm %s6981_s30, 1024 }
 0x526   : > { %p4978_p3 = scmp.ne.s32.totalorder %s6683_s7, %s4977_s14  ;;  %p4982_p0 = scmp.lt.u32.totalorder %s6683_s7, %s6981_s30 }
 0x527   : > { %p4983_p5 = scmp.lt.u32.totalorder %s4981_s16, %s4977_s14  ;;  %p4985_p12 = scmp.lt.u32.totalorder %s4977_s14, %s6683_s7 }
 0x528   : > { %p4979_p10 = pnand %p4978_p3, %p6982_p2 }
 0x529   : > { %p4984_p8 = por %p4983_p5, %p4982_p0 }
 0x52a   : > { %p4980_p11 = pneg %p4979_p10 }
 0x52b   : > { %p4986_p9 = por %p4985_p12, %p4984_p8 }
 0x52d   : > { %p4987_p1 = pnand %p4986_p9, %p4980_p11 }
 0x52f   : > { %4990 = shalt.err (!%p4987_p1)
}
 0x530   : > { %3889 = dma.vmem_to_hbm [thread:$0]  (%p6982_p2), %s3370_s10, 512, %s6683_s7, %s3355_s18  }
 0x531 PF: > { %s6983_s21 = sld [smem:[#allocation18_spill]]  ;;  %s6984_s24 = sld [smem:[#allocation22_spill]] }
 0x532   : > { %p3919_p6 = scmp.ge.s32.totalorder %s5097_s28, 2 }
 0x537   : > { %s3381_s6 = sand.u32 1, %s6983_s21   ;;  %p6985_p13 = scmp.ne.s32.totalorder %s6984_s24, 0 }
 0x538   : > { %s3382_s11 = scalar_lea.sflag [#allocation5], %s3381_s6 }
 0x539   : > { %p3909_p7 = pnand %p3919_p6, %p6985_p13 }
 0x53b   : > { %5052 = dma.done.wait (!%p3909_p7), %s3382_s11, 512  }
 0x53c   : > { %5054 = vsyncadd (!%p3909_p7), %s3382_s11, 4294966784  ;;  %s25_s28 = sadd.s32 1, %s5097_s28   ;;  %s6986_s24 = sld [smem:[#allocation20_spill]] }
 0x53d   : > { %p22_p4 = scmp.ge.s32.totalorder %s25_s28, 8   ;;  %s6987_s29 = smov %s6999_s25 }
 0x53e   : > { %s6988_s5 = sld [smem:[#allocation23_spill]]  ;;  %s6989_s18 = smov %s5061_s19 }
 0x53f   : > { %s6990_s19 = smov %s5065_s20  ;;  %s6991_s20 = smov %s5341_s3 }
 0x540   : > { %s6992_s21 = smov %s5073_s22  ;;  %s6993_s22 = smov %s5077_s23 }
 0x541   : > { %s6994_s23 = smov %s5344_s4  ;;  %s6995_s25 = smov %s5093_s27 }
 0x542   : > { %s6996_s26 = smov %s6987_s29  ;;  %24 = sbr.rel (!%p22_p4) target bundleno = 17 (0x11), region = 118 }
 0x544   : > { %s6997_s27 = smov %s6988_s5 }
 0x549   :  { %3387 = vsyncpa [#allocation4], 1 }
 0x54a   :  { %3389 = vsyncpa [#allocation4 + $0x1], 1 }
 0x54b   :  { %3390 = vsyncpa [#allocation7], 1 }
 0x54c   :  { %3392 = vsyncpa [#allocation7 + $0x1], 1 }
 0x54d   :  { %3393 = vsyncpa [#allocation10], 1 }
 0x54e   :  { %3394 = vsyncpa [#allocation5], 1 }
 0x54f   :  { %3396 = vsyncpa [#allocation5 + $0x1], 1 }

</bundles_post_ra>
